<compile_context>
chip_gen: v7x
topology: tpu7x:2x2x1
jax: 0.10.0
libtpu: 0.0.40
codegen_flags: <defaults>
</compile_context>

<pallas_src>
import functools

import numpy as np
import jax
import jax.numpy as jnp
from jax import lax
from jax.experimental import pallas as pl
from jax.experimental.pallas import tpu as pltpu

C_IN = 1
C_OUT = 4
K = 3
EPS = 1e-5

CH = 8            # sublane chunk processed per inner-loop iteration (keeps vreg residency)
MAX_B_TILE = 256  # rows (images) per grid step, multiple of CH
MASK_ROWS = 16    # 9 tap masks padded to a (8,128)-friendly sublane count

# 3x3 tap offsets, row-major (t = di*3 + dj), expressed as shifts relative to center.
OFFS = [(di - 1, dj - 1) for di in range(K) for dj in range(K)]

NW1 = C_OUT * K * K           # 36 folded conv1 weights
NW2 = C_OUT * C_OUT * K * K   # 144 folded conv2 weights


def _sfe_kernel(W, params_ref, mask_ref, x_ref, o_ref):
    B, HW = x_ref.shape

    # ---- scalars: read once, above the chunk loop (hoisted, reused every chunk) ----
    w1 = [params_ref[i] for i in range(NW1)]
    w2 = [params_ref[NW1 + i] for i in range(NW2)]
    off = NW1 + NW2
    pw = [params_ref[off + c] for c in range(C_OUT)]                 # folded 1x1 shortcut
    b1 = [params_ref[off + C_OUT + c] for c in range(C_OUT)]         # bias after conv1
    b2 = [params_ref[off + 2 * C_OUT + c] for c in range(C_OUT)]     # fused final bias

    # ---- tap validity masks (lane-only, precomputed host-side), (1, HW) each ----
    masks = [mask_ref[pl.ds(t, 1), :] for t in range(K * K)]

    def shifted(v, t):
        # out[b, q] = v[b, q + sr*W + sc] with zero fill outside the image.
        # Single lane-axis roll is valid for |sr|,|sc| <= 1 and W >= 2 (3x3, pad=1):
        # every wrap position is exactly a masked (out-of-image) position.
        sr, sc = OFFS[t]
        s = sr * W + sc
        if s == 0:
            return v                      # center tap: always valid, no mask
        return pltpu.roll(v, shift=(-s) % HW, axis=1) * masks[t]

    def chunk(r0):
        x = x_ref[pl.ds(r0, CH), :]                       # (CH, HW) f32, lane-dense

        # conv1 (1 -> 4, 3x3, pad=1) with BN scale folded into w1, + bias + ReLU
        h = [jnp.zeros((CH, HW), jnp.float32) for _ in range(C_OUT)]
        for t in range(K * K):
            xs = shifted(x, t)
            for c in range(C_OUT):
                h[c] = h[c] + w1[c * K * K + t] * xs
        for c in range(C_OUT):
            h[c] = jnp.maximum(h[c] + b1[c], 0.0)

        # conv2 (4 -> 4, 3x3, pad=1), tap-outer; BN/bn1 scales folded into w2,
        # shortcut + all biases pre-folded into the accumulator init.
        acc = [pw[c] * x + b2[c] for c in range(C_OUT)]
        for t in range(K * K):
            for cin in range(C_OUT):
                hs = shifted(h[cin], t)
                for c in range(C_OUT):
                    acc[c] = acc[c] + w2[(c * C_OUT + cin) * K * K + t] * hs

        # final ReLU + lane-dense, 128-aligned unmasked stores
        for c in range(C_OUT):
            o_ref[pl.ds(r0, CH), pl.ds(c * HW, HW)] = jnp.maximum(acc[c], 0.0)

    n_chunks = B // CH
    if n_chunks <= 2:
        for i in range(n_chunks):        # static starts, fully unrolled
            chunk(i * CH)
    else:
        @pl.loop(0, n_chunks)
        def _(i):
            chunk(pl.multiple_of(i * CH, CH))


def _round_up(a, b):
    return -(-a // b) * b


def _build_masks(H, W):
    HW = H * W
    p = np.arange(HW)
    ri, ci = p // W, p % W
    m = np.zeros((MASK_ROWS, HW), np.float32)
    for t, (sr, sc) in enumerate(OFFS):
        m[t] = ((ri + sr >= 0) & (ri + sr < H) & (ci + sc >= 0) & (ci + sc < W))
    return jnp.asarray(m)


def _fold_params(params):
    """Fold BN scales/shifts and shortcut bias into conv weights / per-channel biases."""
    bs, bb = params["bs"], params["bb"]       # Block's shared BatchNorm (conv1 & conv2)
    b1s, b1b = params["b1s"], params["b1b"]   # outer bn1
    w1 = params["w1"].reshape(C_OUT, K * K) * bs[:, None]                     # (4, 9)
    w2 = params["w2"].reshape(C_OUT, C_OUT * K * K) * (bs * b1s)[:, None]     # (4, 36)
    pw = params["pw"].reshape(C_OUT) * b1s
    bias1 = bb
    bias2 = b1s * (bb + params["pb"]) + b1b
    return jnp.concatenate(
        [w1.reshape(-1), w2.reshape(-1), pw, bias1, bias2]).astype(jnp.float32)


def spatial_feature_extractor(x, params):
    # x: (N, 1, H, W) float32  ->  (N, 4, H, W) float32 (eval-mode semantics).
    N, cin, H, W = x.shape
    assert cin == C_IN
    HW = H * W

    # Adaptive tile: large enough to amortize per-step overhead, capped so small
    # batches don't pay for huge padding and VMEM stays comfortable on v7x/v5e.
    B = min(MAX_B_TILE, max(CH, _round_up(N, CH)))
    Np = _round_up(N, B)

    x_flat = x.reshape(N, HW)                      # lane-dense repack (C_IN == 1)
    if Np != N:
        x_flat = jnp.pad(x_flat, ((0, Np - N), (0, 0)))

    packed = _fold_params(params)
    mask = _build_masks(H, W)

    out = pl.pallas_call(
        functools.partial(_sfe_kernel, W),
        out_shape=jax.ShapeDtypeStruct((Np, C_OUT * HW), jnp.float32),
        grid_spec=pltpu.PrefetchScalarGridSpec(
            num_scalar_prefetch=0,
            grid=(Np // B,),
            in_specs=[
                pl.BlockSpec(memory_space=pltpu.MemorySpace.SMEM),   # packed scalars
                pl.BlockSpec((MASK_ROWS, HW), lambda n: (0, 0)),     # tap masks (VMEM)
                pl.BlockSpec((B, HW), lambda n: (n, 0)),             # input slab
            ],
            out_specs=pl.BlockSpec((B, C_OUT * HW), lambda n: (n, 0)),
        ),
        compiler_params=pltpu.CompilerParams(
            dimension_semantics=("parallel",)),
    )(packed, mask, x_flat)

    # Channel-concatenated lanes -> (N, C_OUT, H, W) is a free reshape (no transpose).
    return out[:N].reshape(N, C_OUT, H, W)


def ref_forward(x, params):
    """Pure-JAX reference (mirrors the PyTorch module in eval mode)."""
    dn = ("NCHW", "OIHW", "NCHW")

    def conv(v, w):
        return lax.conv_general_dilated(v, w, (1, 1), "SAME",
                                        dimension_numbers=dn)

    def bn(v, s, b):
        return v * s[None, :, None, None] + b[None, :, None, None]

    identity = x
    h = jax.nn.relu(bn(conv(x, params["w1"]), params["bs"], params["bb"]))
    h = bn(conv(h, params["w2"]), params["bs"], params["bb"])
    ident = conv(identity, params["pw"]) + params["pb"][None, :, None, None]
    h = h + ident
    return jax.nn.relu(bn(h, params["b1s"], params["b1b"]))


def make_params(key):
    ks = jax.random.split(key, 12)
    w1 = 0.3 * jax.random.normal(ks[0], (C_OUT, C_IN, K, K), jnp.float32)
    w2 = 0.2 * jax.random.normal(ks[1], (C_OUT, C_OUT, K, K), jnp.float32)
    pw = 0.5 * jax.random.normal(ks[2], (C_OUT, C_IN, 1, 1), jnp.float32)
    pb = 0.1 * jax.random.normal(ks[3], (C_OUT,), jnp.float32)

    def bn_fold(kg, kb, km, kv):
        gamma = 1.0 + 0.1 * jax.random.normal(kg, (C_OUT,), jnp.float32)
        beta = 0.1 * jax.random.normal(kb, (C_OUT,), jnp.float32)
        mean = 0.1 * jax.random.normal(km, (C_OUT,), jnp.float32)
        var = 1.0 + 0.1 * jnp.abs(jax.random.normal(kv, (C_OUT,), jnp.float32))
        scale = gamma * lax.rsqrt(var + EPS)
        shift = beta - mean * scale
        return scale, shift

    # Block's single BatchNorm2d instance (shared by conv1 & conv2 outputs).
    bs, bb = bn_fold(ks[4], ks[5], ks[6], ks[7])
    # Outer bn1.
    b1s, b1b = bn_fold(ks[8], ks[9], ks[10], ks[11])

    # TODO(synk): training-mode Dropout2d / batch-statistics BN are stochastic /
    # batch-dependent; eval-mode (identity dropout, folded running stats) is used.
    return dict(w1=w1, w2=w2, pw=pw, pb=pb, bs=bs, bb=bb, b1s=b1s, b1b=b1b)


if __name__ == "__main__":
    key = jax.random.PRNGKey(0)
    k_x, k_p = jax.random.split(key)
    x = jax.random.normal(k_x, (2, C_IN, 16, 16), jnp.float32)
    params = make_params(k_p)

    out = spatial_feature_extractor(x, params)
    out = jax.block_until_ready(out)

    ref = ref_forward(x, params)
    assert out.shape == (2, C_OUT, 16, 16)
    assert jnp.allclose(out, ref, atol=1e-4, rtol=1e-4), (
        float(jnp.max(jnp.abs(out - ref))))
    print("KERNEL_OK")
</pallas_src>

<mosaic_0001>
module attributes {stable_mosaic.version = 11 : i64} {
  func.func @_sfe_kernel(%arg0: i32, %arg1: memref<192xf32, #tpu.memory_space<smem>>, %arg2: memref<16x256xf32, #tpu.memory_space<vmem>>, %arg3: memref<8x256xf32, #tpu.memory_space<vmem>>, %arg4: memref<8x1024xf32, #tpu.memory_space<vmem>>) attributes {dimension_semantics = [#tpu.dimension_semantics<parallel>], iteration_bounds = array<i64: 1>, scalar_prefetch = 0 : i64, scratch_operands = 0 : i64, tpu.core_type = #tpu.core_type<tc>, window_params = [{transform_indices = @transform_0, window_bounds = array<i64: 192>}, {pipeline_mode = #tpu.pipeline_mode<synchronous>, transform_indices = @transform_1, window_bounds = array<i64: 16, 256>}, {transform_indices = @transform_2, window_bounds = array<i64: 8, 256>}, {transform_indices = @transform_3, window_bounds = array<i64: 8, 1024>}]} {
    %c0 = arith.constant 0 : index
    %0 = memref.load %arg1[%c0] : memref<192xf32, #tpu.memory_space<smem>>
    %c1 = arith.constant 1 : index
    %1 = memref.load %arg1[%c1] : memref<192xf32, #tpu.memory_space<smem>>
    %c2 = arith.constant 2 : index
    %2 = memref.load %arg1[%c2] : memref<192xf32, #tpu.memory_space<smem>>
    %c3 = arith.constant 3 : index
    %3 = memref.load %arg1[%c3] : memref<192xf32, #tpu.memory_space<smem>>
    %c4 = arith.constant 4 : index
    %4 = memref.load %arg1[%c4] : memref<192xf32, #tpu.memory_space<smem>>
    %c5 = arith.constant 5 : index
    %5 = memref.load %arg1[%c5] : memref<192xf32, #tpu.memory_space<smem>>
    %c6 = arith.constant 6 : index
    %6 = memref.load %arg1[%c6] : memref<192xf32, #tpu.memory_space<smem>>
    %c7 = arith.constant 7 : index
    %7 = memref.load %arg1[%c7] : memref<192xf32, #tpu.memory_space<smem>>
    %c8 = arith.constant 8 : index
    %8 = memref.load %arg1[%c8] : memref<192xf32, #tpu.memory_space<smem>>
    %c9 = arith.constant 9 : index
    %9 = memref.load %arg1[%c9] : memref<192xf32, #tpu.memory_space<smem>>
    %c10 = arith.constant 10 : index
    %10 = memref.load %arg1[%c10] : memref<192xf32, #tpu.memory_space<smem>>
    %c11 = arith.constant 11 : index
    %11 = memref.load %arg1[%c11] : memref<192xf32, #tpu.memory_space<smem>>
    %c12 = arith.constant 12 : index
    %12 = memref.load %arg1[%c12] : memref<192xf32, #tpu.memory_space<smem>>
    %c13 = arith.constant 13 : index
    %13 = memref.load %arg1[%c13] : memref<192xf32, #tpu.memory_space<smem>>
    %c14 = arith.constant 14 : index
    %14 = memref.load %arg1[%c14] : memref<192xf32, #tpu.memory_space<smem>>
    %c15 = arith.constant 15 : index
    %15 = memref.load %arg1[%c15] : memref<192xf32, #tpu.memory_space<smem>>
    %c16 = arith.constant 16 : index
    %16 = memref.load %arg1[%c16] : memref<192xf32, #tpu.memory_space<smem>>
    %c17 = arith.constant 17 : index
    %17 = memref.load %arg1[%c17] : memref<192xf32, #tpu.memory_space<smem>>
    %c18 = arith.constant 18 : index
    %18 = memref.load %arg1[%c18] : memref<192xf32, #tpu.memory_space<smem>>
    %c19 = arith.constant 19 : index
    %19 = memref.load %arg1[%c19] : memref<192xf32, #tpu.memory_space<smem>>
    %c20 = arith.constant 20 : index
    %20 = memref.load %arg1[%c20] : memref<192xf32, #tpu.memory_space<smem>>
    %c21 = arith.constant 21 : index
    %21 = memref.load %arg1[%c21] : memref<192xf32, #tpu.memory_space<smem>>
    %c22 = arith.constant 22 : index
    %22 = memref.load %arg1[%c22] : memref<192xf32, #tpu.memory_space<smem>>
    %c23 = arith.constant 23 : index
    %23 = memref.load %arg1[%c23] : memref<192xf32, #tpu.memory_space<smem>>
    %c24 = arith.constant 24 : index
    %24 = memref.load %arg1[%c24] : memref<192xf32, #tpu.memory_space<smem>>
    %c25 = arith.constant 25 : index
    %25 = memref.load %arg1[%c25] : memref<192xf32, #tpu.memory_space<smem>>
    %c26 = arith.constant 26 : index
    %26 = memref.load %arg1[%c26] : memref<192xf32, #tpu.memory_space<smem>>
    %c27 = arith.constant 27 : index
    %27 = memref.load %arg1[%c27] : memref<192xf32, #tpu.memory_space<smem>>
    %c28 = arith.constant 28 : index
    %28 = memref.load %arg1[%c28] : memref<192xf32, #tpu.memory_space<smem>>
    %c29 = arith.constant 29 : index
    %29 = memref.load %arg1[%c29] : memref<192xf32, #tpu.memory_space<smem>>
    %c30 = arith.constant 30 : index
    %30 = memref.load %arg1[%c30] : memref<192xf32, #tpu.memory_space<smem>>
    %c31 = arith.constant 31 : index
    %31 = memref.load %arg1[%c31] : memref<192xf32, #tpu.memory_space<smem>>
    %c32 = arith.constant 32 : index
    %32 = memref.load %arg1[%c32] : memref<192xf32, #tpu.memory_space<smem>>
    %c33 = arith.constant 33 : index
    %33 = memref.load %arg1[%c33] : memref<192xf32, #tpu.memory_space<smem>>
    %c34 = arith.constant 34 : index
    %34 = memref.load %arg1[%c34] : memref<192xf32, #tpu.memory_space<smem>>
    %c35 = arith.constant 35 : index
    %35 = memref.load %arg1[%c35] : memref<192xf32, #tpu.memory_space<smem>>
    %c36 = arith.constant 36 : index
    %36 = memref.load %arg1[%c36] : memref<192xf32, #tpu.memory_space<smem>>
    %c37 = arith.constant 37 : index
    %37 = memref.load %arg1[%c37] : memref<192xf32, #tpu.memory_space<smem>>
    %c38 = arith.constant 38 : index
    %38 = memref.load %arg1[%c38] : memref<192xf32, #tpu.memory_space<smem>>
    %c39 = arith.constant 39 : index
    %39 = memref.load %arg1[%c39] : memref<192xf32, #tpu.memory_space<smem>>
    %c40 = arith.constant 40 : index
    %40 = memref.load %arg1[%c40] : memref<192xf32, #tpu.memory_space<smem>>
    %c41 = arith.constant 41 : index
    %41 = memref.load %arg1[%c41] : memref<192xf32, #tpu.memory_space<smem>>
    %c42 = arith.constant 42 : index
    %42 = memref.load %arg1[%c42] : memref<192xf32, #tpu.memory_space<smem>>
    %c43 = arith.constant 43 : index
    %43 = memref.load %arg1[%c43] : memref<192xf32, #tpu.memory_space<smem>>
    %c44 = arith.constant 44 : index
    %44 = memref.load %arg1[%c44] : memref<192xf32, #tpu.memory_space<smem>>
    %c45 = arith.constant 45 : index
    %45 = memref.load %arg1[%c45] : memref<192xf32, #tpu.memory_space<smem>>
    %c46 = arith.constant 46 : index
    %46 = memref.load %arg1[%c46] : memref<192xf32, #tpu.memory_space<smem>>
    %c47 = arith.constant 47 : index
    %47 = memref.load %arg1[%c47] : memref<192xf32, #tpu.memory_space<smem>>
    %c48 = arith.constant 48 : index
    %48 = memref.load %arg1[%c48] : memref<192xf32, #tpu.memory_space<smem>>
    %c49 = arith.constant 49 : index
    %49 = memref.load %arg1[%c49] : memref<192xf32, #tpu.memory_space<smem>>
    %c50 = arith.constant 50 : index
    %50 = memref.load %arg1[%c50] : memref<192xf32, #tpu.memory_space<smem>>
    %c51 = arith.constant 51 : index
    %51 = memref.load %arg1[%c51] : memref<192xf32, #tpu.memory_space<smem>>
    %c52 = arith.constant 52 : index
    %52 = memref.load %arg1[%c52] : memref<192xf32, #tpu.memory_space<smem>>
    %c53 = arith.constant 53 : index
    %53 = memref.load %arg1[%c53] : memref<192xf32, #tpu.memory_space<smem>>
    %c54 = arith.constant 54 : index
    %54 = memref.load %arg1[%c54] : memref<192xf32, #tpu.memory_space<smem>>
    %c55 = arith.constant 55 : index
    %55 = memref.load %arg1[%c55] : memref<192xf32, #tpu.memory_space<smem>>
    %c56 = arith.constant 56 : index
    %56 = memref.load %arg1[%c56] : memref<192xf32, #tpu.memory_space<smem>>
    %c57 = arith.constant 57 : index
    %57 = memref.load %arg1[%c57] : memref<192xf32, #tpu.memory_space<smem>>
    %c58 = arith.constant 58 : index
    %58 = memref.load %arg1[%c58] : memref<192xf32, #tpu.memory_space<smem>>
    %c59 = arith.constant 59 : index
    %59 = memref.load %arg1[%c59] : memref<192xf32, #tpu.memory_space<smem>>
    %c60 = arith.constant 60 : index
    %60 = memref.load %arg1[%c60] : memref<192xf32, #tpu.memory_space<smem>>
    %c61 = arith.constant 61 : index
    %61 = memref.load %arg1[%c61] : memref<192xf32, #tpu.memory_space<smem>>
    %c62 = arith.constant 62 : index
    %62 = memref.load %arg1[%c62] : memref<192xf32, #tpu.memory_space<smem>>
    %c63 = arith.constant 63 : index
    %63 = memref.load %arg1[%c63] : memref<192xf32, #tpu.memory_space<smem>>
    %c64 = arith.constant 64 : index
    %64 = memref.load %arg1[%c64] : memref<192xf32, #tpu.memory_space<smem>>
    %c65 = arith.constant 65 : index
    %65 = memref.load %arg1[%c65] : memref<192xf32, #tpu.memory_space<smem>>
    %c66 = arith.constant 66 : index
    %66 = memref.load %arg1[%c66] : memref<192xf32, #tpu.memory_space<smem>>
    %c67 = arith.constant 67 : index
    %67 = memref.load %arg1[%c67] : memref<192xf32, #tpu.memory_space<smem>>
    %c68 = arith.constant 68 : index
    %68 = memref.load %arg1[%c68] : memref<192xf32, #tpu.memory_space<smem>>
    %c69 = arith.constant 69 : index
    %69 = memref.load %arg1[%c69] : memref<192xf32, #tpu.memory_space<smem>>
    %c70 = arith.constant 70 : index
    %70 = memref.load %arg1[%c70] : memref<192xf32, #tpu.memory_space<smem>>
    %c71 = arith.constant 71 : index
    %71 = memref.load %arg1[%c71] : memref<192xf32, #tpu.memory_space<smem>>
    %c72 = arith.constant 72 : index
    %72 = memref.load %arg1[%c72] : memref<192xf32, #tpu.memory_space<smem>>
    %c73 = arith.constant 73 : index
    %73 = memref.load %arg1[%c73] : memref<192xf32, #tpu.memory_space<smem>>
    %c74 = arith.constant 74 : index
    %74 = memref.load %arg1[%c74] : memref<192xf32, #tpu.memory_space<smem>>
    %c75 = arith.constant 75 : index
    %75 = memref.load %arg1[%c75] : memref<192xf32, #tpu.memory_space<smem>>
    %c76 = arith.constant 76 : index
    %76 = memref.load %arg1[%c76] : memref<192xf32, #tpu.memory_space<smem>>
    %c77 = arith.constant 77 : index
    %77 = memref.load %arg1[%c77] : memref<192xf32, #tpu.memory_space<smem>>
    %c78 = arith.constant 78 : index
    %78 = memref.load %arg1[%c78] : memref<192xf32, #tpu.memory_space<smem>>
    %c79 = arith.constant 79 : index
    %79 = memref.load %arg1[%c79] : memref<192xf32, #tpu.memory_space<smem>>
    %c80 = arith.constant 80 : index
    %80 = memref.load %arg1[%c80] : memref<192xf32, #tpu.memory_space<smem>>
    %c81 = arith.constant 81 : index
    %81 = memref.load %arg1[%c81] : memref<192xf32, #tpu.memory_space<smem>>
    %c82 = arith.constant 82 : index
    %82 = memref.load %arg1[%c82] : memref<192xf32, #tpu.memory_space<smem>>
    %c83 = arith.constant 83 : index
    %83 = memref.load %arg1[%c83] : memref<192xf32, #tpu.memory_space<smem>>
    %c84 = arith.constant 84 : index
    %84 = memref.load %arg1[%c84] : memref<192xf32, #tpu.memory_space<smem>>
    %c85 = arith.constant 85 : index
    %85 = memref.load %arg1[%c85] : memref<192xf32, #tpu.memory_space<smem>>
    %c86 = arith.constant 86 : index
    %86 = memref.load %arg1[%c86] : memref<192xf32, #tpu.memory_space<smem>>
    %c87 = arith.constant 87 : index
    %87 = memref.load %arg1[%c87] : memref<192xf32, #tpu.memory_space<smem>>
    %c88 = arith.constant 88 : index
    %88 = memref.load %arg1[%c88] : memref<192xf32, #tpu.memory_space<smem>>
    %c89 = arith.constant 89 : index
    %89 = memref.load %arg1[%c89] : memref<192xf32, #tpu.memory_space<smem>>
    %c90 = arith.constant 90 : index
    %90 = memref.load %arg1[%c90] : memref<192xf32, #tpu.memory_space<smem>>
    %c91 = arith.constant 91 : index
    %91 = memref.load %arg1[%c91] : memref<192xf32, #tpu.memory_space<smem>>
    %c92 = arith.constant 92 : index
    %92 = memref.load %arg1[%c92] : memref<192xf32, #tpu.memory_space<smem>>
    %c93 = arith.constant 93 : index
    %93 = memref.load %arg1[%c93] : memref<192xf32, #tpu.memory_space<smem>>
    %c94 = arith.constant 94 : index
    %94 = memref.load %arg1[%c94] : memref<192xf32, #tpu.memory_space<smem>>
    %c95 = arith.constant 95 : index
    %95 = memref.load %arg1[%c95] : memref<192xf32, #tpu.memory_space<smem>>
    %c96 = arith.constant 96 : index
    %96 = memref.load %arg1[%c96] : memref<192xf32, #tpu.memory_space<smem>>
    %c97 = arith.constant 97 : index
    %97 = memref.load %arg1[%c97] : memref<192xf32, #tpu.memory_space<smem>>
    %c98 = arith.constant 98 : index
    %98 = memref.load %arg1[%c98] : memref<192xf32, #tpu.memory_space<smem>>
    %c99 = arith.constant 99 : index
    %99 = memref.load %arg1[%c99] : memref<192xf32, #tpu.memory_space<smem>>
    %c100 = arith.constant 100 : index
    %100 = memref.load %arg1[%c100] : memref<192xf32, #tpu.memory_space<smem>>
    %c101 = arith.constant 101 : index
    %101 = memref.load %arg1[%c101] : memref<192xf32, #tpu.memory_space<smem>>
    %c102 = arith.constant 102 : index
    %102 = memref.load %arg1[%c102] : memref<192xf32, #tpu.memory_space<smem>>
    %c103 = arith.constant 103 : index
    %103 = memref.load %arg1[%c103] : memref<192xf32, #tpu.memory_space<smem>>
    %c104 = arith.constant 104 : index
    %104 = memref.load %arg1[%c104] : memref<192xf32, #tpu.memory_space<smem>>
    %c105 = arith.constant 105 : index
    %105 = memref.load %arg1[%c105] : memref<192xf32, #tpu.memory_space<smem>>
    %c106 = arith.constant 106 : index
    %106 = memref.load %arg1[%c106] : memref<192xf32, #tpu.memory_space<smem>>
    %c107 = arith.constant 107 : index
    %107 = memref.load %arg1[%c107] : memref<192xf32, #tpu.memory_space<smem>>
    %c108 = arith.constant 108 : index
    %108 = memref.load %arg1[%c108] : memref<192xf32, #tpu.memory_space<smem>>
    %c109 = arith.constant 109 : index
    %109 = memref.load %arg1[%c109] : memref<192xf32, #tpu.memory_space<smem>>
    %c110 = arith.constant 110 : index
    %110 = memref.load %arg1[%c110] : memref<192xf32, #tpu.memory_space<smem>>
    %c111 = arith.constant 111 : index
    %111 = memref.load %arg1[%c111] : memref<192xf32, #tpu.memory_space<smem>>
    %c112 = arith.constant 112 : index
    %112 = memref.load %arg1[%c112] : memref<192xf32, #tpu.memory_space<smem>>
    %c113 = arith.constant 113 : index
    %113 = memref.load %arg1[%c113] : memref<192xf32, #tpu.memory_space<smem>>
    %c114 = arith.constant 114 : index
    %114 = memref.load %arg1[%c114] : memref<192xf32, #tpu.memory_space<smem>>
    %c115 = arith.constant 115 : index
    %115 = memref.load %arg1[%c115] : memref<192xf32, #tpu.memory_space<smem>>
    %c116 = arith.constant 116 : index
    %116 = memref.load %arg1[%c116] : memref<192xf32, #tpu.memory_space<smem>>
    %c117 = arith.constant 117 : index
    %117 = memref.load %arg1[%c117] : memref<192xf32, #tpu.memory_space<smem>>
    %c118 = arith.constant 118 : index
    %118 = memref.load %arg1[%c118] : memref<192xf32, #tpu.memory_space<smem>>
    %c119 = arith.constant 119 : index
    %119 = memref.load %arg1[%c119] : memref<192xf32, #tpu.memory_space<smem>>
    %c120 = arith.constant 120 : index
    %120 = memref.load %arg1[%c120] : memref<192xf32, #tpu.memory_space<smem>>
    %c121 = arith.constant 121 : index
    %121 = memref.load %arg1[%c121] : memref<192xf32, #tpu.memory_space<smem>>
    %c122 = arith.constant 122 : index
    %122 = memref.load %arg1[%c122] : memref<192xf32, #tpu.memory_space<smem>>
    %c123 = arith.constant 123 : index
    %123 = memref.load %arg1[%c123] : memref<192xf32, #tpu.memory_space<smem>>
    %c124 = arith.constant 124 : index
    %124 = memref.load %arg1[%c124] : memref<192xf32, #tpu.memory_space<smem>>
    %c125 = arith.constant 125 : index
    %125 = memref.load %arg1[%c125] : memref<192xf32, #tpu.memory_space<smem>>
    %c126 = arith.constant 126 : index
    %126 = memref.load %arg1[%c126] : memref<192xf32, #tpu.memory_space<smem>>
    %c127 = arith.constant 127 : index
    %127 = memref.load %arg1[%c127] : memref<192xf32, #tpu.memory_space<smem>>
    %c128 = arith.constant 128 : index
    %128 = memref.load %arg1[%c128] : memref<192xf32, #tpu.memory_space<smem>>
    %c129 = arith.constant 129 : index
    %129 = memref.load %arg1[%c129] : memref<192xf32, #tpu.memory_space<smem>>
    %c130 = arith.constant 130 : index
    %130 = memref.load %arg1[%c130] : memref<192xf32, #tpu.memory_space<smem>>
    %c131 = arith.constant 131 : index
    %131 = memref.load %arg1[%c131] : memref<192xf32, #tpu.memory_space<smem>>
    %c132 = arith.constant 132 : index
    %132 = memref.load %arg1[%c132] : memref<192xf32, #tpu.memory_space<smem>>
    %c133 = arith.constant 133 : index
    %133 = memref.load %arg1[%c133] : memref<192xf32, #tpu.memory_space<smem>>
    %c134 = arith.constant 134 : index
    %134 = memref.load %arg1[%c134] : memref<192xf32, #tpu.memory_space<smem>>
    %c135 = arith.constant 135 : index
    %135 = memref.load %arg1[%c135] : memref<192xf32, #tpu.memory_space<smem>>
    %c136 = arith.constant 136 : index
    %136 = memref.load %arg1[%c136] : memref<192xf32, #tpu.memory_space<smem>>
    %c137 = arith.constant 137 : index
    %137 = memref.load %arg1[%c137] : memref<192xf32, #tpu.memory_space<smem>>
    %c138 = arith.constant 138 : index
    %138 = memref.load %arg1[%c138] : memref<192xf32, #tpu.memory_space<smem>>
    %c139 = arith.constant 139 : index
    %139 = memref.load %arg1[%c139] : memref<192xf32, #tpu.memory_space<smem>>
    %c140 = arith.constant 140 : index
    %140 = memref.load %arg1[%c140] : memref<192xf32, #tpu.memory_space<smem>>
    %c141 = arith.constant 141 : index
    %141 = memref.load %arg1[%c141] : memref<192xf32, #tpu.memory_space<smem>>
    %c142 = arith.constant 142 : index
    %142 = memref.load %arg1[%c142] : memref<192xf32, #tpu.memory_space<smem>>
    %c143 = arith.constant 143 : index
    %143 = memref.load %arg1[%c143] : memref<192xf32, #tpu.memory_space<smem>>
    %c144 = arith.constant 144 : index
    %144 = memref.load %arg1[%c144] : memref<192xf32, #tpu.memory_space<smem>>
    %c145 = arith.constant 145 : index
    %145 = memref.load %arg1[%c145] : memref<192xf32, #tpu.memory_space<smem>>
    %c146 = arith.constant 146 : index
    %146 = memref.load %arg1[%c146] : memref<192xf32, #tpu.memory_space<smem>>
    %c147 = arith.constant 147 : index
    %147 = memref.load %arg1[%c147] : memref<192xf32, #tpu.memory_space<smem>>
    %c148 = arith.constant 148 : index
    %148 = memref.load %arg1[%c148] : memref<192xf32, #tpu.memory_space<smem>>
    %c149 = arith.constant 149 : index
    %149 = memref.load %arg1[%c149] : memref<192xf32, #tpu.memory_space<smem>>
    %c150 = arith.constant 150 : index
    %150 = memref.load %arg1[%c150] : memref<192xf32, #tpu.memory_space<smem>>
    %c151 = arith.constant 151 : index
    %151 = memref.load %arg1[%c151] : memref<192xf32, #tpu.memory_space<smem>>
    %c152 = arith.constant 152 : index
    %152 = memref.load %arg1[%c152] : memref<192xf32, #tpu.memory_space<smem>>
    %c153 = arith.constant 153 : index
    %153 = memref.load %arg1[%c153] : memref<192xf32, #tpu.memory_space<smem>>
    %c154 = arith.constant 154 : index
    %154 = memref.load %arg1[%c154] : memref<192xf32, #tpu.memory_space<smem>>
    %c155 = arith.constant 155 : index
    %155 = memref.load %arg1[%c155] : memref<192xf32, #tpu.memory_space<smem>>
    %c156 = arith.constant 156 : index
    %156 = memref.load %arg1[%c156] : memref<192xf32, #tpu.memory_space<smem>>
    %c157 = arith.constant 157 : index
    %157 = memref.load %arg1[%c157] : memref<192xf32, #tpu.memory_space<smem>>
    %c158 = arith.constant 158 : index
    %158 = memref.load %arg1[%c158] : memref<192xf32, #tpu.memory_space<smem>>
    %c159 = arith.constant 159 : index
    %159 = memref.load %arg1[%c159] : memref<192xf32, #tpu.memory_space<smem>>
    %c160 = arith.constant 160 : index
    %160 = memref.load %arg1[%c160] : memref<192xf32, #tpu.memory_space<smem>>
    %c161 = arith.constant 161 : index
    %161 = memref.load %arg1[%c161] : memref<192xf32, #tpu.memory_space<smem>>
    %c162 = arith.constant 162 : index
    %162 = memref.load %arg1[%c162] : memref<192xf32, #tpu.memory_space<smem>>
    %c163 = arith.constant 163 : index
    %163 = memref.load %arg1[%c163] : memref<192xf32, #tpu.memory_space<smem>>
    %c164 = arith.constant 164 : index
    %164 = memref.load %arg1[%c164] : memref<192xf32, #tpu.memory_space<smem>>
    %c165 = arith.constant 165 : index
    %165 = memref.load %arg1[%c165] : memref<192xf32, #tpu.memory_space<smem>>
    %c166 = arith.constant 166 : index
    %166 = memref.load %arg1[%c166] : memref<192xf32, #tpu.memory_space<smem>>
    %c167 = arith.constant 167 : index
    %167 = memref.load %arg1[%c167] : memref<192xf32, #tpu.memory_space<smem>>
    %c168 = arith.constant 168 : index
    %168 = memref.load %arg1[%c168] : memref<192xf32, #tpu.memory_space<smem>>
    %c169 = arith.constant 169 : index
    %169 = memref.load %arg1[%c169] : memref<192xf32, #tpu.memory_space<smem>>
    %c170 = arith.constant 170 : index
    %170 = memref.load %arg1[%c170] : memref<192xf32, #tpu.memory_space<smem>>
    %c171 = arith.constant 171 : index
    %171 = memref.load %arg1[%c171] : memref<192xf32, #tpu.memory_space<smem>>
    %c172 = arith.constant 172 : index
    %172 = memref.load %arg1[%c172] : memref<192xf32, #tpu.memory_space<smem>>
    %c173 = arith.constant 173 : index
    %173 = memref.load %arg1[%c173] : memref<192xf32, #tpu.memory_space<smem>>
    %c174 = arith.constant 174 : index
    %174 = memref.load %arg1[%c174] : memref<192xf32, #tpu.memory_space<smem>>
    %c175 = arith.constant 175 : index
    %175 = memref.load %arg1[%c175] : memref<192xf32, #tpu.memory_space<smem>>
    %c176 = arith.constant 176 : index
    %176 = memref.load %arg1[%c176] : memref<192xf32, #tpu.memory_space<smem>>
    %c177 = arith.constant 177 : index
    %177 = memref.load %arg1[%c177] : memref<192xf32, #tpu.memory_space<smem>>
    %c178 = arith.constant 178 : index
    %178 = memref.load %arg1[%c178] : memref<192xf32, #tpu.memory_space<smem>>
    %c179 = arith.constant 179 : index
    %179 = memref.load %arg1[%c179] : memref<192xf32, #tpu.memory_space<smem>>
    %c180 = arith.constant 180 : index
    %180 = memref.load %arg1[%c180] : memref<192xf32, #tpu.memory_space<smem>>
    %c181 = arith.constant 181 : index
    %181 = memref.load %arg1[%c181] : memref<192xf32, #tpu.memory_space<smem>>
    %c182 = arith.constant 182 : index
    %182 = memref.load %arg1[%c182] : memref<192xf32, #tpu.memory_space<smem>>
    %c183 = arith.constant 183 : index
    %183 = memref.load %arg1[%c183] : memref<192xf32, #tpu.memory_space<smem>>
    %c184 = arith.constant 184 : index
    %184 = memref.load %arg1[%c184] : memref<192xf32, #tpu.memory_space<smem>>
    %c185 = arith.constant 185 : index
    %185 = memref.load %arg1[%c185] : memref<192xf32, #tpu.memory_space<smem>>
    %c186 = arith.constant 186 : index
    %186 = memref.load %arg1[%c186] : memref<192xf32, #tpu.memory_space<smem>>
    %c187 = arith.constant 187 : index
    %187 = memref.load %arg1[%c187] : memref<192xf32, #tpu.memory_space<smem>>
    %c188 = arith.constant 188 : index
    %188 = memref.load %arg1[%c188] : memref<192xf32, #tpu.memory_space<smem>>
    %c189 = arith.constant 189 : index
    %189 = memref.load %arg1[%c189] : memref<192xf32, #tpu.memory_space<smem>>
    %c190 = arith.constant 190 : index
    %190 = memref.load %arg1[%c190] : memref<192xf32, #tpu.memory_space<smem>>
    %c191 = arith.constant 191 : index
    %191 = memref.load %arg1[%c191] : memref<192xf32, #tpu.memory_space<smem>>
    %c0_0 = arith.constant 0 : index
    %c0_1 = arith.constant 0 : index
    %192 = vector.load %arg2[%c0_0, %c0_1] : memref<16x256xf32, #tpu.memory_space<vmem>>, vector<1x256xf32>
    %c1_2 = arith.constant 1 : index
    %c0_3 = arith.constant 0 : index
    %193 = vector.load %arg2[%c1_2, %c0_3] : memref<16x256xf32, #tpu.memory_space<vmem>>, vector<1x256xf32>
    %c2_4 = arith.constant 2 : index
    %c0_5 = arith.constant 0 : index
    %194 = vector.load %arg2[%c2_4, %c0_5] : memref<16x256xf32, #tpu.memory_space<vmem>>, vector<1x256xf32>
    %c3_6 = arith.constant 3 : index
    %c0_7 = arith.constant 0 : index
    %195 = vector.load %arg2[%c3_6, %c0_7] : memref<16x256xf32, #tpu.memory_space<vmem>>, vector<1x256xf32>
    %c5_8 = arith.constant 5 : index
    %c0_9 = arith.constant 0 : index
    %196 = vector.load %arg2[%c5_8, %c0_9] : memref<16x256xf32, #tpu.memory_space<vmem>>, vector<1x256xf32>
    %c6_10 = arith.constant 6 : index
    %c0_11 = arith.constant 0 : index
    %197 = vector.load %arg2[%c6_10, %c0_11] : memref<16x256xf32, #tpu.memory_space<vmem>>, vector<1x256xf32>
    %c7_12 = arith.constant 7 : index
    %c0_13 = arith.constant 0 : index
    %198 = vector.load %arg2[%c7_12, %c0_13] : memref<16x256xf32, #tpu.memory_space<vmem>>, vector<1x256xf32>
    %c8_14 = arith.constant 8 : index
    %c0_15 = arith.constant 0 : index
    %199 = vector.load %arg2[%c8_14, %c0_15] : memref<16x256xf32, #tpu.memory_space<vmem>>, vector<1x256xf32>
    %c0_16 = arith.constant 0 : index
    %c0_17 = arith.constant 0 : index
    %200 = vector.load %arg3[%c0_16, %c0_17] : memref<8x256xf32, #tpu.memory_space<vmem>>, vector<8x256xf32>
    %cst = arith.constant 0.000000e+00 : f32
    %201 = vector.broadcast %cst : f32 to vector<8x256xf32>
    %cst_18 = arith.constant 0.000000e+00 : f32
    %202 = vector.broadcast %cst_18 : f32 to vector<8x256xf32>
    %cst_19 = arith.constant 0.000000e+00 : f32
    %203 = vector.broadcast %cst_19 : f32 to vector<8x256xf32>
    %cst_20 = arith.constant 0.000000e+00 : f32
    %204 = vector.broadcast %cst_20 : f32 to vector<8x256xf32>
    %c17_i32 = arith.constant 17 : i32
    %205 = tpu.dynamic_rotate %200 by %c17_i32 dim 1 : vector<8x256xf32>, i32 -> vector<8x256xf32>
    %206 = vector.broadcast %192 : vector<1x256xf32> to vector<8x256xf32>
    %207 = arith.mulf %205, %206 : vector<8x256xf32>
    %208 = vector.broadcast %0 : f32 to vector<8x256xf32>
    %209 = arith.mulf %208, %207 : vector<8x256xf32>
    %210 = arith.addf %201, %209 : vector<8x256xf32>
    %211 = vector.broadcast %9 : f32 to vector<8x256xf32>
    %212 = arith.mulf %211, %207 : vector<8x256xf32>
    %213 = arith.addf %202, %212 : vector<8x256xf32>
    %214 = vector.broadcast %18 : f32 to vector<8x256xf32>
    %215 = arith.mulf %214, %207 : vector<8x256xf32>
    %216 = arith.addf %203, %215 : vector<8x256xf32>
    %217 = vector.broadcast %27 : f32 to vector<8x256xf32>
    %218 = arith.mulf %217, %207 : vector<8x256xf32>
    %219 = arith.addf %204, %218 : vector<8x256xf32>
    %c16_i32 = arith.constant 16 : i32
    %220 = tpu.dynamic_rotate %200 by %c16_i32 dim 1 : vector<8x256xf32>, i32 -> vector<8x256xf32>
    %221 = vector.broadcast %193 : vector<1x256xf32> to vector<8x256xf32>
    %222 = arith.mulf %220, %221 : vector<8x256xf32>
    %223 = vector.broadcast %1 : f32 to vector<8x256xf32>
    %224 = arith.mulf %223, %222 : vector<8x256xf32>
    %225 = arith.addf %210, %224 : vector<8x256xf32>
    %226 = vector.broadcast %10 : f32 to vector<8x256xf32>
    %227 = arith.mulf %226, %222 : vector<8x256xf32>
    %228 = arith.addf %213, %227 : vector<8x256xf32>
    %229 = vector.broadcast %19 : f32 to vector<8x256xf32>
    %230 = arith.mulf %229, %222 : vector<8x256xf32>
    %231 = arith.addf %216, %230 : vector<8x256xf32>
    %232 = vector.broadcast %28 : f32 to vector<8x256xf32>
    %233 = arith.mulf %232, %222 : vector<8x256xf32>
    %234 = arith.addf %219, %233 : vector<8x256xf32>
    %c15_i32 = arith.constant 15 : i32
    %235 = tpu.dynamic_rotate %200 by %c15_i32 dim 1 : vector<8x256xf32>, i32 -> vector<8x256xf32>
    %236 = vector.broadcast %194 : vector<1x256xf32> to vector<8x256xf32>
    %237 = arith.mulf %235, %236 : vector<8x256xf32>
    %238 = vector.broadcast %2 : f32 to vector<8x256xf32>
    %239 = arith.mulf %238, %237 : vector<8x256xf32>
    %240 = arith.addf %225, %239 : vector<8x256xf32>
    %241 = vector.broadcast %11 : f32 to vector<8x256xf32>
    %242 = arith.mulf %241, %237 : vector<8x256xf32>
    %243 = arith.addf %228, %242 : vector<8x256xf32>
    %244 = vector.broadcast %20 : f32 to vector<8x256xf32>
    %245 = arith.mulf %244, %237 : vector<8x256xf32>
    %246 = arith.addf %231, %245 : vector<8x256xf32>
    %247 = vector.broadcast %29 : f32 to vector<8x256xf32>
    %248 = arith.mulf %247, %237 : vector<8x256xf32>
    %249 = arith.addf %234, %248 : vector<8x256xf32>
    %c1_i32 = arith.constant 1 : i32
    %250 = tpu.dynamic_rotate %200 by %c1_i32 dim 1 : vector<8x256xf32>, i32 -> vector<8x256xf32>
    %251 = vector.broadcast %195 : vector<1x256xf32> to vector<8x256xf32>
    %252 = arith.mulf %250, %251 : vector<8x256xf32>
    %253 = vector.broadcast %3 : f32 to vector<8x256xf32>
    %254 = arith.mulf %253, %252 : vector<8x256xf32>
    %255 = arith.addf %240, %254 : vector<8x256xf32>
    %256 = vector.broadcast %12 : f32 to vector<8x256xf32>
    %257 = arith.mulf %256, %252 : vector<8x256xf32>
    %258 = arith.addf %243, %257 : vector<8x256xf32>
    %259 = vector.broadcast %21 : f32 to vector<8x256xf32>
    %260 = arith.mulf %259, %252 : vector<8x256xf32>
    %261 = arith.addf %246, %260 : vector<8x256xf32>
    %262 = vector.broadcast %30 : f32 to vector<8x256xf32>
    %263 = arith.mulf %262, %252 : vector<8x256xf32>
    %264 = arith.addf %249, %263 : vector<8x256xf32>
    %265 = vector.broadcast %4 : f32 to vector<8x256xf32>
    %266 = arith.mulf %265, %200 : vector<8x256xf32>
    %267 = arith.addf %255, %266 : vector<8x256xf32>
    %268 = vector.broadcast %13 : f32 to vector<8x256xf32>
    %269 = arith.mulf %268, %200 : vector<8x256xf32>
    %270 = arith.addf %258, %269 : vector<8x256xf32>
    %271 = vector.broadcast %22 : f32 to vector<8x256xf32>
    %272 = arith.mulf %271, %200 : vector<8x256xf32>
    %273 = arith.addf %261, %272 : vector<8x256xf32>
    %274 = vector.broadcast %31 : f32 to vector<8x256xf32>
    %275 = arith.mulf %274, %200 : vector<8x256xf32>
    %276 = arith.addf %264, %275 : vector<8x256xf32>
    %c255_i32 = arith.constant 255 : i32
    %277 = tpu.dynamic_rotate %200 by %c255_i32 dim 1 : vector<8x256xf32>, i32 -> vector<8x256xf32>
    %278 = vector.broadcast %196 : vector<1x256xf32> to vector<8x256xf32>
    %279 = arith.mulf %277, %278 : vector<8x256xf32>
    %280 = vector.broadcast %5 : f32 to vector<8x256xf32>
    %281 = arith.mulf %280, %279 : vector<8x256xf32>
    %282 = arith.addf %267, %281 : vector<8x256xf32>
    %283 = vector.broadcast %14 : f32 to vector<8x256xf32>
    %284 = arith.mulf %283, %279 : vector<8x256xf32>
    %285 = arith.addf %270, %284 : vector<8x256xf32>
    %286 = vector.broadcast %23 : f32 to vector<8x256xf32>
    %287 = arith.mulf %286, %279 : vector<8x256xf32>
    %288 = arith.addf %273, %287 : vector<8x256xf32>
    %289 = vector.broadcast %32 : f32 to vector<8x256xf32>
    %290 = arith.mulf %289, %279 : vector<8x256xf32>
    %291 = arith.addf %276, %290 : vector<8x256xf32>
    %c241_i32 = arith.constant 241 : i32
    %292 = tpu.dynamic_rotate %200 by %c241_i32 dim 1 : vector<8x256xf32>, i32 -> vector<8x256xf32>
    %293 = vector.broadcast %197 : vector<1x256xf32> to vector<8x256xf32>
    %294 = arith.mulf %292, %293 : vector<8x256xf32>
    %295 = vector.broadcast %6 : f32 to vector<8x256xf32>
    %296 = arith.mulf %295, %294 : vector<8x256xf32>
    %297 = arith.addf %282, %296 : vector<8x256xf32>
    %298 = vector.broadcast %15 : f32 to vector<8x256xf32>
    %299 = arith.mulf %298, %294 : vector<8x256xf32>
    %300 = arith.addf %285, %299 : vector<8x256xf32>
    %301 = vector.broadcast %24 : f32 to vector<8x256xf32>
    %302 = arith.mulf %301, %294 : vector<8x256xf32>
    %303 = arith.addf %288, %302 : vector<8x256xf32>
    %304 = vector.broadcast %33 : f32 to vector<8x256xf32>
    %305 = arith.mulf %304, %294 : vector<8x256xf32>
    %306 = arith.addf %291, %305 : vector<8x256xf32>
    %c240_i32 = arith.constant 240 : i32
    %307 = tpu.dynamic_rotate %200 by %c240_i32 dim 1 : vector<8x256xf32>, i32 -> vector<8x256xf32>
    %308 = vector.broadcast %198 : vector<1x256xf32> to vector<8x256xf32>
    %309 = arith.mulf %307, %308 : vector<8x256xf32>
    %310 = vector.broadcast %7 : f32 to vector<8x256xf32>
    %311 = arith.mulf %310, %309 : vector<8x256xf32>
    %312 = arith.addf %297, %311 : vector<8x256xf32>
    %313 = vector.broadcast %16 : f32 to vector<8x256xf32>
    %314 = arith.mulf %313, %309 : vector<8x256xf32>
    %315 = arith.addf %300, %314 : vector<8x256xf32>
    %316 = vector.broadcast %25 : f32 to vector<8x256xf32>
    %317 = arith.mulf %316, %309 : vector<8x256xf32>
    %318 = arith.addf %303, %317 : vector<8x256xf32>
    %319 = vector.broadcast %34 : f32 to vector<8x256xf32>
    %320 = arith.mulf %319, %309 : vector<8x256xf32>
    %321 = arith.addf %306, %320 : vector<8x256xf32>
    %c239_i32 = arith.constant 239 : i32
    %322 = tpu.dynamic_rotate %200 by %c239_i32 dim 1 : vector<8x256xf32>, i32 -> vector<8x256xf32>
    %323 = vector.broadcast %199 : vector<1x256xf32> to vector<8x256xf32>
    %324 = arith.mulf %322, %323 : vector<8x256xf32>
    %325 = vector.broadcast %8 : f32 to vector<8x256xf32>
    %326 = arith.mulf %325, %324 : vector<8x256xf32>
    %327 = arith.addf %312, %326 : vector<8x256xf32>
    %328 = vector.broadcast %17 : f32 to vector<8x256xf32>
    %329 = arith.mulf %328, %324 : vector<8x256xf32>
    %330 = arith.addf %315, %329 : vector<8x256xf32>
    %331 = vector.broadcast %26 : f32 to vector<8x256xf32>
    %332 = arith.mulf %331, %324 : vector<8x256xf32>
    %333 = arith.addf %318, %332 : vector<8x256xf32>
    %334 = vector.broadcast %35 : f32 to vector<8x256xf32>
    %335 = arith.mulf %334, %324 : vector<8x256xf32>
    %336 = arith.addf %321, %335 : vector<8x256xf32>
    %337 = vector.broadcast %184 : f32 to vector<8x256xf32>
    %338 = arith.addf %327, %337 : vector<8x256xf32>
    %cst_21 = arith.constant 0.000000e+00 : f32
    %339 = vector.broadcast %cst_21 : f32 to vector<8x256xf32>
    %340 = arith.maximumf %338, %339 : vector<8x256xf32>
    %341 = vector.broadcast %185 : f32 to vector<8x256xf32>
    %342 = arith.addf %330, %341 : vector<8x256xf32>
    %cst_22 = arith.constant 0.000000e+00 : f32
    %343 = vector.broadcast %cst_22 : f32 to vector<8x256xf32>
    %344 = arith.maximumf %342, %343 : vector<8x256xf32>
    %345 = vector.broadcast %186 : f32 to vector<8x256xf32>
    %346 = arith.addf %333, %345 : vector<8x256xf32>
    %cst_23 = arith.constant 0.000000e+00 : f32
    %347 = vector.broadcast %cst_23 : f32 to vector<8x256xf32>
    %348 = arith.maximumf %346, %347 : vector<8x256xf32>
    %349 = vector.broadcast %187 : f32 to vector<8x256xf32>
    %350 = arith.addf %336, %349 : vector<8x256xf32>
    %cst_24 = arith.constant 0.000000e+00 : f32
    %351 = vector.broadcast %cst_24 : f32 to vector<8x256xf32>
    %352 = arith.maximumf %350, %351 : vector<8x256xf32>
    %353 = vector.broadcast %180 : f32 to vector<8x256xf32>
    %354 = arith.mulf %353, %200 : vector<8x256xf32>
    %355 = vector.broadcast %188 : f32 to vector<8x256xf32>
    %356 = arith.addf %354, %355 : vector<8x256xf32>
    %357 = vector.broadcast %181 : f32 to vector<8x256xf32>
    %358 = arith.mulf %357, %200 : vector<8x256xf32>
    %359 = vector.broadcast %189 : f32 to vector<8x256xf32>
    %360 = arith.addf %358, %359 : vector<8x256xf32>
    %361 = vector.broadcast %182 : f32 to vector<8x256xf32>
    %362 = arith.mulf %361, %200 : vector<8x256xf32>
    %363 = vector.broadcast %190 : f32 to vector<8x256xf32>
    %364 = arith.addf %362, %363 : vector<8x256xf32>
    %365 = vector.broadcast %183 : f32 to vector<8x256xf32>
    %366 = arith.mulf %365, %200 : vector<8x256xf32>
    %367 = vector.broadcast %191 : f32 to vector<8x256xf32>
    %368 = arith.addf %366, %367 : vector<8x256xf32>
    %c17_i32_25 = arith.constant 17 : i32
    %369 = tpu.dynamic_rotate %340 by %c17_i32_25 dim 1 : vector<8x256xf32>, i32 -> vector<8x256xf32>
    %370 = vector.broadcast %192 : vector<1x256xf32> to vector<8x256xf32>
    %371 = arith.mulf %369, %370 : vector<8x256xf32>
    %372 = vector.broadcast %36 : f32 to vector<8x256xf32>
    %373 = arith.mulf %372, %371 : vector<8x256xf32>
    %374 = arith.addf %356, %373 : vector<8x256xf32>
    %375 = vector.broadcast %72 : f32 to vector<8x256xf32>
    %376 = arith.mulf %375, %371 : vector<8x256xf32>
    %377 = arith.addf %360, %376 : vector<8x256xf32>
    %378 = vector.broadcast %108 : f32 to vector<8x256xf32>
    %379 = arith.mulf %378, %371 : vector<8x256xf32>
    %380 = arith.addf %364, %379 : vector<8x256xf32>
    %381 = vector.broadcast %144 : f32 to vector<8x256xf32>
    %382 = arith.mulf %381, %371 : vector<8x256xf32>
    %383 = arith.addf %368, %382 : vector<8x256xf32>
    %c17_i32_26 = arith.constant 17 : i32
    %384 = tpu.dynamic_rotate %344 by %c17_i32_26 dim 1 : vector<8x256xf32>, i32 -> vector<8x256xf32>
    %385 = vector.broadcast %192 : vector<1x256xf32> to vector<8x256xf32>
    %386 = arith.mulf %384, %385 : vector<8x256xf32>
    %387 = vector.broadcast %45 : f32 to vector<8x256xf32>
    %388 = arith.mulf %387, %386 : vector<8x256xf32>
    %389 = arith.addf %374, %388 : vector<8x256xf32>
    %390 = vector.broadcast %81 : f32 to vector<8x256xf32>
    %391 = arith.mulf %390, %386 : vector<8x256xf32>
    %392 = arith.addf %377, %391 : vector<8x256xf32>
    %393 = vector.broadcast %117 : f32 to vector<8x256xf32>
    %394 = arith.mulf %393, %386 : vector<8x256xf32>
    %395 = arith.addf %380, %394 : vector<8x256xf32>
    %396 = vector.broadcast %153 : f32 to vector<8x256xf32>
    %397 = arith.mulf %396, %386 : vector<8x256xf32>
    %398 = arith.addf %383, %397 : vector<8x256xf32>
    %c17_i32_27 = arith.constant 17 : i32
    %399 = tpu.dynamic_rotate %348 by %c17_i32_27 dim 1 : vector<8x256xf32>, i32 -> vector<8x256xf32>
    %400 = vector.broadcast %192 : vector<1x256xf32> to vector<8x256xf32>
    %401 = arith.mulf %399, %400 : vector<8x256xf32>
    %402 = vector.broadcast %54 : f32 to vector<8x256xf32>
    %403 = arith.mulf %402, %401 : vector<8x256xf32>
    %404 = arith.addf %389, %403 : vector<8x256xf32>
    %405 = vector.broadcast %90 : f32 to vector<8x256xf32>
    %406 = arith.mulf %405, %401 : vector<8x256xf32>
    %407 = arith.addf %392, %406 : vector<8x256xf32>
    %408 = vector.broadcast %126 : f32 to vector<8x256xf32>
    %409 = arith.mulf %408, %401 : vector<8x256xf32>
    %410 = arith.addf %395, %409 : vector<8x256xf32>
    %411 = vector.broadcast %162 : f32 to vector<8x256xf32>
    %412 = arith.mulf %411, %401 : vector<8x256xf32>
    %413 = arith.addf %398, %412 : vector<8x256xf32>
    %c17_i32_28 = arith.constant 17 : i32
    %414 = tpu.dynamic_rotate %352 by %c17_i32_28 dim 1 : vector<8x256xf32>, i32 -> vector<8x256xf32>
    %415 = vector.broadcast %192 : vector<1x256xf32> to vector<8x256xf32>
    %416 = arith.mulf %414, %415 : vector<8x256xf32>
    %417 = vector.broadcast %63 : f32 to vector<8x256xf32>
    %418 = arith.mulf %417, %416 : vector<8x256xf32>
    %419 = arith.addf %404, %418 : vector<8x256xf32>
    %420 = vector.broadcast %99 : f32 to vector<8x256xf32>
    %421 = arith.mulf %420, %416 : vector<8x256xf32>
    %422 = arith.addf %407, %421 : vector<8x256xf32>
    %423 = vector.broadcast %135 : f32 to vector<8x256xf32>
    %424 = arith.mulf %423, %416 : vector<8x256xf32>
    %425 = arith.addf %410, %424 : vector<8x256xf32>
    %426 = vector.broadcast %171 : f32 to vector<8x256xf32>
    %427 = arith.mulf %426, %416 : vector<8x256xf32>
    %428 = arith.addf %413, %427 : vector<8x256xf32>
    %c16_i32_29 = arith.constant 16 : i32
    %429 = tpu.dynamic_rotate %340 by %c16_i32_29 dim 1 : vector<8x256xf32>, i32 -> vector<8x256xf32>
    %430 = vector.broadcast %193 : vector<1x256xf32> to vector<8x256xf32>
    %431 = arith.mulf %429, %430 : vector<8x256xf32>
    %432 = vector.broadcast %37 : f32 to vector<8x256xf32>
    %433 = arith.mulf %432, %431 : vector<8x256xf32>
    %434 = arith.addf %419, %433 : vector<8x256xf32>
    %435 = vector.broadcast %73 : f32 to vector<8x256xf32>
    %436 = arith.mulf %435, %431 : vector<8x256xf32>
    %437 = arith.addf %422, %436 : vector<8x256xf32>
    %438 = vector.broadcast %109 : f32 to vector<8x256xf32>
    %439 = arith.mulf %438, %431 : vector<8x256xf32>
    %440 = arith.addf %425, %439 : vector<8x256xf32>
    %441 = vector.broadcast %145 : f32 to vector<8x256xf32>
    %442 = arith.mulf %441, %431 : vector<8x256xf32>
    %443 = arith.addf %428, %442 : vector<8x256xf32>
    %c16_i32_30 = arith.constant 16 : i32
    %444 = tpu.dynamic_rotate %344 by %c16_i32_30 dim 1 : vector<8x256xf32>, i32 -> vector<8x256xf32>
    %445 = vector.broadcast %193 : vector<1x256xf32> to vector<8x256xf32>
    %446 = arith.mulf %444, %445 : vector<8x256xf32>
    %447 = vector.broadcast %46 : f32 to vector<8x256xf32>
    %448 = arith.mulf %447, %446 : vector<8x256xf32>
    %449 = arith.addf %434, %448 : vector<8x256xf32>
    %450 = vector.broadcast %82 : f32 to vector<8x256xf32>
    %451 = arith.mulf %450, %446 : vector<8x256xf32>
    %452 = arith.addf %437, %451 : vector<8x256xf32>
    %453 = vector.broadcast %118 : f32 to vector<8x256xf32>
    %454 = arith.mulf %453, %446 : vector<8x256xf32>
    %455 = arith.addf %440, %454 : vector<8x256xf32>
    %456 = vector.broadcast %154 : f32 to vector<8x256xf32>
    %457 = arith.mulf %456, %446 : vector<8x256xf32>
    %458 = arith.addf %443, %457 : vector<8x256xf32>
    %c16_i32_31 = arith.constant 16 : i32
    %459 = tpu.dynamic_rotate %348 by %c16_i32_31 dim 1 : vector<8x256xf32>, i32 -> vector<8x256xf32>
    %460 = vector.broadcast %193 : vector<1x256xf32> to vector<8x256xf32>
    %461 = arith.mulf %459, %460 : vector<8x256xf32>
    %462 = vector.broadcast %55 : f32 to vector<8x256xf32>
    %463 = arith.mulf %462, %461 : vector<8x256xf32>
    %464 = arith.addf %449, %463 : vector<8x256xf32>
    %465 = vector.broadcast %91 : f32 to vector<8x256xf32>
    %466 = arith.mulf %465, %461 : vector<8x256xf32>
    %467 = arith.addf %452, %466 : vector<8x256xf32>
    %468 = vector.broadcast %127 : f32 to vector<8x256xf32>
    %469 = arith.mulf %468, %461 : vector<8x256xf32>
    %470 = arith.addf %455, %469 : vector<8x256xf32>
    %471 = vector.broadcast %163 : f32 to vector<8x256xf32>
    %472 = arith.mulf %471, %461 : vector<8x256xf32>
    %473 = arith.addf %458, %472 : vector<8x256xf32>
    %c16_i32_32 = arith.constant 16 : i32
    %474 = tpu.dynamic_rotate %352 by %c16_i32_32 dim 1 : vector<8x256xf32>, i32 -> vector<8x256xf32>
    %475 = vector.broadcast %193 : vector<1x256xf32> to vector<8x256xf32>
    %476 = arith.mulf %474, %475 : vector<8x256xf32>
    %477 = vector.broadcast %64 : f32 to vector<8x256xf32>
    %478 = arith.mulf %477, %476 : vector<8x256xf32>
    %479 = arith.addf %464, %478 : vector<8x256xf32>
    %480 = vector.broadcast %100 : f32 to vector<8x256xf32>
    %481 = arith.mulf %480, %476 : vector<8x256xf32>
    %482 = arith.addf %467, %481 : vector<8x256xf32>
    %483 = vector.broadcast %136 : f32 to vector<8x256xf32>
    %484 = arith.mulf %483, %476 : vector<8x256xf32>
    %485 = arith.addf %470, %484 : vector<8x256xf32>
    %486 = vector.broadcast %172 : f32 to vector<8x256xf32>
    %487 = arith.mulf %486, %476 : vector<8x256xf32>
    %488 = arith.addf %473, %487 : vector<8x256xf32>
    %c15_i32_33 = arith.constant 15 : i32
    %489 = tpu.dynamic_rotate %340 by %c15_i32_33 dim 1 : vector<8x256xf32>, i32 -> vector<8x256xf32>
    %490 = vector.broadcast %194 : vector<1x256xf32> to vector<8x256xf32>
    %491 = arith.mulf %489, %490 : vector<8x256xf32>
    %492 = vector.broadcast %38 : f32 to vector<8x256xf32>
    %493 = arith.mulf %492, %491 : vector<8x256xf32>
    %494 = arith.addf %479, %493 : vector<8x256xf32>
    %495 = vector.broadcast %74 : f32 to vector<8x256xf32>
    %496 = arith.mulf %495, %491 : vector<8x256xf32>
    %497 = arith.addf %482, %496 : vector<8x256xf32>
    %498 = vector.broadcast %110 : f32 to vector<8x256xf32>
    %499 = arith.mulf %498, %491 : vector<8x256xf32>
    %500 = arith.addf %485, %499 : vector<8x256xf32>
    %501 = vector.broadcast %146 : f32 to vector<8x256xf32>
    %502 = arith.mulf %501, %491 : vector<8x256xf32>
    %503 = arith.addf %488, %502 : vector<8x256xf32>
    %c15_i32_34 = arith.constant 15 : i32
    %504 = tpu.dynamic_rotate %344 by %c15_i32_34 dim 1 : vector<8x256xf32>, i32 -> vector<8x256xf32>
    %505 = vector.broadcast %194 : vector<1x256xf32> to vector<8x256xf32>
    %506 = arith.mulf %504, %505 : vector<8x256xf32>
    %507 = vector.broadcast %47 : f32 to vector<8x256xf32>
    %508 = arith.mulf %507, %506 : vector<8x256xf32>
    %509 = arith.addf %494, %508 : vector<8x256xf32>
    %510 = vector.broadcast %83 : f32 to vector<8x256xf32>
    %511 = arith.mulf %510, %506 : vector<8x256xf32>
    %512 = arith.addf %497, %511 : vector<8x256xf32>
    %513 = vector.broadcast %119 : f32 to vector<8x256xf32>
    %514 = arith.mulf %513, %506 : vector<8x256xf32>
    %515 = arith.addf %500, %514 : vector<8x256xf32>
    %516 = vector.broadcast %155 : f32 to vector<8x256xf32>
    %517 = arith.mulf %516, %506 : vector<8x256xf32>
    %518 = arith.addf %503, %517 : vector<8x256xf32>
    %c15_i32_35 = arith.constant 15 : i32
    %519 = tpu.dynamic_rotate %348 by %c15_i32_35 dim 1 : vector<8x256xf32>, i32 -> vector<8x256xf32>
    %520 = vector.broadcast %194 : vector<1x256xf32> to vector<8x256xf32>
    %521 = arith.mulf %519, %520 : vector<8x256xf32>
    %522 = vector.broadcast %56 : f32 to vector<8x256xf32>
    %523 = arith.mulf %522, %521 : vector<8x256xf32>
    %524 = arith.addf %509, %523 : vector<8x256xf32>
    %525 = vector.broadcast %92 : f32 to vector<8x256xf32>
    %526 = arith.mulf %525, %521 : vector<8x256xf32>
    %527 = arith.addf %512, %526 : vector<8x256xf32>
    %528 = vector.broadcast %128 : f32 to vector<8x256xf32>
    %529 = arith.mulf %528, %521 : vector<8x256xf32>
    %530 = arith.addf %515, %529 : vector<8x256xf32>
    %531 = vector.broadcast %164 : f32 to vector<8x256xf32>
    %532 = arith.mulf %531, %521 : vector<8x256xf32>
    %533 = arith.addf %518, %532 : vector<8x256xf32>
    %c15_i32_36 = arith.constant 15 : i32
    %534 = tpu.dynamic_rotate %352 by %c15_i32_36 dim 1 : vector<8x256xf32>, i32 -> vector<8x256xf32>
    %535 = vector.broadcast %194 : vector<1x256xf32> to vector<8x256xf32>
    %536 = arith.mulf %534, %535 : vector<8x256xf32>
    %537 = vector.broadcast %65 : f32 to vector<8x256xf32>
    %538 = arith.mulf %537, %536 : vector<8x256xf32>
    %539 = arith.addf %524, %538 : vector<8x256xf32>
    %540 = vector.broadcast %101 : f32 to vector<8x256xf32>
    %541 = arith.mulf %540, %536 : vector<8x256xf32>
    %542 = arith.addf %527, %541 : vector<8x256xf32>
    %543 = vector.broadcast %137 : f32 to vector<8x256xf32>
    %544 = arith.mulf %543, %536 : vector<8x256xf32>
    %545 = arith.addf %530, %544 : vector<8x256xf32>
    %546 = vector.broadcast %173 : f32 to vector<8x256xf32>
    %547 = arith.mulf %546, %536 : vector<8x256xf32>
    %548 = arith.addf %533, %547 : vector<8x256xf32>
    %c1_i32_37 = arith.constant 1 : i32
    %549 = tpu.dynamic_rotate %340 by %c1_i32_37 dim 1 : vector<8x256xf32>, i32 -> vector<8x256xf32>
    %550 = vector.broadcast %195 : vector<1x256xf32> to vector<8x256xf32>
    %551 = arith.mulf %549, %550 : vector<8x256xf32>
    %552 = vector.broadcast %39 : f32 to vector<8x256xf32>
    %553 = arith.mulf %552, %551 : vector<8x256xf32>
    %554 = arith.addf %539, %553 : vector<8x256xf32>
    %555 = vector.broadcast %75 : f32 to vector<8x256xf32>
    %556 = arith.mulf %555, %551 : vector<8x256xf32>
    %557 = arith.addf %542, %556 : vector<8x256xf32>
    %558 = vector.broadcast %111 : f32 to vector<8x256xf32>
    %559 = arith.mulf %558, %551 : vector<8x256xf32>
    %560 = arith.addf %545, %559 : vector<8x256xf32>
    %561 = vector.broadcast %147 : f32 to vector<8x256xf32>
    %562 = arith.mulf %561, %551 : vector<8x256xf32>
    %563 = arith.addf %548, %562 : vector<8x256xf32>
    %c1_i32_38 = arith.constant 1 : i32
    %564 = tpu.dynamic_rotate %344 by %c1_i32_38 dim 1 : vector<8x256xf32>, i32 -> vector<8x256xf32>
    %565 = vector.broadcast %195 : vector<1x256xf32> to vector<8x256xf32>
    %566 = arith.mulf %564, %565 : vector<8x256xf32>
    %567 = vector.broadcast %48 : f32 to vector<8x256xf32>
    %568 = arith.mulf %567, %566 : vector<8x256xf32>
    %569 = arith.addf %554, %568 : vector<8x256xf32>
    %570 = vector.broadcast %84 : f32 to vector<8x256xf32>
    %571 = arith.mulf %570, %566 : vector<8x256xf32>
    %572 = arith.addf %557, %571 : vector<8x256xf32>
    %573 = vector.broadcast %120 : f32 to vector<8x256xf32>
    %574 = arith.mulf %573, %566 : vector<8x256xf32>
    %575 = arith.addf %560, %574 : vector<8x256xf32>
    %576 = vector.broadcast %156 : f32 to vector<8x256xf32>
    %577 = arith.mulf %576, %566 : vector<8x256xf32>
    %578 = arith.addf %563, %577 : vector<8x256xf32>
    %c1_i32_39 = arith.constant 1 : i32
    %579 = tpu.dynamic_rotate %348 by %c1_i32_39 dim 1 : vector<8x256xf32>, i32 -> vector<8x256xf32>
    %580 = vector.broadcast %195 : vector<1x256xf32> to vector<8x256xf32>
    %581 = arith.mulf %579, %580 : vector<8x256xf32>
    %582 = vector.broadcast %57 : f32 to vector<8x256xf32>
    %583 = arith.mulf %582, %581 : vector<8x256xf32>
    %584 = arith.addf %569, %583 : vector<8x256xf32>
    %585 = vector.broadcast %93 : f32 to vector<8x256xf32>
    %586 = arith.mulf %585, %581 : vector<8x256xf32>
    %587 = arith.addf %572, %586 : vector<8x256xf32>
    %588 = vector.broadcast %129 : f32 to vector<8x256xf32>
    %589 = arith.mulf %588, %581 : vector<8x256xf32>
    %590 = arith.addf %575, %589 : vector<8x256xf32>
    %591 = vector.broadcast %165 : f32 to vector<8x256xf32>
    %592 = arith.mulf %591, %581 : vector<8x256xf32>
    %593 = arith.addf %578, %592 : vector<8x256xf32>
    %c1_i32_40 = arith.constant 1 : i32
    %594 = tpu.dynamic_rotate %352 by %c1_i32_40 dim 1 : vector<8x256xf32>, i32 -> vector<8x256xf32>
    %595 = vector.broadcast %195 : vector<1x256xf32> to vector<8x256xf32>
    %596 = arith.mulf %594, %595 : vector<8x256xf32>
    %597 = vector.broadcast %66 : f32 to vector<8x256xf32>
    %598 = arith.mulf %597, %596 : vector<8x256xf32>
    %599 = arith.addf %584, %598 : vector<8x256xf32>
    %600 = vector.broadcast %102 : f32 to vector<8x256xf32>
    %601 = arith.mulf %600, %596 : vector<8x256xf32>
    %602 = arith.addf %587, %601 : vector<8x256xf32>
    %603 = vector.broadcast %138 : f32 to vector<8x256xf32>
    %604 = arith.mulf %603, %596 : vector<8x256xf32>
    %605 = arith.addf %590, %604 : vector<8x256xf32>
    %606 = vector.broadcast %174 : f32 to vector<8x256xf32>
    %607 = arith.mulf %606, %596 : vector<8x256xf32>
    %608 = arith.addf %593, %607 : vector<8x256xf32>
    %609 = vector.broadcast %40 : f32 to vector<8x256xf32>
    %610 = arith.mulf %609, %340 : vector<8x256xf32>
    %611 = arith.addf %599, %610 : vector<8x256xf32>
    %612 = vector.broadcast %76 : f32 to vector<8x256xf32>
    %613 = arith.mulf %612, %340 : vector<8x256xf32>
    %614 = arith.addf %602, %613 : vector<8x256xf32>
    %615 = vector.broadcast %112 : f32 to vector<8x256xf32>
    %616 = arith.mulf %615, %340 : vector<8x256xf32>
    %617 = arith.addf %605, %616 : vector<8x256xf32>
    %618 = vector.broadcast %148 : f32 to vector<8x256xf32>
    %619 = arith.mulf %618, %340 : vector<8x256xf32>
    %620 = arith.addf %608, %619 : vector<8x256xf32>
    %621 = vector.broadcast %49 : f32 to vector<8x256xf32>
    %622 = arith.mulf %621, %344 : vector<8x256xf32>
    %623 = arith.addf %611, %622 : vector<8x256xf32>
    %624 = vector.broadcast %85 : f32 to vector<8x256xf32>
    %625 = arith.mulf %624, %344 : vector<8x256xf32>
    %626 = arith.addf %614, %625 : vector<8x256xf32>
    %627 = vector.broadcast %121 : f32 to vector<8x256xf32>
    %628 = arith.mulf %627, %344 : vector<8x256xf32>
    %629 = arith.addf %617, %628 : vector<8x256xf32>
    %630 = vector.broadcast %157 : f32 to vector<8x256xf32>
    %631 = arith.mulf %630, %344 : vector<8x256xf32>
    %632 = arith.addf %620, %631 : vector<8x256xf32>
    %633 = vector.broadcast %58 : f32 to vector<8x256xf32>
    %634 = arith.mulf %633, %348 : vector<8x256xf32>
    %635 = arith.addf %623, %634 : vector<8x256xf32>
    %636 = vector.broadcast %94 : f32 to vector<8x256xf32>
    %637 = arith.mulf %636, %348 : vector<8x256xf32>
    %638 = arith.addf %626, %637 : vector<8x256xf32>
    %639 = vector.broadcast %130 : f32 to vector<8x256xf32>
    %640 = arith.mulf %639, %348 : vector<8x256xf32>
    %641 = arith.addf %629, %640 : vector<8x256xf32>
    %642 = vector.broadcast %166 : f32 to vector<8x256xf32>
    %643 = arith.mulf %642, %348 : vector<8x256xf32>
    %644 = arith.addf %632, %643 : vector<8x256xf32>
    %645 = vector.broadcast %67 : f32 to vector<8x256xf32>
    %646 = arith.mulf %645, %352 : vector<8x256xf32>
    %647 = arith.addf %635, %646 : vector<8x256xf32>
    %648 = vector.broadcast %103 : f32 to vector<8x256xf32>
    %649 = arith.mulf %648, %352 : vector<8x256xf32>
    %650 = arith.addf %638, %649 : vector<8x256xf32>
    %651 = vector.broadcast %139 : f32 to vector<8x256xf32>
    %652 = arith.mulf %651, %352 : vector<8x256xf32>
    %653 = arith.addf %641, %652 : vector<8x256xf32>
    %654 = vector.broadcast %175 : f32 to vector<8x256xf32>
    %655 = arith.mulf %654, %352 : vector<8x256xf32>
    %656 = arith.addf %644, %655 : vector<8x256xf32>
    %c255_i32_41 = arith.constant 255 : i32
    %657 = tpu.dynamic_rotate %340 by %c255_i32_41 dim 1 : vector<8x256xf32>, i32 -> vector<8x256xf32>
    %658 = vector.broadcast %196 : vector<1x256xf32> to vector<8x256xf32>
    %659 = arith.mulf %657, %658 : vector<8x256xf32>
    %660 = vector.broadcast %41 : f32 to vector<8x256xf32>
    %661 = arith.mulf %660, %659 : vector<8x256xf32>
    %662 = arith.addf %647, %661 : vector<8x256xf32>
    %663 = vector.broadcast %77 : f32 to vector<8x256xf32>
    %664 = arith.mulf %663, %659 : vector<8x256xf32>
    %665 = arith.addf %650, %664 : vector<8x256xf32>
    %666 = vector.broadcast %113 : f32 to vector<8x256xf32>
    %667 = arith.mulf %666, %659 : vector<8x256xf32>
    %668 = arith.addf %653, %667 : vector<8x256xf32>
    %669 = vector.broadcast %149 : f32 to vector<8x256xf32>
    %670 = arith.mulf %669, %659 : vector<8x256xf32>
    %671 = arith.addf %656, %670 : vector<8x256xf32>
    %c255_i32_42 = arith.constant 255 : i32
    %672 = tpu.dynamic_rotate %344 by %c255_i32_42 dim 1 : vector<8x256xf32>, i32 -> vector<8x256xf32>
    %673 = vector.broadcast %196 : vector<1x256xf32> to vector<8x256xf32>
    %674 = arith.mulf %672, %673 : vector<8x256xf32>
    %675 = vector.broadcast %50 : f32 to vector<8x256xf32>
    %676 = arith.mulf %675, %674 : vector<8x256xf32>
    %677 = arith.addf %662, %676 : vector<8x256xf32>
    %678 = vector.broadcast %86 : f32 to vector<8x256xf32>
    %679 = arith.mulf %678, %674 : vector<8x256xf32>
    %680 = arith.addf %665, %679 : vector<8x256xf32>
    %681 = vector.broadcast %122 : f32 to vector<8x256xf32>
    %682 = arith.mulf %681, %674 : vector<8x256xf32>
    %683 = arith.addf %668, %682 : vector<8x256xf32>
    %684 = vector.broadcast %158 : f32 to vector<8x256xf32>
    %685 = arith.mulf %684, %674 : vector<8x256xf32>
    %686 = arith.addf %671, %685 : vector<8x256xf32>
    %c255_i32_43 = arith.constant 255 : i32
    %687 = tpu.dynamic_rotate %348 by %c255_i32_43 dim 1 : vector<8x256xf32>, i32 -> vector<8x256xf32>
    %688 = vector.broadcast %196 : vector<1x256xf32> to vector<8x256xf32>
    %689 = arith.mulf %687, %688 : vector<8x256xf32>
    %690 = vector.broadcast %59 : f32 to vector<8x256xf32>
    %691 = arith.mulf %690, %689 : vector<8x256xf32>
    %692 = arith.addf %677, %691 : vector<8x256xf32>
    %693 = vector.broadcast %95 : f32 to vector<8x256xf32>
    %694 = arith.mulf %693, %689 : vector<8x256xf32>
    %695 = arith.addf %680, %694 : vector<8x256xf32>
    %696 = vector.broadcast %131 : f32 to vector<8x256xf32>
    %697 = arith.mulf %696, %689 : vector<8x256xf32>
    %698 = arith.addf %683, %697 : vector<8x256xf32>
    %699 = vector.broadcast %167 : f32 to vector<8x256xf32>
    %700 = arith.mulf %699, %689 : vector<8x256xf32>
    %701 = arith.addf %686, %700 : vector<8x256xf32>
    %c255_i32_44 = arith.constant 255 : i32
    %702 = tpu.dynamic_rotate %352 by %c255_i32_44 dim 1 : vector<8x256xf32>, i32 -> vector<8x256xf32>
    %703 = vector.broadcast %196 : vector<1x256xf32> to vector<8x256xf32>
    %704 = arith.mulf %702, %703 : vector<8x256xf32>
    %705 = vector.broadcast %68 : f32 to vector<8x256xf32>
    %706 = arith.mulf %705, %704 : vector<8x256xf32>
    %707 = arith.addf %692, %706 : vector<8x256xf32>
    %708 = vector.broadcast %104 : f32 to vector<8x256xf32>
    %709 = arith.mulf %708, %704 : vector<8x256xf32>
    %710 = arith.addf %695, %709 : vector<8x256xf32>
    %711 = vector.broadcast %140 : f32 to vector<8x256xf32>
    %712 = arith.mulf %711, %704 : vector<8x256xf32>
    %713 = arith.addf %698, %712 : vector<8x256xf32>
    %714 = vector.broadcast %176 : f32 to vector<8x256xf32>
    %715 = arith.mulf %714, %704 : vector<8x256xf32>
    %716 = arith.addf %701, %715 : vector<8x256xf32>
    %c241_i32_45 = arith.constant 241 : i32
    %717 = tpu.dynamic_rotate %340 by %c241_i32_45 dim 1 : vector<8x256xf32>, i32 -> vector<8x256xf32>
    %718 = vector.broadcast %197 : vector<1x256xf32> to vector<8x256xf32>
    %719 = arith.mulf %717, %718 : vector<8x256xf32>
    %720 = vector.broadcast %42 : f32 to vector<8x256xf32>
    %721 = arith.mulf %720, %719 : vector<8x256xf32>
    %722 = arith.addf %707, %721 : vector<8x256xf32>
    %723 = vector.broadcast %78 : f32 to vector<8x256xf32>
    %724 = arith.mulf %723, %719 : vector<8x256xf32>
    %725 = arith.addf %710, %724 : vector<8x256xf32>
    %726 = vector.broadcast %114 : f32 to vector<8x256xf32>
    %727 = arith.mulf %726, %719 : vector<8x256xf32>
    %728 = arith.addf %713, %727 : vector<8x256xf32>
    %729 = vector.broadcast %150 : f32 to vector<8x256xf32>
    %730 = arith.mulf %729, %719 : vector<8x256xf32>
    %731 = arith.addf %716, %730 : vector<8x256xf32>
    %c241_i32_46 = arith.constant 241 : i32
    %732 = tpu.dynamic_rotate %344 by %c241_i32_46 dim 1 : vector<8x256xf32>, i32 -> vector<8x256xf32>
    %733 = vector.broadcast %197 : vector<1x256xf32> to vector<8x256xf32>
    %734 = arith.mulf %732, %733 : vector<8x256xf32>
    %735 = vector.broadcast %51 : f32 to vector<8x256xf32>
    %736 = arith.mulf %735, %734 : vector<8x256xf32>
    %737 = arith.addf %722, %736 : vector<8x256xf32>
    %738 = vector.broadcast %87 : f32 to vector<8x256xf32>
    %739 = arith.mulf %738, %734 : vector<8x256xf32>
    %740 = arith.addf %725, %739 : vector<8x256xf32>
    %741 = vector.broadcast %123 : f32 to vector<8x256xf32>
    %742 = arith.mulf %741, %734 : vector<8x256xf32>
    %743 = arith.addf %728, %742 : vector<8x256xf32>
    %744 = vector.broadcast %159 : f32 to vector<8x256xf32>
    %745 = arith.mulf %744, %734 : vector<8x256xf32>
    %746 = arith.addf %731, %745 : vector<8x256xf32>
    %c241_i32_47 = arith.constant 241 : i32
    %747 = tpu.dynamic_rotate %348 by %c241_i32_47 dim 1 : vector<8x256xf32>, i32 -> vector<8x256xf32>
    %748 = vector.broadcast %197 : vector<1x256xf32> to vector<8x256xf32>
    %749 = arith.mulf %747, %748 : vector<8x256xf32>
    %750 = vector.broadcast %60 : f32 to vector<8x256xf32>
    %751 = arith.mulf %750, %749 : vector<8x256xf32>
    %752 = arith.addf %737, %751 : vector<8x256xf32>
    %753 = vector.broadcast %96 : f32 to vector<8x256xf32>
    %754 = arith.mulf %753, %749 : vector<8x256xf32>
    %755 = arith.addf %740, %754 : vector<8x256xf32>
    %756 = vector.broadcast %132 : f32 to vector<8x256xf32>
    %757 = arith.mulf %756, %749 : vector<8x256xf32>
    %758 = arith.addf %743, %757 : vector<8x256xf32>
    %759 = vector.broadcast %168 : f32 to vector<8x256xf32>
    %760 = arith.mulf %759, %749 : vector<8x256xf32>
    %761 = arith.addf %746, %760 : vector<8x256xf32>
    %c241_i32_48 = arith.constant 241 : i32
    %762 = tpu.dynamic_rotate %352 by %c241_i32_48 dim 1 : vector<8x256xf32>, i32 -> vector<8x256xf32>
    %763 = vector.broadcast %197 : vector<1x256xf32> to vector<8x256xf32>
    %764 = arith.mulf %762, %763 : vector<8x256xf32>
    %765 = vector.broadcast %69 : f32 to vector<8x256xf32>
    %766 = arith.mulf %765, %764 : vector<8x256xf32>
    %767 = arith.addf %752, %766 : vector<8x256xf32>
    %768 = vector.broadcast %105 : f32 to vector<8x256xf32>
    %769 = arith.mulf %768, %764 : vector<8x256xf32>
    %770 = arith.addf %755, %769 : vector<8x256xf32>
    %771 = vector.broadcast %141 : f32 to vector<8x256xf32>
    %772 = arith.mulf %771, %764 : vector<8x256xf32>
    %773 = arith.addf %758, %772 : vector<8x256xf32>
    %774 = vector.broadcast %177 : f32 to vector<8x256xf32>
    %775 = arith.mulf %774, %764 : vector<8x256xf32>
    %776 = arith.addf %761, %775 : vector<8x256xf32>
    %c240_i32_49 = arith.constant 240 : i32
    %777 = tpu.dynamic_rotate %340 by %c240_i32_49 dim 1 : vector<8x256xf32>, i32 -> vector<8x256xf32>
    %778 = vector.broadcast %198 : vector<1x256xf32> to vector<8x256xf32>
    %779 = arith.mulf %777, %778 : vector<8x256xf32>
    %780 = vector.broadcast %43 : f32 to vector<8x256xf32>
    %781 = arith.mulf %780, %779 : vector<8x256xf32>
    %782 = arith.addf %767, %781 : vector<8x256xf32>
    %783 = vector.broadcast %79 : f32 to vector<8x256xf32>
    %784 = arith.mulf %783, %779 : vector<8x256xf32>
    %785 = arith.addf %770, %784 : vector<8x256xf32>
    %786 = vector.broadcast %115 : f32 to vector<8x256xf32>
    %787 = arith.mulf %786, %779 : vector<8x256xf32>
    %788 = arith.addf %773, %787 : vector<8x256xf32>
    %789 = vector.broadcast %151 : f32 to vector<8x256xf32>
    %790 = arith.mulf %789, %779 : vector<8x256xf32>
    %791 = arith.addf %776, %790 : vector<8x256xf32>
    %c240_i32_50 = arith.constant 240 : i32
    %792 = tpu.dynamic_rotate %344 by %c240_i32_50 dim 1 : vector<8x256xf32>, i32 -> vector<8x256xf32>
    %793 = vector.broadcast %198 : vector<1x256xf32> to vector<8x256xf32>
    %794 = arith.mulf %792, %793 : vector<8x256xf32>
    %795 = vector.broadcast %52 : f32 to vector<8x256xf32>
    %796 = arith.mulf %795, %794 : vector<8x256xf32>
    %797 = arith.addf %782, %796 : vector<8x256xf32>
    %798 = vector.broadcast %88 : f32 to vector<8x256xf32>
    %799 = arith.mulf %798, %794 : vector<8x256xf32>
    %800 = arith.addf %785, %799 : vector<8x256xf32>
    %801 = vector.broadcast %124 : f32 to vector<8x256xf32>
    %802 = arith.mulf %801, %794 : vector<8x256xf32>
    %803 = arith.addf %788, %802 : vector<8x256xf32>
    %804 = vector.broadcast %160 : f32 to vector<8x256xf32>
    %805 = arith.mulf %804, %794 : vector<8x256xf32>
    %806 = arith.addf %791, %805 : vector<8x256xf32>
    %c240_i32_51 = arith.constant 240 : i32
    %807 = tpu.dynamic_rotate %348 by %c240_i32_51 dim 1 : vector<8x256xf32>, i32 -> vector<8x256xf32>
    %808 = vector.broadcast %198 : vector<1x256xf32> to vector<8x256xf32>
    %809 = arith.mulf %807, %808 : vector<8x256xf32>
    %810 = vector.broadcast %61 : f32 to vector<8x256xf32>
    %811 = arith.mulf %810, %809 : vector<8x256xf32>
    %812 = arith.addf %797, %811 : vector<8x256xf32>
    %813 = vector.broadcast %97 : f32 to vector<8x256xf32>
    %814 = arith.mulf %813, %809 : vector<8x256xf32>
    %815 = arith.addf %800, %814 : vector<8x256xf32>
    %816 = vector.broadcast %133 : f32 to vector<8x256xf32>
    %817 = arith.mulf %816, %809 : vector<8x256xf32>
    %818 = arith.addf %803, %817 : vector<8x256xf32>
    %819 = vector.broadcast %169 : f32 to vector<8x256xf32>
    %820 = arith.mulf %819, %809 : vector<8x256xf32>
    %821 = arith.addf %806, %820 : vector<8x256xf32>
    %c240_i32_52 = arith.constant 240 : i32
    %822 = tpu.dynamic_rotate %352 by %c240_i32_52 dim 1 : vector<8x256xf32>, i32 -> vector<8x256xf32>
    %823 = vector.broadcast %198 : vector<1x256xf32> to vector<8x256xf32>
    %824 = arith.mulf %822, %823 : vector<8x256xf32>
    %825 = vector.broadcast %70 : f32 to vector<8x256xf32>
    %826 = arith.mulf %825, %824 : vector<8x256xf32>
    %827 = arith.addf %812, %826 : vector<8x256xf32>
    %828 = vector.broadcast %106 : f32 to vector<8x256xf32>
    %829 = arith.mulf %828, %824 : vector<8x256xf32>
    %830 = arith.addf %815, %829 : vector<8x256xf32>
    %831 = vector.broadcast %142 : f32 to vector<8x256xf32>
    %832 = arith.mulf %831, %824 : vector<8x256xf32>
    %833 = arith.addf %818, %832 : vector<8x256xf32>
    %834 = vector.broadcast %178 : f32 to vector<8x256xf32>
    %835 = arith.mulf %834, %824 : vector<8x256xf32>
    %836 = arith.addf %821, %835 : vector<8x256xf32>
    %c239_i32_53 = arith.constant 239 : i32
    %837 = tpu.dynamic_rotate %340 by %c239_i32_53 dim 1 : vector<8x256xf32>, i32 -> vector<8x256xf32>
    %838 = vector.broadcast %199 : vector<1x256xf32> to vector<8x256xf32>
    %839 = arith.mulf %837, %838 : vector<8x256xf32>
    %840 = vector.broadcast %44 : f32 to vector<8x256xf32>
    %841 = arith.mulf %840, %839 : vector<8x256xf32>
    %842 = arith.addf %827, %841 : vector<8x256xf32>
    %843 = vector.broadcast %80 : f32 to vector<8x256xf32>
    %844 = arith.mulf %843, %839 : vector<8x256xf32>
    %845 = arith.addf %830, %844 : vector<8x256xf32>
    %846 = vector.broadcast %116 : f32 to vector<8x256xf32>
    %847 = arith.mulf %846, %839 : vector<8x256xf32>
    %848 = arith.addf %833, %847 : vector<8x256xf32>
    %849 = vector.broadcast %152 : f32 to vector<8x256xf32>
    %850 = arith.mulf %849, %839 : vector<8x256xf32>
    %851 = arith.addf %836, %850 : vector<8x256xf32>
    %c239_i32_54 = arith.constant 239 : i32
    %852 = tpu.dynamic_rotate %344 by %c239_i32_54 dim 1 : vector<8x256xf32>, i32 -> vector<8x256xf32>
    %853 = vector.broadcast %199 : vector<1x256xf32> to vector<8x256xf32>
    %854 = arith.mulf %852, %853 : vector<8x256xf32>
    %855 = vector.broadcast %53 : f32 to vector<8x256xf32>
    %856 = arith.mulf %855, %854 : vector<8x256xf32>
    %857 = arith.addf %842, %856 : vector<8x256xf32>
    %858 = vector.broadcast %89 : f32 to vector<8x256xf32>
    %859 = arith.mulf %858, %854 : vector<8x256xf32>
    %860 = arith.addf %845, %859 : vector<8x256xf32>
    %861 = vector.broadcast %125 : f32 to vector<8x256xf32>
    %862 = arith.mulf %861, %854 : vector<8x256xf32>
    %863 = arith.addf %848, %862 : vector<8x256xf32>
    %864 = vector.broadcast %161 : f32 to vector<8x256xf32>
    %865 = arith.mulf %864, %854 : vector<8x256xf32>
    %866 = arith.addf %851, %865 : vector<8x256xf32>
    %c239_i32_55 = arith.constant 239 : i32
    %867 = tpu.dynamic_rotate %348 by %c239_i32_55 dim 1 : vector<8x256xf32>, i32 -> vector<8x256xf32>
    %868 = vector.broadcast %199 : vector<1x256xf32> to vector<8x256xf32>
    %869 = arith.mulf %867, %868 : vector<8x256xf32>
    %870 = vector.broadcast %62 : f32 to vector<8x256xf32>
    %871 = arith.mulf %870, %869 : vector<8x256xf32>
    %872 = arith.addf %857, %871 : vector<8x256xf32>
    %873 = vector.broadcast %98 : f32 to vector<8x256xf32>
    %874 = arith.mulf %873, %869 : vector<8x256xf32>
    %875 = arith.addf %860, %874 : vector<8x256xf32>
    %876 = vector.broadcast %134 : f32 to vector<8x256xf32>
    %877 = arith.mulf %876, %869 : vector<8x256xf32>
    %878 = arith.addf %863, %877 : vector<8x256xf32>
    %879 = vector.broadcast %170 : f32 to vector<8x256xf32>
    %880 = arith.mulf %879, %869 : vector<8x256xf32>
    %881 = arith.addf %866, %880 : vector<8x256xf32>
    %c239_i32_56 = arith.constant 239 : i32
    %882 = tpu.dynamic_rotate %352 by %c239_i32_56 dim 1 : vector<8x256xf32>, i32 -> vector<8x256xf32>
    %883 = vector.broadcast %199 : vector<1x256xf32> to vector<8x256xf32>
    %884 = arith.mulf %882, %883 : vector<8x256xf32>
    %885 = vector.broadcast %71 : f32 to vector<8x256xf32>
    %886 = arith.mulf %885, %884 : vector<8x256xf32>
    %887 = arith.addf %872, %886 : vector<8x256xf32>
    %888 = vector.broadcast %107 : f32 to vector<8x256xf32>
    %889 = arith.mulf %888, %884 : vector<8x256xf32>
    %890 = arith.addf %875, %889 : vector<8x256xf32>
    %891 = vector.broadcast %143 : f32 to vector<8x256xf32>
    %892 = arith.mulf %891, %884 : vector<8x256xf32>
    %893 = arith.addf %878, %892 : vector<8x256xf32>
    %894 = vector.broadcast %179 : f32 to vector<8x256xf32>
    %895 = arith.mulf %894, %884 : vector<8x256xf32>
    %896 = arith.addf %881, %895 : vector<8x256xf32>
    %cst_57 = arith.constant 0.000000e+00 : f32
    %897 = vector.broadcast %cst_57 : f32 to vector<8x256xf32>
    %898 = arith.maximumf %887, %897 : vector<8x256xf32>
    %c0_58 = arith.constant 0 : index
    %c0_59 = arith.constant 0 : index
    %899 = vector.load %arg4[%c0_58, %c0_59] : memref<8x1024xf32, #tpu.memory_space<vmem>>, vector<8x256xf32>
    tpu.vector_store %arg4[%c0_58, %c0_59], %898 {strides = array<i32>} : memref<8x1024xf32, #tpu.memory_space<vmem>>, vector<8x256xf32>,
    %cst_60 = arith.constant 0.000000e+00 : f32
    %900 = vector.broadcast %cst_60 : f32 to vector<8x256xf32>
    %901 = arith.maximumf %890, %900 : vector<8x256xf32>
    %c0_61 = arith.constant 0 : index
    %c256 = arith.constant 256 : index
    %902 = vector.load %arg4[%c0_61, %c256] : memref<8x1024xf32, #tpu.memory_space<vmem>>, vector<8x256xf32>
    tpu.vector_store %arg4[%c0_61, %c256], %901 {strides = array<i32>} : memref<8x1024xf32, #tpu.memory_space<vmem>>, vector<8x256xf32>,
    %cst_62 = arith.constant 0.000000e+00 : f32
    %903 = vector.broadcast %cst_62 : f32 to vector<8x256xf32>
    %904 = arith.maximumf %893, %903 : vector<8x256xf32>
    %c0_63 = arith.constant 0 : index
    %c512 = arith.constant 512 : index
    %905 = vector.load %arg4[%c0_63, %c512] : memref<8x1024xf32, #tpu.memory_space<vmem>>, vector<8x256xf32>
    tpu.vector_store %arg4[%c0_63, %c512], %904 {strides = array<i32>} : memref<8x1024xf32, #tpu.memory_space<vmem>>, vector<8x256xf32>,
    %cst_64 = arith.constant 0.000000e+00 : f32
    %906 = vector.broadcast %cst_64 : f32 to vector<8x256xf32>
    %907 = arith.maximumf %896, %906 : vector<8x256xf32>
    %c0_65 = arith.constant 0 : index
    %c768 = arith.constant 768 : index
    %908 = vector.load %arg4[%c0_65, %c768] : memref<8x1024xf32, #tpu.memory_space<vmem>>, vector<8x256xf32>
    tpu.vector_store %arg4[%c0_65, %c768], %907 {strides = array<i32>} : memref<8x1024xf32, #tpu.memory_space<vmem>>, vector<8x256xf32>,
    return
  }
  func.func @transform_0(%arg0: i32) -> i32 {
    %c0_i32 = arith.constant 0 : i32
    %c0_i32_0 = arith.constant 0 : i32
    return %c0_i32 : i32
  }
  func.func @transform_1(%arg0: i32) -> (i32, i32) {
    %c0_i32 = arith.constant 0 : i32
    %c0_i32_0 = arith.constant 0 : i32
    %c0_i32_1 = arith.constant 0 : i32
    return %c0_i32, %c0_i32_0 : i32, i32
  }
  func.func @transform_2(%arg0: i32) -> (i32, i32) {
    %c0_i32 = arith.constant 0 : i32
    %c0_i32_0 = arith.constant 0 : i32
    return %arg0, %c0_i32 : i32, i32
  }
  func.func @transform_3(%arg0: i32) -> (i32, i32) {
    %c0_i32 = arith.constant 0 : i32
    %c0_i32_0 = arith.constant 0 : i32
    return %arg0, %c0_i32 : i32, i32
  }
}

</mosaic_0001>

<bundles_post_ra>
// kernel: tpu_custom_call.1
= control target key start
LH: loop header
LB: loop body
LE: loop exit
PB: predicated region body
PF: predicated region fallthrough
CT: control target
= control target key end

     0   :  { %s3893_s0 = inlined_call_operand.hbm [shape: f32[192], index: 0, kind: input, shape index: {}]   ;;  %s3894_s1 = inlined_call_operand.hbm [shape: f32[16,256], index: 1, kind: input, shape index: {}]   ;;  %s3895_s2 = inlined_call_operand.hbm [shape: f32[8,256], index: 2, kind: input, shape index: {}]   ;;  %s3896_s3 = inlined_call_operand.hbm [shape: f32[8,1024], index: 3, kind: output, shape index: {}]  }
   0x1   :  { %4048 = sst [smem:[#allocation117_spill]] %s3896_s3 }
   0x2   :  { %8 = vsyncpa [#allocation5], 0 }
   0x3   :  { %9 = vsyncpa [#allocation3], 0 }
   0x4   :  { %10 = vsyncpa [#allocation8], 0 }
   0x5   :  { %11 = vsyncpa [#allocation4], 0  ;;  %s1860_s14 = scalar_lea.hbm %s3893_s0, 32 }
   0x6   :  { %p1861_p0 = scmp.ne.s32.totalorder %s3893_s0, %s1860_s14  ;;  %p1864_p1 = scmp.lt.u32.totalorder %s1860_s14, %s3893_s0 }
   0x8   :  { %p1866_p2 = pnand %p1864_p1, %p1861_p0 }
   0xa   :  { %1869 = shalt.err (!%p1866_p2)
}
   0xb   :  { %s1944_s19 = smov [#allocation2]   ;;  %s1945_s22 = smov [#allocation6]  }
   0xc   :  { %19 = dma.hbm_to_smem %s3893_s0, 32, %s1944_s19, [#allocation5]  }
   0xd   :  { %s25_s23 = sshll.u32 %s1945_s22, 4  ;;  %s1870_s26 = scalar_lea.hbm %s3894_s1, 512  ;;  %s26_s23 = int_to_ptr.vmem [resolvable:$true] %s25_s23 }
   0xe   :  { %p1871_p3 = scmp.ne.s32.totalorder %s3894_s1, %s1870_s26  ;;  %p1874_p4 = scmp.lt.u32.totalorder %s1870_s26, %s3894_s1 }
  0x10   :  { %p1876_p5 = pnand %p1874_p4, %p1871_p3 }
  0x12   :  { %1879 = shalt.err (!%p1876_p5)
}
  0x13   :  { %s1880_s4 = scalar_lea.vmem %s26_s23, 512  ;;  %p1885_p7 = scmp.lt.s32.totalorder %s26_s23, %s26_s23 }
  0x14   :  { %p1881_p6 = scmp.ne.s32.totalorder %s26_s23, %s1880_s4  ;;  %p1886_p8 = scmp.lt.s32.totalorder %s1880_s4, %s1880_s4 }
  0x16   :  { %p1887_p9 = por %p1886_p8, %p1885_p7 }
  0x18   :  { %p1888_p10 = pnand %p1887_p9, %p1881_p6 }
  0x1a   :  { %1891 = shalt.err (!%p1888_p10)
}
  0x1b   :  { %s1946_s0 = smov 256   ;;  %s3909_s5 = smov 16  }
  0x1c   :  { %31 = dma.hbm_to_vmem [thread:$0]  %s3894_s1, 512, %s26_s23, [#allocation3], %s1946_s0, %s1946_s0, %s3909_s5  }
  0x1d   :  { %s1948_s8 = smov [#allocation7]   ;;  %s1892_s12 = scalar_lea.hbm %s3895_s2, 256 }
  0x1e   :  { %s38_s9 = sshll.u32 %s1948_s8, 4  ;;  %p1893_p11 = scmp.ne.s32.totalorder %s3895_s2, %s1892_s12  ;;  %s39_s9 = int_to_ptr.vmem [resolvable:$true] %s38_s9 }
  0x1f   :  { %p1896_p12 = scmp.lt.u32.totalorder %s1892_s12, %s3895_s2 }
  0x21   :  { %p1898_p13 = pnand %p1896_p12, %p1893_p11 }
  0x23   :  { %1901 = shalt.err (!%p1898_p13)
}
  0x24   :  { %s1902_s17 = scalar_lea.vmem %s39_s9, 256  ;;  %p1907_p1 = scmp.lt.s32.totalorder %s39_s9, %s39_s9 }
  0x25   :  { %p1903_p0 = scmp.ne.s32.totalorder %s39_s9, %s1902_s17  ;;  %p1908_p2 = scmp.lt.s32.totalorder %s1902_s17, %s1902_s17 }
  0x27   :  { %p1909_p3 = por %p1908_p2, %p1907_p1 }
  0x29   :  { %p1910_p4 = pnand %p1909_p3, %p1903_p0 }
  0x2b   :  { %1913 = shalt.err (!%p1910_p4)
}
  0x2c   :  { %41 = dma.hbm_to_vmem [thread:$0]  %s3895_s2, 256, %s39_s9, [#allocation8]  }
  0x2d   :  { %1936 = dma.done.wait [#allocation5], 32  }
  0x2e   :  { %1937 = vsyncadd [#allocation5], 4294967264 }
  0x2f   :  { %1938 = dma.done.wait [#allocation3], 512  }
  0x30   :  { %1939 = vsyncadd [#allocation3], 4294966784 }
  0x31   :  { %1940 = dma.done.wait [#allocation8], 256  }
  0x32   :  { %1941 = vsyncadd [#allocation8], 4294967040 }
  0x33   :  { %51 = sfence }
  0x34   :  { %v2014_v0 = vld [vmem:[#allocation7] sm:$0xff]  ;;  %s3911_s19 = smov 17   ;;  %v2020_v1 = vld [vmem:[#allocation7 + $0x8] sm:$0xff]  ;;  %s3907_s2 = smov 15   ;;  %v265_v2 = vlaneseq }
  0x35   :  { %303 = vrot.lane.b32.xlu1 %v2014_v0, %s3909_s5  ;;  %261 = vrot.lane.b32.xlu0 %v2014_v0, %s3911_s19  ;;  %s3905_s20 = smov 1   ;;  %s3903_s21 = smov 127   ;;  %v246_v5 = vld [vmem:[#allocation6 + $0x1] ss:$8 sm:$0x3] }
  0x36   :  { %s3901_s22 = smov 113   ;;  %s3899_s23 = smov 112   ;;  %v272_v3 = vshrl.u32 %v265_v2, 7  ;;  %v2072_v4 = vand.u32 127, %v265_v2 }
  0x37   :  { %s3897_s24 = smov 111   ;;  %s2050_s25 = sld [smem:[#allocation2 + $0x1]]  ;;  %v244_v6 = vld [vmem:[#allocation6] ss:$8 sm:$0x3] }
  0x38   :  { %s2052_s26 = sld [smem:[#allocation2 + $0xa]]  ;;  %s2054_s27 = sld [smem:[#allocation2 + $0x13]]  ;;  %v2078_v7 = vsub.s32 0, %v272_v3  ;;  %v2080_v8 = vsub.s32 1, %v272_v3  ;;  %vm307_vm0 = vcmp.lt.s32.totalorder %v2072_v4, 16  ;;  %vm267_vm1 = vcmp.lt.s32.totalorder %v2072_v4, 17 }
  0x39   :  { %305 = vrot.lane.b32.xlu1 %v2020_v1, %s3909_s5  ;;  %263 = vrot.lane.b32.xlu0 %v2020_v1, %s3911_s19  ;;  %s2056_s28 = sld [smem:[#allocation2 + $0x1c]]  ;;  %s2058_s29 = sld [smem:[#allocation2]]  ;;  %v248_v9 = vld [vmem:[#allocation6 + $0x2] ss:$8 sm:$0x3]  ;;  %vm347_vm2 = vcmp.lt.s32.totalorder %v2072_v4, 15 }
  0x3a   :  { %s2060_s30 = sld [smem:[#allocation2 + $0x9]]  ;;  %s2062_s4 = sld [smem:[#allocation2 + $0x12]]  ;;  %v2100_v10 = vrot.slane %v246_v5, %v2078_v7  ;;  %v2103_v11 = vrot.slane %v246_v5, %v2080_v8  ;;  %v2107_v12 = vrot.slane %v244_v6, %v2078_v7  ;;  %v2110_v13 = vrot.slane %v244_v6, %v2080_v8  ;;  %v250_v14 = vld [vmem:[#allocation6 + $0x3] ss:$8 sm:$0x3] }
  0x3b   :  { %s2064_s0 = sld [smem:[#allocation2 + $0x1b]]  ;;  %s2066_s6 = sld [smem:[#allocation2 + $0x2]]  ;;  %v2125_v21 = vrot.slane %v248_v9, %v2078_v7  ;;  %v2128_v22 = vrot.slane %v248_v9, %v2080_v8  ;;  %v2133_v25 = vrot.slane %v250_v14, %v2078_v7  ;;  %v2136_v26 = vrot.slane %v250_v14, %v2080_v8  ;;  %v252_v27 = vld [vmem:[#allocation6 + $0x5] ss:$8 sm:$0x3] }
  0x3c   :  { %s2068_s7 = sld [smem:[#allocation2 + $0xb]]  ;;  %s2070_s8 = sld [smem:[#allocation2 + $0x14]]  ;;  %4049 = vst [vmem:[#allocation14_spill] sm:$0xff] %v2103_v11  ;;  %v2158_v41 = vrot.slane %v252_v27, %v2078_v7  ;;  %v254_v42 = vld [vmem:[#allocation6 + $0x6] ss:$8 sm:$0x3]  ;;  %v2169_v45 = vrot.slane %v252_v27, %v2080_v8 }
  0x3d   :  { %345 = vrot.lane.b32.xlu1 %v2020_v1, %s3907_s2  ;;  %343 = vrot.lane.b32.xlu0 %v2014_v0, %s3907_s2  ;;  %s2074_s9 = sld [smem:[#allocation2 + $0x1d]]  ;;  %s2076_s10 = sld [smem:[#allocation2 + $0x3]]  ;;  %v323_v15 = vstv %s2050_s25  ;;  %4050 = vst [vmem:[#allocation15_spill] sm:$0xff] %v2125_v21  ;;  %4051 = vst [vmem:[#allocation16_spill] sm:$0xff] %v2128_v22  ;;  %vm387_vm3 = vcmp.lt.s32.totalorder %v2072_v4, 1  ;;  %v2215_v2 = vrot.slane %v254_v42, %v2078_v7  ;;  %vm447_vm4 = vcmp.lt.s32.totalorder %v2072_v4, 127 }
  0x3e   :  { %s2082_s11 = sld [smem:[#allocation2 + $0xc]]  ;;  %s2086_s13 = sld [smem:[#allocation2 + $0x15]]  ;;  %v328_v16 = vstv %s2052_s26  ;;  %v333_v17 = vstv %s2054_s27  ;;  %4052 = vst [vmem:[#allocation17_spill] sm:$0xff] %v2133_v25  ;;  %4053 = vst [vmem:[#allocation18_spill] sm:$0xff] %v2136_v26  ;;  %v2218_v3 = vrot.slane %v254_v42, %v2080_v8  ;;  %vm487_vm5 = vcmp.lt.s32.totalorder %v2072_v4, 113 }
  0x3f   :  { %s2084_s12 = sld [smem:[#allocation2 + $0x4]]  ;;  %s2088_s14 = sld [smem:[#allocation2 + $0xd]]  ;;  %v338_v18 = vstv %s2056_s28  ;;  %v283_v19 = vstv %s2058_s29  ;;  %v256_v61 = vld [vmem:[#allocation6 + $0x7] ss:$8 sm:$0x3]  ;;  %4055 = vst [vmem:[#allocation20_spill] sm:$0xff] %v2215_v2 }
  0x40   :  { %s2090_s15 = sld [smem:[#allocation2 + $0x1e]]  ;;  %s2095_s17 = sld [smem:[#allocation2 + $0x5]]  ;;  %v288_v20 = vstv %s2060_s30  ;;  %v293_v23 = vstv %s2062_s4  ;;  %4056 = vst [vmem:[#allocation21_spill] sm:$0xff] %v2218_v3  ;;  %v258_v27 = vld [vmem:[#allocation6 + $0x10] ss:$8 sm:$0x3]  ;;  %v2230_v42 = vrot.slane %v256_v61, %v2080_v8 }
  0x41   :  { %385 = vrot.lane.b32.xlu1 %v2020_v1, %s3905_s20  ;;  %383 = vrot.lane.b32.xlu0 %v2014_v0, %s3905_s20  ;;  %s2092_s16 = sld [smem:[#allocation2 + $0x16]]  ;;  %s2097_s1 = sld [smem:[#allocation2 + $0x1f]]  ;;  %v298_v24 = vstv %s2064_s0  ;;  %v363_v28 = vstv %s2066_s6  ;;  %vm527_vm6 = vcmp.lt.s32.totalorder %v2072_v4, 112  ;;  %vm567_vm7 = vcmp.lt.s32.totalorder %v2072_v4, 111 }
  0x42   :  { %s2112_s18 = sld [smem:[#allocation2 + $0xe]]  ;;  %v368_v29 = vstv %s2068_s7  ;;  %v373_v30 = vstv %s2070_s8  ;;  %s2150_s20 = sld [smem:[#allocation2 + $0x18]]  ;;  %4058 = vst [vmem:[#allocation23_spill] sm:$0xff] %v2230_v42 }
  0x43   :  { %s2152_s2 = sld [smem:[#allocation2 + $0x21]]  ;;  %s2162_s5 = sld [smem:[#allocation2 + $0x10]] }
  0x44   :  { %s2190_s19 = sld [smem:[#allocation2 + $0x11]]  ;;  %s2232_s3 = sld [smem:[#allocation2 + $0x1a]] }
  0x45   :  { %445 = vrot.lane.b32.xlu1 %v2020_v1, %s3903_s21  ;;  %443 = vrot.lane.b32.xlu0 %v2014_v0, %s3903_s21  ;;  %v423_v31 = vstv %s2084_s12  ;;  %s2144_s21 = sld [smem:[#allocation2 + $0xf]]  ;;  %v428_v37 = vstv %s2088_s14  ;;  %s2172_s14 = sld [smem:[#allocation2 + $0x19]] }
  0x46   :  { %s2160_s12 = sld [smem:[#allocation2 + $0x7]]  ;;  %v2165_v43 = vmul.f32 %v423_v31, %v2014_v0  ;;  %v2179_v47 = vmul.f32 %v423_v31, %v2020_v1  ;;  %v2182_v48 = vmul.f32 %v428_v37, %v2014_v0  ;;  %v2185_v49 = vmul.f32 %v428_v37, %v2020_v1  ;;  %s2310_s25 = sld [smem:[#allocation2 + $0xb8]] }
  0x47   :  { %v433_v40 = vstv %s2092_s16  ;;  %v438_v44 = vstv %s2097_s1  ;;  %s2174_s16 = sld [smem:[#allocation2 + $0x22]]  ;;  %s2188_s1 = sld [smem:[#allocation2 + $0x8]] }
  0x48   :  { %v2193_v53 = vmul.f32 %v433_v40, %v2014_v0  ;;  %v2196_v54 = vmul.f32 %v433_v40, %v2020_v1  ;;  %v2205_v59 = vmul.f32 %v438_v44, %v2014_v0  ;;  %v2208_v60 = vmul.f32 %v438_v44, %v2020_v1  ;;  %s2312_s26 = sld [smem:[#allocation2 + $0xb9]]  ;;  %s2523_s28 = sld [smem:[#allocation2 + $0x55]] }
  0x49   :  { %485 = vrot.lane.b32.xlu1 %v2020_v1, %s3901_s22  ;;  %483 = vrot.lane.b32.xlu0 %v2014_v0, %s3901_s22  ;;  %s2142_s22 = sld [smem:[#allocation2 + $0x6]]  ;;  %v2227_v40 = vrot.slane %v256_v61, %v2078_v7  ;;  %v2243_v61 = vrot.slane %v258_v27, %v2078_v7  ;;  %s2525_s29 = sld [smem:[#allocation2 + $0x70]] }
  0x4a   :  { %s2527_s30 = sld [smem:[#allocation2 + $0x79]]  ;;  %s2533_s4 = sld [smem:[#allocation2 + $0x94]] }
  0x4b   :  { %4054 = sst [smem:[#allocation19_spill]] %s2144_s21  ;;  %4057 = vst [vmem:[#allocation22_spill] sm:$0xff] %v2227_v40  ;;  %s2234_s21 = sld [smem:[#allocation2 + $0x23]]  ;;  %4059 = vst [vmem:[#allocation24_spill] sm:$0xff] %v2243_v61 }
  0x4c   :  { %s4077_s27 = sld [smem:[#allocation19_spill]]  ;;  %s2535_s0 = sld [smem:[#allocation2 + $0x9d]] }
  0x4d   :  { %525 = vrot.lane.b32.xlu1 %v2020_v1, %s3899_s23  ;;  %523 = vrot.lane.b32.xlu0 %v2014_v0, %s3899_s23  ;;  %s2120_s23 = sld [smem:[#allocation2 + $0x20]]  ;;  %s2537_s6 = sld [smem:[#allocation2 + $0x3a]] }
  0x4e   :  { %s2539_s7 = sld [smem:[#allocation2 + $0x43]]  ;;  %s2541_s8 = sld [smem:[#allocation2 + $0x5e]] }
  0x51   :  { %565 = vrot.lane.b32.xlu1 %v2020_v1, %s3897_s24  ;;  %563 = vrot.lane.b32.xlu0 %v2014_v0, %s3897_s24  ;;  %s2118_s24 = sld [smem:[#allocation2 + $0x17]] }
  0x54   :  { %4108 = sst [smem:[#allocation19_spill]] %s2539_s7 }
  0xa7   :  { %v304_v32 = vpop.permute.xlu1 %303  ;;  %v262_v33 = vpop.permute.xlu0 %261 }
  0xab   :  { %v306_v51 = vpop.permute.xlu1 %305  ;;  %v264_v52 = vpop.permute.xlu0 %263 }
  0xac   :  { %v308_v57 = vsel %vm307_vm0, %v304_v32, %v306_v51  ;;  %v309_v58 = vsel %vm307_vm0, %v306_v51, %v304_v32  ;;  %v268_v62 = vsel %vm267_vm1, %v262_v33, %v264_v52  ;;  %v269_v63 = vsel %vm267_vm1, %v264_v52, %v262_v33 }
  0xad   :  { %v321_v5 = vmul.f32 %v2100_v10, %v309_v58  ;;  %v322_v6 = vmul.f32 %v2103_v11, %v308_v57  ;;  %v281_v44 = vmul.f32 %v2107_v12, %v269_v63  ;;  %v282_v51 = vmul.f32 %v2110_v13, %v268_v62 }
  0xae   :  { %v2246_v33 = vrot.slane %v258_v27, %v2080_v8 }
  0xaf   :  { %v346_v31 = vpop.permute.xlu1 %345  ;;  %v344_v32 = vpop.permute.xlu0 %343  ;;  %v324_v14 = vmul.f32 %v323_v15, %v321_v5  ;;  %v325_v63 = vmul.f32 %v323_v15, %v322_v6  ;;  %v329_v57 = vmul.f32 %v328_v16, %v321_v5  ;;  %v330_v58 = vmul.f32 %v328_v16, %v322_v6 }
  0xb0   :  { %4060 = vst [vmem:[#allocation25_spill] sm:$0xff] %v2246_v33  ;;  %v334_v37 = vmul.f32 %v333_v17, %v321_v5  ;;  %v335_v7 = vmul.f32 %v333_v17, %v322_v6  ;;  %v284_v52 = vmul.f32 %v283_v19, %v281_v44  ;;  %v285_v15 = vmul.f32 %v283_v19, %v282_v51 }
  0xb1   :  { %v289_v62 = vmul.f32 %v288_v20, %v281_v44  ;;  %v290_v9 = vmul.f32 %v288_v20, %v282_v51  ;;  %v348_v16 = vsel %vm347_vm2, %v344_v32, %v346_v31  ;;  %v349_v17 = vsel %vm347_vm2, %v346_v31, %v344_v32 }
  0xb2   :  { %v294_v55 = vmul.f32 %v293_v23, %v281_v44  ;;  %v295_v50 = vmul.f32 %v293_v23, %v282_v51  ;;  %v361_v20 = vmul.f32 %v2125_v21, %v349_v17  ;;  %v362_v46 = vmul.f32 %v2128_v22, %v348_v16 }
  0xb3   :  { %v386_v8 = vpop.permute.xlu1 %385  ;;  %v384_v27 = vpop.permute.xlu0 %383  ;;  %v339_v39 = vmul.f32 %v338_v18, %v321_v5  ;;  %v340_v38 = vmul.f32 %v338_v18, %v322_v6  ;;  %v299_v23 = vmul.f32 %v298_v24, %v281_v44  ;;  %v300_v16 = vmul.f32 %v298_v24, %v282_v51 }
  0xb4   :  { %v388_v56 = vsel %vm387_vm3, %v384_v27, %v386_v8  ;;  %v389_v19 = vsel %vm387_vm3, %v386_v8, %v384_v27  ;;  %v326_v6 = vadd.f32 %v324_v14, %v284_v52  ;;  %v327_v17 = vadd.f32 %v325_v63, %v285_v15 }
  0xb5   :  { %v401_v5 = vmul.f32 %v2133_v25, %v389_v19  ;;  %v402_v18 = vmul.f32 %v2136_v26, %v388_v56  ;;  %v331_v36 = vadd.f32 %v329_v57, %v289_v62  ;;  %v332_v34 = vadd.f32 %v330_v58, %v290_v9 }
  0xb6   :  { %v336_v35 = vadd.f32 %v334_v37, %v294_v55  ;;  %v337_v8 = vadd.f32 %v335_v7, %v295_v50  ;;  %v364_v27 = vmul.f32 %v363_v28, %v361_v20  ;;  %v365_v44 = vmul.f32 %v363_v28, %v362_v46 }
  0xb7   :  { %v446_v31 = vpop.permute.xlu1 %445  ;;  %v444_v32 = vpop.permute.xlu0 %443  ;;  %v369_v24 = vmul.f32 %v368_v29, %v361_v20  ;;  %v370_v56 = vmul.f32 %v368_v29, %v362_v46  ;;  %v374_v9 = vmul.f32 %v373_v30, %v361_v20  ;;  %v375_v55 = vmul.f32 %v373_v30, %v362_v46 }
  0xb8   :  { %v341_v28 = vadd.f32 %v339_v39, %v299_v23  ;;  %v342_v37 = vadd.f32 %v340_v38, %v300_v16  ;;  %v4061_v51 = vstv %s2076_s10  ;;  %v4063_v63 = vstv %s2074_s9  ;;  %s2543_s9 = sld [smem:[#allocation2 + $0x67]]  ;;  %s2545_s10 = sld [smem:[#allocation2 + $0x82]] }
  0xb9   :  { %v404_v52 = vmul.f32 %v4061_v51, %v401_v5  ;;  %v4062_v57 = vmov %v4061_v51  ;;  %v379_v29 = vmul.f32 %v4063_v63, %v361_v20  ;;  %v4064_v62 = vmov %v4063_v63 }
  0xba   :  { %v405_v58 = vmul.f32 %v4062_v57, %v402_v18  ;;  %v380_v7 = vmul.f32 %v4064_v62, %v362_v46  ;;  %v4065_v15 = vstv %s2082_s11  ;;  %v366_v25 = vadd.f32 %v364_v27, %v326_v6  ;;  %s2547_s11 = sld [smem:[#allocation2 + $0x8b]] }
  0xbb   :  { %v486_v50 = vpop.permute.xlu1 %485  ;;  %v484_v14 = vpop.permute.xlu0 %483  ;;  %v409_v30 = vmul.f32 %v4065_v15, %v401_v5  ;;  %v4066_v19 = vmov %v4065_v15  ;;  %v367_v22 = vadd.f32 %v365_v44, %v327_v17  ;;  %v4067_v21 = vstv %s2086_s13  ;;  %s2553_s13 = sld [smem:[#allocation2 + $0xa6]] }
  0xbc   :  { %v410_v26 = vmul.f32 %v4066_v19, %v402_v18  ;;  %v414_v11 = vmul.f32 %v4067_v21, %v401_v5  ;;  %v4068_v39 = vmov %v4067_v21  ;;  %v371_v23 = vadd.f32 %v369_v24, %v331_v36 }
  0xbd   :  { %v415_v38 = vmul.f32 %v4068_v39, %v402_v18  ;;  %v372_v16 = vadd.f32 %v370_v56, %v332_v34  ;;  %v376_v51 = vadd.f32 %v374_v9, %v336_v35  ;;  %v377_v20 = vadd.f32 %v375_v55, %v337_v8 }
  0xbe   :  { %v406_v46 = vadd.f32 %v404_v52, %v366_v25  ;;  %v407_v57 = vadd.f32 %v405_v58, %v367_v22  ;;  %v4069_v63 = vstv %s2090_s15  ;;  %v381_v17 = vadd.f32 %v379_v29, %v341_v28  ;;  %4109 = sst [smem:[#allocation26_spill]] %s2543_s9  ;;  %s2555_s15 = sld [smem:[#allocation2 + $0xaf]] }
  0xbf   :  { %v419_v62 = vmul.f32 %v4069_v63, %v401_v5  ;;  %v4070_v27 = vmov %v4069_v63  ;;  %v382_v21 = vadd.f32 %v380_v7, %v342_v37  ;;  %v411_v44 = vadd.f32 %v409_v30, %v371_v23  ;;  %v526_v19 = vpop.permute.xlu1 %525  ;;  %v524_v39 = vpop.permute.xlu0 %523 }
  0xc0   :  { %v420_v6 = vmul.f32 %v4070_v27, %v402_v18  ;;  %v412_v15 = vadd.f32 %v410_v26, %v372_v16  ;;  %v416_v36 = vadd.f32 %v414_v11, %v376_v51  ;;  %v417_v34 = vadd.f32 %v415_v38, %v377_v20  ;;  %4110 = sst [smem:[#allocation27_spill]] %s2547_s11  ;;  %s2804_s11 = sld [smem:[#allocation2 + $0x9c]] }
  0xc1   :  { %v448_v35 = vsel %vm447_vm4, %v444_v32, %v446_v31  ;;  %v449_v22 = vsel %vm447_vm4, %v446_v31, %v444_v32  ;;  %v603_v5 = vstv %s2310_s25  ;;  %v608_v26 = vstv %s2312_s26  ;;  %4111 = sst [smem:[#allocation28_spill]] %s2553_s13  ;;  %s4115_s25 = smov 127  }
  0xc2   :  { %v461_v25 = vmul.f32 %v2158_v41, %v448_v35  ;;  %v462_v8 = vmul.f32 %v2169_v45, %v449_v22  ;;  %v421_v11 = vadd.f32 %v419_v62, %v381_v17  ;;  %v422_v18 = vadd.f32 %v420_v6, %v382_v21  ;;  %s2573_s26 = sld [smem:[#allocation2 + $0x6c]] }
  0xc3   :  { %v426_v24 = vadd.f32 %v2165_v43, %v406_v46  ;;  %v427_v56 = vadd.f32 %v2179_v47, %v407_v57  ;;  %v431_v9 = vadd.f32 %v2182_v48, %v411_v44  ;;  %v432_v31 = vadd.f32 %v2185_v49, %v412_v15  ;;  %v566_v51 = vpop.permute.xlu1 %565  ;;  %v564_v20 = vpop.permute.xlu0 %563 }
  0xc4   :  { %v488_v32 = vsel %vm487_vm5, %v484_v14, %v486_v50  ;;  %v489_v55 = vsel %vm487_vm5, %v486_v50, %v484_v14  ;;  %v436_v28 = vadd.f32 %v2193_v53, %v416_v36  ;;  %v437_v37 = vadd.f32 %v2196_v54, %v417_v34  ;;  %4112 = sst [smem:[#allocation29_spill]] %s2555_s15  ;;  %s2601_s15 = sld [smem:[#allocation2 + $0x7e]] }
  0xc5   :  { %v4071_v52 = vstv %s2095_s17  ;;  %v4073_v29 = vstv %s2112_s18  ;;  %v4075_v30 = vstv %s2118_s24  ;;  %v441_v50 = vadd.f32 %v2205_v59, %v421_v11  ;;  %s2521_s24 = sld [smem:[#allocation2 + $0x4c]]  ;;  %s2559_s18 = sld [smem:[#allocation2 + $0xb5]] }
  0xc6   :  { %v464_v43 = vmul.f32 %v4071_v52, %v461_v25  ;;  %v4072_v58 = vmov %v4071_v52  ;;  %v469_v48 = vmul.f32 %v4073_v29, %v461_v25  ;;  %v4074_v7 = vmov %v4073_v29  ;;  %s2557_s17 = sld [smem:[#allocation2 + $0xb4]] }
  0xc7   :  { %v465_v47 = vmul.f32 %v4072_v58, %v462_v8  ;;  %v470_v49 = vmul.f32 %v4074_v7, %v462_v8  ;;  %v474_v38 = vmul.f32 %v4075_v30, %v461_v25  ;;  %v4076_v23 = vmov %v4075_v30  ;;  %4189 = sst [smem:[#allocation85_spill]] %s2804_s11 }
  0xc8   :  { %v475_v16 = vmul.f32 %v4076_v23, %v462_v8  ;;  %v442_v53 = vadd.f32 %v2208_v60, %v422_v18  ;;  %v501_v54 = vmul.f32 %v2215_v2, %v488_v32  ;;  %v502_v14 = vmul.f32 %v2218_v3, %v489_v55  ;;  %4116 = sst [smem:[#allocation32_spill]] %s2573_s26  ;;  %s2593_s26 = sld [smem:[#allocation2 + $0x75]] }
  0xc9   :  { %v4078_v46 = vstv %s2120_s23  ;;  %v528_v27 = vsel %vm527_vm6, %v524_v39, %v526_v19  ;;  %v529_v59 = vsel %vm527_vm6, %v526_v19, %v524_v39  ;;  %v466_v6 = vadd.f32 %v464_v43, %v426_v24  ;;  %s2519_s23 = sld [smem:[#allocation2 + $0x31]] }
  0xca   :  { %v479_v57 = vmul.f32 %v4078_v46, %v461_v25  ;;  %v4079_v63 = vmov %v4078_v46  ;;  %v467_v60 = vadd.f32 %v465_v47, %v427_v56  ;;  %v568_v17 = vsel %vm567_vm7, %v564_v20, %v566_v51  ;;  %4125 = sst [smem:[#allocation41_spill]] %s2601_s15  ;;  %s2617_s15 = sld [smem:[#allocation2 + $0x25]] }
  0xcb   :  { %v480_v62 = vmul.f32 %v4079_v63, %v462_v8  ;;  %v569_v21 = vsel %vm567_vm7, %v566_v51, %v564_v20  ;;  %v471_v44 = vadd.f32 %v469_v48, %v431_v9  ;;  %v472_v15 = vadd.f32 %v470_v49, %v432_v31 }
  0xcc   :  { %v476_v36 = vadd.f32 %v474_v38, %v436_v28  ;;  %v477_v34 = vadd.f32 %v475_v16, %v437_v37  ;;  %v4080_v35 = vstv %s2142_s22  ;;  %v4082_v25 = vstv %s4077_s27  ;;  %s2517_s22 = sld [smem:[#allocation2 + $0x28]] }
  0xcd   :  { %v504_v19 = vmul.f32 %v4080_v35, %v501_v54  ;;  %v4081_v39 = vmov %v4080_v35  ;;  %v509_v8 = vmul.f32 %v4082_v25, %v501_v54  ;;  %v4083_v11 = vmov %v4082_v25  ;;  %s2575_s27 = sld [smem:[#allocation2 + $0x90]] }
  0xce   :  { %v505_v22 = vmul.f32 %v4081_v39, %v502_v14  ;;  %v510_v18 = vmul.f32 %v4083_v11, %v502_v14  ;;  %v481_v24 = vadd.f32 %v479_v57, %v441_v50  ;;  %v482_v56 = vadd.f32 %v480_v62, %v442_v53  ;;  %4121 = sst [smem:[#allocation37_spill]] %s2593_s26  ;;  %s2627_s26 = sld [smem:[#allocation2 + $0x52]] }
  0xcf   :  { %v541_v9 = vmul.f32 %v2227_v40, %v528_v27  ;;  %v542_v31 = vmul.f32 %v2230_v42, %v529_v59  ;;  %v4084_v32 = vstv %s2150_s20  ;;  %v581_v52 = vmul.f32 %v2243_v61, %v568_v17  ;;  %s4106_s20 = smov 15  }
  0xd0   :  { %v514_v55 = vmul.f32 %v4084_v32, %v501_v54  ;;  %v4085_v28 = vmov %v4084_v32  ;;  %v582_v43 = vmul.f32 %v2246_v33, %v569_v21  ;;  %v4086_v58 = vstv %s2160_s12  ;;  %s2561_s12 = sld [smem:[#allocation2 + $0xb6]] }
  0xd1   :  { %v515_v37 = vmul.f32 %v4085_v28, %v502_v14  ;;  %v544_v47 = vmul.f32 %v4086_v58, %v541_v9  ;;  %v4087_v29 = vmov %v4086_v58  ;;  %v4088_v7 = vstv %s2162_s5  ;;  %s2414_s5 = sld [smem:[#allocation2 + $0xba]]  ;;  %4131 = sst [smem:[#allocation47_spill]] %s2617_s15 }
  0xd2   :  { %v545_v48 = vmul.f32 %v4087_v29, %v542_v31  ;;  %v549_v49 = vmul.f32 %v4088_v7, %v541_v9  ;;  %v4089_v30 = vmov %v4088_v7  ;;  %v506_v23 = vadd.f32 %v504_v19, %v466_v6  ;;  %s2859_s15 = sld [smem:[#allocation2 + $0x66]] }
  0xd3   :  { %v550_v38 = vmul.f32 %v4089_v30, %v542_v31  ;;  %v507_v16 = vadd.f32 %v505_v22, %v467_v60  ;;  %v511_v51 = vadd.f32 %v509_v8, %v471_v44  ;;  %v512_v20 = vadd.f32 %v510_v18, %v472_v15  ;;  %4117 = sst [smem:[#allocation33_spill]] %s2575_s27  ;;  %s2595_s27 = sld [smem:[#allocation2 + $0x99]] }
  0xd4   :  { %v4090_v50 = vstv %s2152_s2  ;;  %v4092_v63 = vstv %s2172_s14  ;;  %v546_v17 = vadd.f32 %v544_v47, %v506_v23  ;;  %v4094_v6 = vstv %s2188_s1  ;;  %s4105_s2 = smov 16   ;;  %s2563_s14 = sld [smem:[#allocation2 + $0xb7]] }
  0xd5   :  { %v519_v53 = vmul.f32 %v4090_v50, %v501_v54  ;;  %v4091_v46 = vmov %v4090_v50  ;;  %v554_v62 = vmul.f32 %v4092_v63, %v541_v9  ;;  %v4093_v27 = vmov %v4092_v63  ;;  %s2567_s1 = sld [smem:[#allocation2 + $0x48]]  ;;  %4136 = sst [smem:[#allocation52_spill]] %s2627_s26 }
  0xd6   :  { %v520_v57 = vmul.f32 %v4091_v46, %v502_v14  ;;  %v555_v59 = vmul.f32 %v4093_v27, %v542_v31  ;;  %v547_v21 = vadd.f32 %v545_v48, %v507_v16  ;;  %v551_v35 = vadd.f32 %v549_v49, %v511_v51  ;;  %s2641_s26 = sld [smem:[#allocation2 + $0x5b]] }
  0xd7   :  { %v552_v39 = vadd.f32 %v550_v38, %v512_v20  ;;  %v584_v60 = vmul.f32 %v4094_v6, %v581_v52  ;;  %v4095_v44 = vmov %v4094_v6  ;;  %v4096_v54 = vstv %s2190_s19  ;;  %s1842_s19 = sld [smem:[#allocation2 + $0xbb]] }
  0xd8   :  { %v585_v15 = vmul.f32 %v4095_v44, %v582_v43  ;;  %v589_v19 = vmul.f32 %v4096_v54, %v581_v52  ;;  %v4097_v22 = vmov %v4096_v54  ;;  %v516_v25 = vadd.f32 %v514_v55, %v476_v36  ;;  %4197 = sst [smem:[#allocation91_spill]] %s2859_s15 }
  0xd9   :  { %v590_v14 = vmul.f32 %v4097_v22, %v582_v43  ;;  %v517_v8 = vadd.f32 %v515_v37, %v477_v34  ;;  %v4098_v11 = vstv %s2232_s3  ;;  %v586_v58 = vadd.f32 %v584_v60, %v546_v17  ;;  %s4104_s3 = smov 17   ;;  %4122 = sst [smem:[#allocation38_spill]] %s2595_s27 }
  0xda   :  { %v594_v18 = vmul.f32 %v4098_v11, %v581_v52  ;;  %v4099_v32 = vmov %v4098_v11  ;;  %v587_v47 = vadd.f32 %v585_v15, %v547_v21  ;;  %v591_v29 = vadd.f32 %v589_v19, %v551_v35  ;;  %s2613_s27 = sld [smem:[#allocation2 + $0x87]]  ;;  %s3013_s15 = sld [smem:[#allocation2 + $0x2a]] }
  0xdb   :  { %v595_v28 = vmul.f32 %v4099_v32, %v582_v43  ;;  %v592_v48 = vadd.f32 %v590_v14, %v552_v39  ;;  %v556_v7 = vadd.f32 %v554_v62, %v516_v25  ;;  %v557_v49 = vadd.f32 %v555_v59, %v517_v8  ;;  %4114 = sst [smem:[#allocation31_spill]] %s2567_s1 }
  0xdc   :  { %v4100_v30 = vstv %s2174_s16  ;;  %v521_v34 = vadd.f32 %v519_v53, %v481_v24  ;;  %v522_v55 = vadd.f32 %v520_v57, %v482_v56  ;;  %v604_v37 = vadd.f32 %v603_v5, %v586_v58  ;;  %s2565_s16 = sld [smem:[#allocation2 + $0x24]]  ;;  %s2597_s1 = sld [smem:[#allocation2 + $0x36]] }
  0xdd   :  { %v559_v38 = vmul.f32 %v4100_v30, %v541_v9  ;;  %v4101_v23 = vmov %v4100_v30  ;;  %v605_v16 = vadd.f32 %v603_v5, %v587_v47  ;;  %v596_v51 = vadd.f32 %v594_v18, %v556_v7  ;;  %4140 = sst [smem:[#allocation56_spill]] %s2641_s26  ;;  %s2657_s26 = sld [smem:[#allocation2 + $0x40]] }
  0xde   :  { %v560_v36 = vmul.f32 %v4101_v23, %v542_v31  ;;  %v597_v20 = vadd.f32 %v595_v28, %v557_v49  ;;  %v4102_v50 = vstv %s2234_s21  ;;  %v2440_v27 = vmax.f32 %v604_v37, 0.0  ;;  %s4107_s21 = smov 1  }
  0xdf   :  { %v599_v46 = vmul.f32 %v4102_v50, %v581_v52  ;;  %v4103_v63 = vmov %v4102_v50  ;;  %v2442_v59 = vmax.f32 %v605_v16, 0.0  ;;  %v609_v9 = vadd.f32 %v608_v26, %v591_v29 }
  0xe0   :  { %v600_v62 = vmul.f32 %v4103_v63, %v582_v43  ;;  %v610_v31 = vadd.f32 %v608_v26, %v592_v48  ;;  %v561_v24 = vadd.f32 %v559_v38, %v521_v34  ;;  %v562_v56 = vadd.f32 %v560_v36, %v522_v55  ;;  %647 = vrot.lane.b32.xlu0 %v2440_v27, %s4104_s3  ;;  %4129 = sst [smem:[#allocation45_spill]] %s2613_s27  ;;  %s2802_s27 = sld [smem:[#allocation2 + $0x78]] }
  0xe1   :  { %v613_v53 = vstv %s2414_s5  ;;  %649 = vrot.lane.b32.xlu1 %v2442_v59, %s4104_s3  ;;  %v2453_v43 = vmax.f32 %v609_v9, 0.0  ;;  %v618_v35 = vstv %s1842_s19  ;;  %s2577_s5 = sld [smem:[#allocation2 + $0xbc]]  ;;  %s2579_s19 = sld [smem:[#allocation2 + $0xbd]]  ;;  %v1095_v54 = vstv %s2517_s22 }
  0xe2   :  { %v601_v5 = vadd.f32 %v599_v46, %v561_v24  ;;  %v602_v52 = vadd.f32 %v600_v62, %v562_v56  ;;  %v2455_v57 = vmax.f32 %v610_v31, 0.0  ;;  %v614_v17 = vadd.f32 %v613_v53, %v596_v51  ;;  %4113 = sst [smem:[#allocation30_spill]] %s2565_s16  ;;  %s2599_s16 = sld [smem:[#allocation2 + $0x5a]] }
  0xe3   :  { %v615_v21 = vadd.f32 %v613_v53, %v597_v20  ;;  %4123 = sst [smem:[#allocation39_spill]] %s2597_s1  ;;  %v1115_v19 = vstv %s2519_s23  ;;  %v1100_v22 = vstv %s2521_s24  ;;  %v1105_v14 = vstv %s2525_s29  ;;  %s2838_s23 = sld [smem:[#allocation2 + $0x81]] }
  0xe4   :  { %675 = vrot.lane.b32.xlu0 %v2453_v43, %s4104_s3  ;;  %v2461_v26 = vmax.f32 %v614_v17, 0.0  ;;  %v619_v6 = vadd.f32 %v618_v35, %v601_v5  ;;  %v620_v60 = vadd.f32 %v618_v35, %v602_v52  ;;  %s2625_s1 = sld [smem:[#allocation2 + $0x2e]]  ;;  %v1120_v25 = vstv %s2523_s28  ;;  %4143 = sst [smem:[#allocation59_spill]] %s2657_s26 }
  0xe5   :  { %677 = vrot.lane.b32.xlu1 %v2455_v57, %s4104_s3  ;;  %v2463_v39 = vmax.f32 %v615_v21, 0.0  ;;  %v1125_v8 = vstv %s2527_s30  ;;  %v623_v11 = vstv %s2557_s17  ;;  %v1110_v18 = vstv %s2533_s4  ;;  %s4145_s17 = smov 113   ;;  %s2745_s26 = sld [smem:[#allocation2 + $0x65]] }
  0xe6   :  { %v2469_v44 = vmax.f32 %v619_v6, 0.0  ;;  %v2471_v15 = vmax.f32 %v620_v60, 0.0  ;;  %v1130_v32 = vstv %s2535_s0  ;;  %v1135_v28 = vstv %s2537_s6  ;;  %4188 = sst [smem:[#allocation84_spill]] %s2802_s27  ;;  %s2840_s28 = sld [smem:[#allocation2 + $0xa5]] }
  0xe7   :  { %v629_v58 = vstv %s2559_s18  ;;  %v635_v47 = vstv %s2561_s12  ;;  %v1140_v29 = vstv %s2541_s8  ;;  %v1155_v48 = vstv %s2539_s7  ;;  %s2677_s18 = sld [smem:[#allocation2 + $0x26]]  ;;  %s2679_s12 = sld [smem:[#allocation2 + $0x4a]] }
  0xe8   :  { %703 = vrot.lane.b32.xlu0 %v2461_v26, %s4104_s3  ;;  %4124 = sst [smem:[#allocation40_spill]] %s2599_s16  ;;  %s2615_s16 = sld [smem:[#allocation2 + $0xab]]  ;;  %v1145_v7 = vstv %s2545_s10  ;;  %v1160_v49 = vstv %s2543_s9  ;;  %v624_v30 = vmul.f32 %v623_v11, %v2014_v0  ;;  %v625_v38 = vmul.f32 %v623_v11, %v2020_v1 }
  0xe9   :  { %705 = vrot.lane.b32.xlu1 %v2463_v39, %s4104_s3  ;;  %v626_v23 = vstv %s2577_s5  ;;  %v641_v36 = vstv %s2563_s14  ;;  %v630_v34 = vmul.f32 %v629_v58, %v2014_v0  ;;  %v631_v55 = vmul.f32 %v629_v58, %v2020_v1  ;;  %s2691_s5 = sld [smem:[#allocation2 + $0x2f]]  ;;  %s2743_s7 = sld [smem:[#allocation2 + $0x41]] }
  0xea   :  { %4135 = sst [smem:[#allocation51_spill]] %s2625_s1  ;;  %s2639_s1 = sld [smem:[#allocation2 + $0x37]]  ;;  %v636_v37 = vmul.f32 %v635_v47, %v2014_v0  ;;  %v637_v16 = vmul.f32 %v635_v47, %v2020_v1  ;;  %v632_v51 = vstv %s2579_s19  ;;  %v1150_v50 = vstv %s2553_s13 }
  0xeb   :  { %v642_v63 = vmul.f32 %v641_v36, %v2014_v0  ;;  %v643_v62 = vmul.f32 %v641_v36, %v2020_v1  ;;  %s2703_s19 = sld [smem:[#allocation2 + $0x77]]  ;;  %v2710_v9 = vmul.f32 %v1095_v54, %v2442_v59  ;;  %v2713_v24 = vadd.f32 %v626_v23, %v624_v30  ;;  %4172 = sst [smem:[#allocation75_spill]] %s2745_s26 }
  0xec   :  { %731 = vrot.lane.b32.xlu0 %v2469_v44, %s4104_s3  ;;  %v2715_v56 = vadd.f32 %v626_v23, %v625_v38  ;;  %v2725_v1 = vmul.f32 %v1100_v22, %v2442_v59  ;;  %v2727_v53 = vadd.f32 %v632_v51, %v630_v34  ;;  %v2729_v5 = vadd.f32 %v632_v51, %v631_v55  ;;  %s2763_s26 = sld [smem:[#allocation2 + $0x27]]  ;;  %4193 = sst [smem:[#allocation89_spill]] %s2840_s28 }
  0xed   :  { %733 = vrot.lane.b32.xlu1 %v2471_v15, %s4104_s3  ;;  %s2581_s3 = sld [smem:[#allocation2 + $0xbe]]  ;;  %4149 = sst [smem:[#allocation64_spill]] %s2679_s12  ;;  %v2770_v36 = vmul.f32 %v1105_v14, %v2442_v59  ;;  %v2775_v34 = vmul.f32 %v1110_v18, %v2442_v59  ;;  %v2819_v51 = vmul.f32 %v1120_v25, %v2455_v57  ;;  %v2869_v55 = vmul.f32 %v1105_v14, %v2440_v27 }
  0xee   :  { %4130 = sst [smem:[#allocation46_spill]] %s2615_s16  ;;  %s2693_s12 = sld [smem:[#allocation2 + $0x53]]  ;;  %v2893_v14 = vmul.f32 %v1135_v28, %v2463_v39  ;;  %v2919_v30 = vmul.f32 %v1145_v7, %v2463_v39  ;;  %v2930_v38 = vmul.f32 %v1150_v50, %v2461_v26  ;;  %v2935_v23 = vmul.f32 %v1150_v50, %v2463_v39 }
  0xef   :  { %4148 = sst [smem:[#allocation63_spill]] %s2677_s18  ;;  %s2720_s18 = sld [smem:[#allocation2 + $0x5c]]  ;;  %v2959_v60 = vmul.f32 %v1155_v48, %v2471_v15  ;;  %v2998_v6 = vmul.f32 %v1160_v49, %v2469_v44  ;;  %v3003_v47 = vmul.f32 %v1160_v49, %v2471_v15 }
  0xf0   :  { %759 = vrot.lane.b32.xlu0 %v2440_v27, %s4105_s2  ;;  %4139 = sst [smem:[#allocation55_spill]] %s2639_s1  ;;  %s2659_s1 = sld [smem:[#allocation2 + $0x64]]  ;;  %4214 = vst [vmem:[#allocation99_spill] sm:$0xff] %v2919_v30  ;;  %4219 = vst [vmem:[#allocation101_spill] sm:$0xff] %v2930_v38 }
  0xf1   :  { %761 = vrot.lane.b32.xlu1 %v2442_v59, %s4105_s2  ;;  %4156 = sst [smem:[#allocation68_spill]] %s2703_s19  ;;  %s2735_s19 = sld [smem:[#allocation2 + $0x80]]  ;;  %4221 = vst [vmem:[#allocation102_spill] sm:$0xff] %v2935_v23  ;;  %4233 = vst [vmem:[#allocation106_spill] sm:$0xff] %v2959_v60 }
  0xf2   :  { %4170 = sst [smem:[#allocation74_spill]] %s2743_s7  ;;  %s2765_s7 = sld [smem:[#allocation2 + $0x4b]]  ;;  %4244 = vst [vmem:[#allocation109_spill] sm:$0xff] %v2998_v6  ;;  %4245 = vst [vmem:[#allocation110_spill] sm:$0xff] %v3003_v47 }
  0xf3   :  { %v638_v20 = vstv %s2581_s3  ;;  %s2759_s3 = sld [smem:[#allocation2 + $0xad]]  ;;  %4192 = sst [smem:[#allocation88_spill]] %s2838_s23 }
  0xf4   :  { %787 = vrot.lane.b32.xlu0 %v2453_v43, %s4105_s2  ;;  %4155 = sst [smem:[#allocation67_spill]] %s2693_s12  ;;  %v2731_v52 = vadd.f32 %v638_v20, %v636_v37  ;;  %v2733_v17 = vadd.f32 %v638_v20, %v637_v16  ;;  %s2757_s12 = sld [smem:[#allocation2 + $0x89]]  ;;  %v2814_v20 = vmul.f32 %v1120_v25, %v2453_v43  ;;  %v2835_v37 = vmul.f32 %v1125_v8, %v2455_v57 }
  0xf5   :  { %789 = vrot.lane.b32.xlu1 %v2455_v57, %s4105_s2  ;;  %4163 = sst [smem:[#allocation71_spill]] %s2720_s18  ;;  %s2781_s18 = sld [smem:[#allocation2 + $0x6f]]  ;;  %v2845_v16 = vmul.f32 %v1130_v32, %v2453_v43  ;;  %v2864_v25 = vmul.f32 %v1100_v22, %v2440_v27  ;;  %v2903_v22 = vmul.f32 %v1140_v29, %v2463_v39 }
  0xf6   :  { %4144 = sst [smem:[#allocation60_spill]] %s2659_s1  ;;  %s2790_s1 = sld [smem:[#allocation2 + $0x54]] }
  0xf7   :  { %4166 = sst [smem:[#allocation72_spill]] %s2735_s19  ;;  %s2825_s16 = sld [smem:[#allocation2 + $0x5d]]  ;;  %4208 = vst [vmem:[#allocation95_spill] sm:$0xff] %v2903_v22 }
  0xf8   :  { %815 = vrot.lane.b32.xlu0 %v2461_v26, %s4105_s2  ;;  %4180 = sst [smem:[#allocation78_spill]] %s2763_s26  ;;  %s2857_s9 = sld [smem:[#allocation2 + $0x42]] }
  0xf9   :  { %817 = vrot.lane.b32.xlu1 %v2463_v39, %s4105_s2  ;;  %4179 = sst [smem:[#allocation77_spill]] %s2759_s3  ;;  %s4200_s0 = smov 112  }
  0xfa   :  { %4178 = sst [smem:[#allocation76_spill]] %s2757_s12  ;;  %s2886_s29 = sld [smem:[#allocation2 + $0x8a]] }
  0xfb   :  { %4181 = sst [smem:[#allocation79_spill]] %s2765_s7  ;;  %s2923_s30 = sld [smem:[#allocation2 + $0x71]] }
  0xfc   :  { %843 = vrot.lane.b32.xlu0 %v2469_v44, %s4105_s2  ;;  %4182 = sst [smem:[#allocation80_spill]] %s2781_s18  ;;  %s2888_s4 = sld [smem:[#allocation2 + $0xae]] }
  0xfd   :  { %845 = vrot.lane.b32.xlu1 %v2471_v15, %s4105_s2  ;;  %s2583_s2 = sld [smem:[#allocation2 + $0xbf]]  ;;  %4186 = sst [smem:[#allocation83_spill]] %s2790_s1 }
  0xfe   :  { %4191 = sst [smem:[#allocation87_spill]] %s2825_s16  ;;  %s2925_s19 = sld [smem:[#allocation2 + $0x95]] }
  0xff   :  { %4196 = sst [smem:[#allocation90_spill]] %s2857_s9  ;;  %s2969_s8 = sld [smem:[#allocation2 + $0x3b]] }
 0x100   :  { %871 = vrot.lane.b32.xlu0 %v2440_v27, %s4106_s20  ;;  %4202 = sst [smem:[#allocation28_spill]] %s2886_s29  ;;  %s2907_s29 = sld [smem:[#allocation2 + $0x29]] }
 0x101   :  { %873 = vrot.lane.b32.xlu1 %v2442_v59, %s4106_s20  ;;  %4217 = sst [smem:[#allocation19_spill]] %s2923_s30  ;;  %s2971_s23 = sld [smem:[#allocation2 + $0x5f]] }
 0x102   :  { %4203 = sst [smem:[#allocation93_spill]] %s2888_s4  ;;  %s2909_s4 = sld [smem:[#allocation2 + $0x4d]] }
 0x103   :  { %4118 = sst [smem:[#allocation34_spill]] %s2583_s2  ;;  %s2603_s2 = sld [smem:[#allocation2 + $0xa2]] }
 0x104   :  { %899 = vrot.lane.b32.xlu0 %v2453_v43, %s4106_s20  ;;  %s4153_s14 = sld [smem:[#allocation34_spill]]  ;;  %4218 = sst [smem:[#allocation100_spill]] %s2925_s19 }
 0x105   :  { %901 = vrot.lane.b32.xlu1 %v2455_v57, %s4106_s20  ;;  %4154 = sst [smem:[#allocation34_spill]] %s2691_s5  ;;  %s2943_s19 = sld [smem:[#allocation2 + $0x56]] }
 0x106   :  { %4210 = sst [smem:[#allocation96_spill]] %s2907_s29  ;;  %s2987_s30 = sld [smem:[#allocation2 + $0x68]] }
 0x107   :  { %s2985_s22 = sld [smem:[#allocation2 + $0x44]]  ;;  %s3007_s5 = sld [smem:[#allocation2 + $0xb0]] }
 0x108   :  { %927 = vrot.lane.b32.xlu0 %v2461_v26, %s4106_s20  ;;  %4211 = sst [smem:[#allocation97_spill]] %s2909_s4  ;;  %s3015_s13 = sld [smem:[#allocation2 + $0x4e]] }
 0x109   :  { %929 = vrot.lane.b32.xlu1 %v2463_v39, %s4106_s20  ;;  %4126 = sst [smem:[#allocation42_spill]] %s2603_s2  ;;  %s3021_s28 = sld [smem:[#allocation2 + $0x72]] }
 0x10a   :  { %s2623_s2 = sld [smem:[#allocation2 + $0x91]]  ;;  %v644_v0 = vstv %s4153_s14  ;;  %s2783_s14 = sld [smem:[#allocation2 + $0x93]] }
 0x10b   :  { %v2751_v11 = vadd.f32 %v644_v0, %v642_v63  ;;  %v2753_v58 = vadd.f32 %v644_v0, %v643_v62  ;;  %v2795_v0 = vmul.f32 %v1115_v19, %v2453_v43  ;;  %v2809_v62 = vmul.f32 %v1115_v19, %v2455_v57  ;;  %4227 = sst [smem:[#allocation104_spill]] %s2943_s19  ;;  %s2963_s19 = sld [smem:[#allocation2 + $0x9e]] }
 0x10c   :  { %955 = vrot.lane.b32.xlu0 %v2469_v44, %s4106_s20  ;;  %v2830_v19 = vmul.f32 %v1125_v8, %v2453_v43  ;;  %v2850_v63 = vmul.f32 %v1130_v32, %v2455_v57  ;;  %v2855_v8 = vmul.f32 %v1095_v54, %v2440_v27  ;;  %v2874_v32 = vmul.f32 %v1110_v18, %v2440_v27  ;;  %4247 = sst [smem:[#allocation111_spill]] %s3013_s15  ;;  %s4252_s24 = sld [smem:[#allocation88_spill]] }
 0x10d   :  { %957 = vrot.lane.b32.xlu1 %v2471_v15, %s4106_s20  ;;  %s2585_s20 = sld [smem:[#allocation2 + $0x2d]]  ;;  %v2879_v54 = vmul.f32 %v1135_v28, %v2461_v26  ;;  %v2898_v18 = vmul.f32 %v1140_v29, %v2461_v26  ;;  %v2914_v28 = vmul.f32 %v1145_v7, %v2461_v26  ;;  %v2954_v29 = vmul.f32 %v1155_v48, %v2469_v44  ;;  %4246 = sst [smem:[#allocation26_spill]] %s3007_s5 }
 0x10e   :  { %4249 = sst [smem:[#allocation112_spill]] %s3015_s13  ;;  %s3023_s9 = sld [smem:[#allocation2 + $0x96]] }
 0x10f   :  { %4199 = vst [vmem:[#allocation92_spill] sm:$0xff] %v2879_v54  ;;  %4206 = vst [vmem:[#allocation94_spill] sm:$0xff] %v2898_v18  ;;  %s4253_s10 = sld [smem:[#allocation89_spill]]  ;;  %s4254_s3 = sld [smem:[#allocation90_spill]] }
 0x110   :  { %983 = vrot.lane.b32.xlu0 %v2440_v27, %s4107_s21  ;;  %4134 = sst [smem:[#allocation50_spill]] %s2623_s2  ;;  %4212 = vst [vmem:[#allocation98_spill] sm:$0xff] %v2914_v28  ;;  %4231 = vst [vmem:[#allocation105_spill] sm:$0xff] %v2954_v29  ;;  %s4251_s2 = sld [smem:[#allocation27_spill]] }
 0x111   :  { %985 = vrot.lane.b32.xlu1 %v2442_v59, %s4107_s21  ;;  %4183 = sst [smem:[#allocation81_spill]] %s2783_s14  ;;  %s3031_s29 = sld [smem:[#allocation2 + $0x57]] }
 0x112   :  { %4237 = sst [smem:[#allocation108_spill]] %s2963_s19  ;;  %s3029_s19 = sld [smem:[#allocation2 + $0x33]] }
 0x113   :  { %4119 = sst [smem:[#allocation35_spill]] %s2585_s20  ;;  %s2605_s20 = sld [smem:[#allocation2 + $0x3f]] }
 0x114   :  { %1011 = vrot.lane.b32.xlu0 %v2453_v43, %s4107_s21  ;;  %s4260_s18 = sld [smem:[#allocation96_spill]]  ;;  %s4261_s7 = sld [smem:[#allocation97_spill]] }
 0x115   :  { %1013 = vrot.lane.b32.xlu1 %v2455_v57, %s4107_s21  ;;  %s3049_s1 = sld [smem:[#allocation2 + $0x7b]]  ;;  %s3051_s4 = sld [smem:[#allocation2 + $0x9f]] }
 0x116   :  { %v4262_v31 = vstv %s4251_s2  ;;  %s4272_s16 = sld [smem:[#allocation29_spill]]  ;;  %s3059_s6 = sld [smem:[#allocation2 + $0x60]] }
 0x117   :  { %4258 = sst [smem:[#allocation88_spill]] %s3031_s29  ;;  %v3042_v21 = vmul.f32 %v4262_v31, %v2469_v44  ;;  %v4264_v7 = vmov %v4262_v31  ;;  %s3073_s12 = sld [smem:[#allocation2 + $0x45]] }
 0x118   :  { %1039 = vrot.lane.b32.xlu0 %v2461_v26, %s4107_s21  ;;  %4256 = sst [smem:[#allocation27_spill]] %s3029_s19  ;;  %v3047_v35 = vmul.f32 %v4264_v7, %v2471_v15  ;;  %s3075_s26 = sld [smem:[#allocation2 + $0x69]] }
 0x119   :  { %1041 = vrot.lane.b32.xlu1 %v2463_v39, %s4107_s21  ;;  %4127 = sst [smem:[#allocation43_spill]] %s2605_s20  ;;  %s2619_s20 = sld [smem:[#allocation2 + $0x49]]  ;;  %4263 = vst [vmem:[#allocation113_spill] sm:$0xff] %v3042_v21 }
 0x11a   :  { %4266 = vst [vmem:[#allocation114_spill] sm:$0xff] %v3047_v35  ;;  %s4275_s14 = smov 111   ;;  %s3093_s29 = sld [smem:[#allocation2 + $0x8d]] }
 0x11b   :  { %4268 = sst [smem:[#allocation89_spill]] %s3049_s1  ;;  %s3065_s1 = sld [smem:[#allocation2 + $0x84]] }
 0x11c   :  { %1067 = vrot.lane.b32.xlu0 %v2469_v44, %s4107_s21  ;;  %4270 = sst [smem:[#allocation90_spill]] %s3051_s4  ;;  %s3067_s4 = sld [smem:[#allocation2 + $0xa8]]  ;;  %v4276_v50 = vstv %s4272_s16 }
 0x11d   :  { %1069 = vrot.lane.b32.xlu1 %v2471_v15, %s4107_s21  ;;  %s2587_s21 = sld [smem:[#allocation2 + $0x51]]  ;;  %v3084_v46 = vmul.f32 %v4276_v50, %v2469_v44  ;;  %v4278_v49 = vmov %v4276_v50  ;;  %s4282_s27 = sld [smem:[#allocation27_spill]] }
 0x11e   :  { %v3089_v48 = vmul.f32 %v4278_v49, %v2471_v15  ;;  %s4283_s16 = sld [smem:[#allocation88_spill]]  ;;  %s4284_s11 = sld [smem:[#allocation89_spill]] }
 0x11f   :  { %4132 = sst [smem:[#allocation48_spill]] %s2619_s20  ;;  %s2633_s20 = sld [smem:[#allocation2 + $0x76]]  ;;  %4277 = vst [vmem:[#allocation115_spill] sm:$0xff] %v3084_v46 }
 0x120   :  { %1175 = vrot.lane.b32.xlu0 %v2440_v27, %s4115_s25  ;;  %4279 = vst [vmem:[#allocation116_spill] sm:$0xff] %v3089_v48  ;;  %4280 = sst [smem:[#allocation96_spill]] %s3093_s29  ;;  %s4285_s2 = sld [smem:[#allocation90_spill]] }
 0x121   :  { %1177 = vrot.lane.b32.xlu1 %v2442_v59, %s4115_s25  ;;  %s4286_s19 = sld [smem:[#allocation30_spill]]  ;;  %s4287_s5 = sld [smem:[#allocation31_spill]] }
 0x122   :  { %s4289_s13 = sld [smem:[#allocation32_spill]]  ;;  %s4291_s15 = sld [smem:[#allocation33_spill]] }
 0x123   :  { %4120 = sst [smem:[#allocation36_spill]] %s2587_s21  ;;  %s4307_s29 = sld [smem:[#allocation40_spill]] }
 0x124   :  { %1203 = vrot.lane.b32.xlu0 %v2453_v43, %s4115_s25  ;;  %s2607_s21 = sld [smem:[#allocation2 + $0x63]] }
 0x125   :  { %1205 = vrot.lane.b32.xlu1 %v2455_v57, %s4115_s25  ;;  %4137 = sst [smem:[#allocation53_spill]] %s2633_s20  ;;  %s2650_s20 = sld [smem:[#allocation2 + $0xa3]] }
 0x127   :  { %v4292_v6 = vstv %s4287_s5  ;;  %s4299_s5 = sld [smem:[#allocation36_spill]] }
 0x128   :  { %1231 = vrot.lane.b32.xlu0 %v2461_v26, %s4115_s25  ;;  %v4293_v48 = vmov %v4292_v6  ;;  %v4296_v38 = vstv %s4291_s15  ;;  %s4301_s15 = sld [smem:[#allocation38_spill]] }
 0x129   :  { %1233 = vrot.lane.b32.xlu1 %v2463_v39, %s4115_s25  ;;  %v4297_v46 = vmov %v4296_v38  ;;  %v4316_v23 = vstv %s4307_s29 }
 0x12a   :  { %4128 = sst [smem:[#allocation44_spill]] %s2607_s21  ;;  %s2621_s21 = sld [smem:[#allocation2 + $0x6d]]  ;;  %v4317_v18 = vmov %v4316_v23 }
 0x12b   :  { %4142 = sst [smem:[#allocation58_spill]] %s2650_s20  ;;  %s2667_s20 = sld [smem:[#allocation2 + $0x88]] }
 0x12c   :  { %1259 = vrot.lane.b32.xlu0 %v2469_v44, %s4115_s25  ;;  %s4323_s29 = sld [smem:[#allocation44_spill]] }
 0x12d   :  { %1261 = vrot.lane.b32.xlu1 %v2471_v15, %s4115_s25  ;;  %s2648_s25 = sld [smem:[#allocation2 + $0x7f]]  ;;  %v4304_v35 = vstv %s4299_s5  ;;  %s4324_s5 = sld [smem:[#allocation45_spill]] }
 0x130   :  { %4133 = sst [smem:[#allocation49_spill]] %s2621_s21  ;;  %s2635_s21 = sld [smem:[#allocation2 + $0x9a]]  ;;  %1287 = vrot.lane.b32.xlu0 %v2440_v27, %s4145_s17 }
 0x131   :  { %1289 = vrot.lane.b32.xlu1 %v2442_v59, %s4145_s17  ;;  %4146 = sst [smem:[#allocation61_spill]] %s2667_s20  ;;  %s2687_s20 = sld [smem:[#allocation2 + $0x92]] }
 0x133   :  { %4141 = sst [smem:[#allocation57_spill]] %s2648_s25  ;;  %s2669_s25 = sld [smem:[#allocation2 + $0xac]] }
 0x134   :  { %1315 = vrot.lane.b32.xlu0 %v2453_v43, %s4145_s17 }
 0x135   :  { %1317 = vrot.lane.b32.xlu1 %v2455_v57, %s4145_s17 }
 0x136   :  { %4138 = sst [smem:[#allocation54_spill]] %s2635_s21  ;;  %s2941_s21 = sld [smem:[#allocation2 + $0x32]] }
 0x137   :  { %4152 = sst [smem:[#allocation66_spill]] %s2687_s20  ;;  %s2705_s20 = sld [smem:[#allocation2 + $0x9b]] }
 0x138   :  { %1343 = vrot.lane.b32.xlu0 %v2461_v26, %s4145_s17 }
 0x139   :  { %4147 = sst [smem:[#allocation62_spill]] %s2669_s25  ;;  %s2685_s25 = sld [smem:[#allocation2 + $0x6e]]  ;;  %1345 = vrot.lane.b32.xlu1 %v2463_v39, %s4145_s17 }
 0x13c   :  { %1371 = vrot.lane.b32.xlu0 %v2469_v44, %s4145_s17  ;;  %4225 = sst [smem:[#allocation103_spill]] %s2941_s21  ;;  %s3005_s21 = sld [smem:[#allocation2 + $0x8c]] }
 0x13d   :  { %4158 = sst [smem:[#allocation69_spill]] %s2705_s20  ;;  %s2788_s20 = sld [smem:[#allocation2 + $0x30]]  ;;  %1373 = vrot.lane.b32.xlu1 %v2471_v15, %s4145_s17 }
 0x13e   :  { %s2823_s17 = sld [smem:[#allocation2 + $0x39]] }
 0x13f   :  { %4151 = sst [smem:[#allocation65_spill]] %s2685_s25 }
 0x140   :  { %s2718_s25 = sld [smem:[#allocation2 + $0x38]]  ;;  %1399 = vrot.lane.b32.xlu0 %v2440_v27, %s4200_s0 }
 0x141   :  { %1401 = vrot.lane.b32.xlu1 %v2442_v59, %s4200_s0 }
 0x143   :  { %4185 = sst [smem:[#allocation82_spill]] %s2788_s20 }
 0x144   :  { %4190 = sst [smem:[#allocation86_spill]] %s2823_s17  ;;  %1427 = vrot.lane.b32.xlu0 %v2453_v43, %s4200_s0  ;;  %s2979_s17 = sld [smem:[#allocation2 + $0xa7]] }
 0x145   :  { %1429 = vrot.lane.b32.xlu1 %v2455_v57, %s4200_s0  ;;  %s3095_s20 = sld [smem:[#allocation2 + $0xb1]] }
 0x146   :  { %4162 = sst [smem:[#allocation70_spill]] %s2718_s25  ;;  %s2737_s25 = sld [smem:[#allocation2 + $0xa4]] }
 0x148   :  { %1455 = vrot.lane.b32.xlu0 %v2461_v26, %s4200_s0 }
 0x149   :  { %1457 = vrot.lane.b32.xlu1 %v2463_v39, %s4200_s0 }
 0x14b   :  { %4281 = sst [smem:[#allocation97_spill]] %s3095_s20  ;;  %s4306_s20 = sld [smem:[#allocation39_spill]] }
 0x14c   :  { %4168 = sst [smem:[#allocation73_spill]] %s2737_s25  ;;  %s2961_s25 = sld [smem:[#allocation2 + $0x7a]]  ;;  %1483 = vrot.lane.b32.xlu0 %v2469_v44, %s4200_s0 }
 0x14d   :  { %1485 = vrot.lane.b32.xlu1 %v2471_v15, %s4200_s0  ;;  %s3057_s0 = sld [smem:[#allocation2 + $0x3c]] }
 0x150   :  { %1511 = vrot.lane.b32.xlu0 %v2440_v27, %s4275_s14 }
 0x151   :  { %1513 = vrot.lane.b32.xlu1 %v2442_v59, %s4275_s14 }
 0x152   :  { %4235 = sst [smem:[#allocation107_spill]] %s2961_s25  ;;  %s2977_s25 = sld [smem:[#allocation2 + $0x83]]  ;;  %v648_v42 = vpop.permute.xlu0 %647 }
 0x153   :  { %v650_v50 = vpop.permute.xlu1 %649 }
 0x154   :  { %v651_v59 = vsel %vm267_vm1, %v648_v42, %v650_v50  ;;  %v652_v27 = vsel %vm267_vm1, %v650_v50, %v648_v42  ;;  %1539 = vrot.lane.b32.xlu0 %v2453_v43, %s4275_s14  ;;  %v4314_v50 = vstv %s4306_s20  ;;  %s4322_s20 = sld [smem:[#allocation43_spill]] }
 0x155   :  { %v653_v3 = vmul.f32 %v652_v27, %v2107_v12  ;;  %v654_v61 = vmul.f32 %v651_v59, %v2110_v13  ;;  %1541 = vrot.lane.b32.xlu1 %v2455_v57, %s4275_s14  ;;  %v4288_v59 = vstv %s4286_s19  ;;  %s4298_s19 = sld [smem:[#allocation35_spill]]  ;;  %v4315_v21 = vmov %v4314_v50 }
 0x156   :  { %v4290_v49 = vmov %v4288_v59  ;;  %v676_v43 = vpop.permute.xlu0 %675 }
 0x157   :  { %v656_v33 = vmul.f32 %v4288_v59, %v653_v3  ;;  %v657_v57 = vmul.f32 %v4290_v49, %v654_v61  ;;  %v678_v2 = vpop.permute.xlu1 %677  ;;  %v661_v27 = vmul.f32 %v4292_v6, %v653_v3  ;;  %v662_v31 = vmul.f32 %v4293_v48, %v654_v61 }
 0x158   :  { %v4294_v49 = vstv %s4289_s13  ;;  %v671_v40 = vmul.f32 %v4296_v38, %v653_v3  ;;  %v672_v42 = vmul.f32 %v4297_v46, %v654_v61  ;;  %1567 = vrot.lane.b32.xlu0 %v2461_v26, %s4275_s14  ;;  %s4300_s13 = sld [smem:[#allocation37_spill]] }
 0x159   :  { %1569 = vrot.lane.b32.xlu1 %v2463_v39, %s4275_s14  ;;  %v666_v47 = vmul.f32 %v4294_v49, %v653_v3  ;;  %v4295_v29 = vmov %v4294_v49  ;;  %v658_v6 = vadd.f32 %v656_v33, %v2713_v24  ;;  %v659_v48 = vadd.f32 %v657_v57, %v2715_v56 }
 0x15a   :  { %v667_v60 = vmul.f32 %v4295_v29, %v654_v61  ;;  %v679_v39 = vsel %vm267_vm1, %v676_v43, %v678_v2  ;;  %v680_v29 = vsel %vm267_vm1, %v678_v2, %v676_v43  ;;  %v704_v38 = vpop.permute.xlu0 %703  ;;  %v663_v24 = vadd.f32 %v661_v27, %v2727_v53 }
 0x15b   :  { %v706_v3 = vpop.permute.xlu1 %705  ;;  %v681_v61 = vmul.f32 %v680_v29, %v2107_v12  ;;  %v682_v26 = vmul.f32 %v679_v39, %v2110_v13  ;;  %v664_v56 = vadd.f32 %v662_v31, %v2729_v5  ;;  %v4302_v43 = vstv %s4298_s19  ;;  %s4310_s19 = sld [smem:[#allocation41_spill]] }
 0x15c   :  { %v707_v33 = vsel %vm267_vm1, %v704_v38, %v706_v3  ;;  %v708_v46 = vsel %vm267_vm1, %v706_v3, %v704_v38  ;;  %v4303_v39 = vmov %v4302_v43  ;;  %v4305_v3 = vmov %v4304_v35  ;;  %1595 = vrot.lane.b32.xlu0 %v2469_v44, %s4275_s14 }
 0x15d   :  { %v709_v2 = vmul.f32 %v708_v46, %v2107_v12  ;;  %v710_v57 = vmul.f32 %v707_v33, %v2110_v13  ;;  %1597 = vrot.lane.b32.xlu1 %v2471_v15, %s4275_s14  ;;  %v684_v49 = vmul.f32 %v4302_v43, %v681_v61  ;;  %v685_v29 = vmul.f32 %v4303_v39, %v682_v26  ;;  %s4313_s14 = sld [smem:[#allocation42_spill]] }
 0x15e   :  { %v689_v59 = vmul.f32 %v4304_v35, %v681_v61  ;;  %v690_v38 = vmul.f32 %v4305_v3, %v682_v26  ;;  %v668_v53 = vadd.f32 %v666_v47, %v2731_v52  ;;  %v669_v5 = vadd.f32 %v667_v60, %v2733_v17  ;;  %v732_v35 = vpop.permute.xlu0 %731 }
 0x15f   :  { %v4308_v31 = vstv %s4300_s13  ;;  %v734_v46 = vpop.permute.xlu1 %733  ;;  %v673_v43 = vadd.f32 %v671_v40, %v2751_v11  ;;  %v674_v39 = vadd.f32 %v672_v42, %v2753_v58  ;;  %v4311_v44 = vstv %s4301_s15  ;;  %s4325_s13 = sld [smem:[#allocation46_spill]]  ;;  %s4331_s15 = sld [smem:[#allocation47_spill]] }
 0x160   :  { %v694_v15 = vmul.f32 %v4308_v31, %v681_v61  ;;  %v4309_v27 = vmov %v4308_v31  ;;  %v699_v3 = vmul.f32 %v4311_v44, %v681_v61  ;;  %v4312_v7 = vmov %v4311_v44 }
 0x161   :  { %v695_v33 = vmul.f32 %v4309_v27, %v682_v26  ;;  %v700_v52 = vmul.f32 %v4312_v7, %v682_v26  ;;  %v686_v47 = vadd.f32 %v684_v49, %v658_v6  ;;  %v687_v17 = vadd.f32 %v685_v29, %v659_v48 }
 0x162   :  { %v691_v60 = vadd.f32 %v689_v59, %v663_v24  ;;  %v692_v31 = vadd.f32 %v690_v38, %v664_v56  ;;  %v712_v27 = vmul.f32 %v4314_v50, %v709_v2  ;;  %v713_v28 = vmul.f32 %v4315_v21, %v710_v57  ;;  %v760_v26 = vpop.permute.xlu0 %759 }
 0x163   :  { %v717_v30 = vmul.f32 %v4316_v23, %v709_v2  ;;  %v718_v40 = vmul.f32 %v4317_v18, %v710_v57  ;;  %v696_v11 = vadd.f32 %v694_v15, %v668_v53  ;;  %v697_v58 = vadd.f32 %v695_v33, %v669_v5  ;;  %v762_v6 = vpop.permute.xlu1 %761 }
 0x164   :  { %v4318_v42 = vstv %s4310_s19  ;;  %v701_v48 = vadd.f32 %v699_v3, %v673_v43  ;;  %v702_v49 = vadd.f32 %v700_v52, %v674_v39  ;;  %v4320_v59 = vstv %s4313_s14  ;;  %v4326_v3 = vld [vmem:[#allocation14_spill] sm:$0xff]  ;;  %s4334_s19 = sld [smem:[#allocation48_spill]]  ;;  %s4335_s14 = sld [smem:[#allocation49_spill]] }
 0x165   :  { %v722_v61 = vmul.f32 %v4318_v42, %v709_v2  ;;  %v4319_v44 = vmov %v4318_v42  ;;  %v727_v24 = vmul.f32 %v4320_v59, %v709_v2  ;;  %v4321_v56 = vmov %v4320_v59 }
 0x166   :  { %v723_v7 = vmul.f32 %v4319_v44, %v710_v57  ;;  %v728_v50 = vmul.f32 %v4321_v56, %v710_v57  ;;  %v714_v29 = vadd.f32 %v712_v27, %v686_v47  ;;  %v715_v21 = vadd.f32 %v713_v28, %v687_v17  ;;  %v788_v43 = vpop.permute.xlu0 %787 }
 0x167   :  { %v719_v38 = vadd.f32 %v717_v30, %v691_v60  ;;  %v720_v23 = vadd.f32 %v718_v40, %v692_v31  ;;  %v735_v18 = vsel %vm267_vm1, %v732_v35, %v734_v46  ;;  %v736_v53 = vsel %vm267_vm1, %v734_v46, %v732_v35  ;;  %v790_v33 = vpop.permute.xlu1 %789 }
 0x168   :  { %v763_v5 = vsel %vm307_vm0, %v760_v26, %v762_v6  ;;  %v764_v2 = vsel %vm307_vm0, %v762_v6, %v760_v26  ;;  %v724_v30 = vadd.f32 %v722_v61, %v696_v11  ;;  %v725_v28 = vadd.f32 %v723_v7, %v697_v58 }
 0x169   :  { %v737_v57 = vmul.f32 %v736_v53, %v2107_v12  ;;  %v738_v15 = vmul.f32 %v735_v18, %v2110_v13  ;;  %v729_v46 = vadd.f32 %v727_v24, %v701_v48  ;;  %v730_v35 = vadd.f32 %v728_v50, %v702_v49 }
 0x16a   :  { %v765_v39 = vmul.f32 %v764_v2, %v2100_v10  ;;  %v766_v52 = vmul.f32 %v763_v5, %v4326_v3  ;;  %v4327_v47 = vstv %s4322_s20  ;;  %v4329_v27 = vstv %s4323_s29  ;;  %s4336_s20 = sld [smem:[#allocation50_spill]]  ;;  %v816_v50 = vpop.permute.xlu0 %815  ;;  %s4347_s29 = sld [smem:[#allocation51_spill]] }
 0x16b   :  { %v740_v17 = vmul.f32 %v4327_v47, %v737_v57  ;;  %v4328_v60 = vmov %v4327_v47  ;;  %v745_v40 = vmul.f32 %v4329_v27, %v737_v57  ;;  %v4330_v11 = vmov %v4329_v27  ;;  %v818_v56 = vpop.permute.xlu1 %817 }
 0x16c   :  { %v741_v31 = vmul.f32 %v4328_v60, %v738_v15  ;;  %v746_v12 = vmul.f32 %v4330_v11, %v738_v15  ;;  %v4332_v13 = vstv %s4324_s5  ;;  %v791_v44 = vsel %vm307_vm0, %v788_v43, %v790_v33  ;;  %s4348_s5 = sld [smem:[#allocation52_spill]] }
 0x16d   :  { %v750_v58 = vmul.f32 %v4332_v13, %v737_v57  ;;  %v4333_v42 = vmov %v4332_v13  ;;  %v792_v7 = vsel %vm307_vm0, %v790_v33, %v788_v43  ;;  %v742_v6 = vadd.f32 %v740_v17, %v714_v29 }
 0x16e   :  { %v751_v61 = vmul.f32 %v4333_v42, %v738_v15  ;;  %v743_v26 = vadd.f32 %v741_v31, %v715_v21  ;;  %v4337_v48 = vstv %s4325_s13  ;;  %v747_v18 = vadd.f32 %v745_v40, %v719_v38  ;;  %s4349_s13 = sld [smem:[#allocation53_spill]] }
 0x16f   :  { %v755_v49 = vmul.f32 %v4337_v48, %v737_v57  ;;  %v4338_v59 = vmov %v4337_v48  ;;  %v748_v53 = vadd.f32 %v746_v12, %v720_v23  ;;  %v752_v5 = vadd.f32 %v750_v58, %v724_v30  ;;  %v846_v40 = vpop.permute.xlu1 %845  ;;  %v844_v12 = vpop.permute.xlu0 %843 }
 0x170   :  { %v756_v24 = vmul.f32 %v4338_v59, %v738_v15  ;;  %v753_v2 = vadd.f32 %v751_v61, %v725_v28  ;;  %v4339_v47 = vstv %s4331_s15  ;;  %v4341_v33 = vstv %s4334_s19  ;;  %s4350_s15 = sld [smem:[#allocation54_spill]]  ;;  %s4355_s19 = sld [smem:[#allocation55_spill]] }
 0x171   :  { %v768_v60 = vmul.f32 %v4339_v47, %v765_v39  ;;  %v4340_v27 = vmov %v4339_v47  ;;  %v773_v43 = vmul.f32 %v4341_v33, %v765_v39  ;;  %v4342_v29 = vmov %v4341_v33 }
 0x172   :  { %v769_v11 = vmul.f32 %v4340_v27, %v766_v52  ;;  %v774_v17 = vmul.f32 %v4342_v29, %v766_v52  ;;  %v4343_v21 = vstv %s4335_s14  ;;  %v4345_v42 = vstv %s4336_s20  ;;  %s4356_s14 = sld [smem:[#allocation56_spill]]  ;;  %s4359_s20 = sld [smem:[#allocation57_spill]] }
 0x173   :  { %v778_v31 = vmul.f32 %v4343_v21, %v765_v39  ;;  %v4344_v13 = vmov %v4343_v21  ;;  %v783_v15 = vmul.f32 %v4345_v42, %v765_v39  ;;  %v4346_v48 = vmov %v4345_v42  ;;  %v874_v33 = vpop.permute.xlu1 %873 }
 0x174   :  { %v779_v57 = vmul.f32 %v4344_v13, %v766_v52  ;;  %v784_v59 = vmul.f32 %v4346_v48, %v766_v52  ;;  %v757_v38 = vadd.f32 %v755_v49, %v729_v46  ;;  %v758_v23 = vadd.f32 %v756_v24, %v730_v35 }
 0x175   :  { %v770_v30 = vadd.f32 %v768_v60, %v742_v6  ;;  %v771_v28 = vadd.f32 %v769_v11, %v743_v26  ;;  %v775_v58 = vadd.f32 %v773_v43, %v747_v18  ;;  %v776_v61 = vadd.f32 %v774_v17, %v748_v53 }
 0x176   :  { %v780_v47 = vadd.f32 %v778_v31, %v752_v5  ;;  %v781_v27 = vadd.f32 %v779_v57, %v753_v2  ;;  %v793_v39 = vmul.f32 %v792_v7, %v2100_v10  ;;  %v794_v52 = vmul.f32 %v791_v44, %v4326_v3 }
 0x177   :  { %v819_v46 = vsel %vm307_vm0, %v816_v50, %v818_v56  ;;  %v820_v35 = vsel %vm307_vm0, %v818_v56, %v816_v50  ;;  %v785_v6 = vadd.f32 %v783_v15, %v757_v38  ;;  %v786_v26 = vadd.f32 %v784_v59, %v758_v23  ;;  %v872_v56 = vpop.permute.xlu0 %871 }
 0x178   :  { %v821_v49 = vmul.f32 %v820_v35, %v2100_v10  ;;  %v822_v24 = vmul.f32 %v819_v46, %v4326_v3  ;;  %v4351_v18 = vstv %s4347_s29  ;;  %v4353_v2 = vstv %s4348_s5  ;;  %s4360_s29 = sld [smem:[#allocation58_spill]]  ;;  %s4371_s5 = sld [smem:[#allocation59_spill]] }
 0x179   :  { %v796_v53 = vmul.f32 %v4351_v18, %v793_v39  ;;  %v4352_v5 = vmov %v4351_v18  ;;  %v801_v44 = vmul.f32 %v4353_v2, %v793_v39  ;;  %v4354_v60 = vmov %v4353_v2 }
 0x17a   :  { %v797_v7 = vmul.f32 %v4352_v5, %v794_v52  ;;  %v802_v11 = vmul.f32 %v4354_v60, %v794_v52  ;;  %v4357_v50 = vstv %s4349_s13  ;;  %v847_v21 = vsel %vm307_vm0, %v844_v12, %v846_v40  ;;  %s4372_s13 = sld [smem:[#allocation60_spill]] }
 0x17b   :  { %v806_v43 = vmul.f32 %v4357_v50, %v793_v39  ;;  %v4358_v29 = vmov %v4357_v50  ;;  %v848_v31 = vsel %vm307_vm0, %v846_v40, %v844_v12  ;;  %v798_v13 = vadd.f32 %v796_v53, %v770_v30  ;;  %v902_v30 = vpop.permute.xlu1 %901  ;;  %v900_v53 = vpop.permute.xlu0 %899 }
 0x17c   :  { %v807_v17 = vmul.f32 %v4358_v29, %v794_v52  ;;  %v799_v57 = vadd.f32 %v797_v7, %v771_v28  ;;  %v4361_v42 = vstv %s4350_s15  ;;  %v803_v38 = vadd.f32 %v801_v44, %v775_v58  ;;  %s4373_s15 = sld [smem:[#allocation61_spill]] }
 0x17d   :  { %v811_v15 = vmul.f32 %v4361_v42, %v793_v39  ;;  %v4362_v48 = vmov %v4361_v42  ;;  %v804_v23 = vadd.f32 %v802_v11, %v776_v61  ;;  %v808_v46 = vadd.f32 %v806_v43, %v780_v47 }
 0x17e   :  { %v812_v59 = vmul.f32 %v4362_v48, %v794_v52  ;;  %v809_v35 = vadd.f32 %v807_v17, %v781_v27  ;;  %v4363_v18 = vstv %s4355_s19  ;;  %v4365_v50 = vstv %s4356_s14  ;;  %s4374_s19 = sld [smem:[#allocation62_spill]]  ;;  %s4379_s14 = sld [smem:[#allocation63_spill]] }
 0x17f   :  { %v824_v5 = vmul.f32 %v4363_v18, %v821_v49  ;;  %v4364_v2 = vmov %v4363_v18  ;;  %v829_v29 = vmul.f32 %v4365_v50, %v821_v49  ;;  %v4366_v40 = vmov %v4365_v50 }
 0x180   :  { %v825_v60 = vmul.f32 %v4364_v2, %v822_v24  ;;  %v830_v12 = vmul.f32 %v4366_v40, %v822_v24  ;;  %v4367_v28 = vstv %s4359_s20  ;;  %v4369_v42 = vstv %s4360_s29  ;;  %s4382_s20 = sld [smem:[#allocation64_spill]]  ;;  %s4385_s29 = sld [smem:[#allocation65_spill]] }
 0x181   :  { %v834_v7 = vmul.f32 %v4367_v28, %v821_v49  ;;  %v4368_v54 = vmov %v4367_v28  ;;  %v839_v52 = vmul.f32 %v4369_v42, %v821_v49  ;;  %v4370_v58 = vmov %v4369_v42 }
 0x182   :  { %v835_v39 = vmul.f32 %v4368_v54, %v822_v24  ;;  %v840_v61 = vmul.f32 %v4370_v58, %v822_v24  ;;  %v813_v47 = vadd.f32 %v811_v15, %v785_v6  ;;  %v814_v27 = vadd.f32 %v812_v59, %v786_v26  ;;  %v930_v24 = vpop.permute.xlu1 %929  ;;  %v4375_v59 = vld [vmem:[#allocation15_spill] sm:$0xff] }
 0x183   :  { %v826_v44 = vadd.f32 %v824_v5, %v798_v13  ;;  %v827_v11 = vadd.f32 %v825_v60, %v799_v57  ;;  %v831_v43 = vadd.f32 %v829_v29, %v803_v38  ;;  %v832_v17 = vadd.f32 %v830_v12, %v804_v23  ;;  %v928_v13 = vpop.permute.xlu0 %927  ;;  %v4376_v23 = vld [vmem:[#allocation16_spill] sm:$0xff] }
 0x184   :  { %v836_v48 = vadd.f32 %v834_v7, %v808_v46  ;;  %v837_v18 = vadd.f32 %v835_v39, %v809_v35  ;;  %v849_v54 = vmul.f32 %v848_v31, %v2100_v10  ;;  %v850_v49 = vmul.f32 %v847_v21, %v4326_v3 }
 0x185   :  { %v875_v6 = vsel %vm347_vm2, %v872_v56, %v874_v33  ;;  %v876_v26 = vsel %vm347_vm2, %v874_v33, %v872_v56  ;;  %v841_v57 = vadd.f32 %v839_v52, %v813_v47  ;;  %v842_v15 = vadd.f32 %v840_v61, %v814_v27 }
 0x186   :  { %v877_v38 = vmul.f32 %v876_v26, %v4375_v59  ;;  %v878_v46 = vmul.f32 %v875_v6, %v4376_v23  ;;  %v4377_v35 = vstv %s4371_s5  ;;  %v4380_v21 = vstv %s4372_s13  ;;  %s4386_s5 = sld [smem:[#allocation66_spill]] }
 0x187   :  { %v852_v10 = vmul.f32 %v4377_v35, %v849_v54  ;;  %v4378_v31 = vmov %v4377_v35  ;;  %v857_v5 = vmul.f32 %v4380_v21, %v849_v54  ;;  %v4381_v2 = vmov %v4380_v21  ;;  %s4397_s13 = sld [smem:[#allocation34_spill]] }
 0x188   :  { %v853_v3 = vmul.f32 %v4378_v31, %v850_v49  ;;  %v858_v33 = vmul.f32 %v4381_v2, %v850_v49  ;;  %v4383_v56 = vstv %s4373_s15  ;;  %v903_v40 = vsel %vm347_vm2, %v900_v53, %v902_v30  ;;  %s4398_s15 = sld [smem:[#allocation67_spill]] }
 0x189   :  { %v862_v60 = vmul.f32 %v4383_v56, %v849_v54  ;;  %v4384_v50 = vmov %v4383_v56  ;;  %v904_v12 = vsel %vm347_vm2, %v902_v30, %v900_v53  ;;  %v854_v28 = vadd.f32 %v852_v10, %v826_v44  ;;  %v958_v44 = vpop.permute.xlu1 %957  ;;  %v956_v10 = vpop.permute.xlu0 %955 }
 0x18a   :  { %v863_v29 = vmul.f32 %v4384_v50, %v850_v49  ;;  %v855_v7 = vadd.f32 %v853_v3, %v827_v11  ;;  %v4387_v39 = vstv %s4374_s19  ;;  %v859_v61 = vadd.f32 %v857_v5, %v831_v43  ;;  %s4399_s19 = sld [smem:[#allocation68_spill]] }
 0x18b   :  { %v867_v42 = vmul.f32 %v4387_v39, %v849_v54  ;;  %v4388_v52 = vmov %v4387_v39  ;;  %v860_v47 = vadd.f32 %v858_v33, %v832_v17  ;;  %v864_v27 = vadd.f32 %v862_v60, %v836_v48 }
 0x18c   :  { %v868_v58 = vmul.f32 %v4388_v52, %v850_v49  ;;  %v865_v6 = vadd.f32 %v863_v29, %v837_v18  ;;  %v4389_v26 = vstv %s4379_s14  ;;  %v4391_v2 = vstv %s4382_s20  ;;  %s4400_s14 = sld [smem:[#allocation69_spill]]  ;;  %s4405_s20 = sld [smem:[#allocation70_spill]] }
 0x18d   :  { %v880_v35 = vmul.f32 %v4389_v26, %v877_v38  ;;  %v4390_v31 = vmov %v4389_v26  ;;  %v885_v56 = vmul.f32 %v4391_v2, %v877_v38  ;;  %v4392_v30 = vmov %v4391_v2 }
 0x18e   :  { %v881_v21 = vmul.f32 %v4390_v31, %v878_v46  ;;  %v886_v53 = vmul.f32 %v4392_v30, %v878_v46  ;;  %v4393_v11 = vstv %s4385_s29  ;;  %v4395_v39 = vstv %s4386_s5  ;;  %s4406_s29 = sld [smem:[#allocation71_spill]]  ;;  %s4409_s5 = sld [smem:[#allocation72_spill]] }
 0x18f   :  { %v890_v3 = vmul.f32 %v4393_v11, %v877_v38  ;;  %v4394_v50 = vmov %v4393_v11  ;;  %v895_v49 = vmul.f32 %v4395_v39, %v877_v38  ;;  %v4396_v43 = vmov %v4395_v39 }
 0x190   :  { %v891_v54 = vmul.f32 %v4394_v50, %v878_v46  ;;  %v896_v17 = vmul.f32 %v4396_v43, %v878_v46  ;;  %v869_v48 = vadd.f32 %v867_v42, %v841_v57  ;;  %v870_v18 = vadd.f32 %v868_v58, %v842_v15 }
 0x191   :  { %v882_v5 = vadd.f32 %v880_v35, %v854_v28  ;;  %v883_v33 = vadd.f32 %v881_v21, %v855_v7  ;;  %v887_v60 = vadd.f32 %v885_v56, %v859_v61  ;;  %v888_v29 = vadd.f32 %v886_v53, %v860_v47  ;;  %v986_v21 = vpop.permute.xlu1 %985 }
 0x192   :  { %v892_v52 = vadd.f32 %v890_v3, %v864_v27  ;;  %v893_v26 = vadd.f32 %v891_v54, %v865_v6  ;;  %v905_v31 = vmul.f32 %v904_v12, %v4375_v59  ;;  %v906_v38 = vmul.f32 %v903_v40, %v4376_v23 }
 0x193   :  { %v931_v57 = vsel %vm347_vm2, %v928_v13, %v930_v24  ;;  %v932_v15 = vsel %vm347_vm2, %v930_v24, %v928_v13  ;;  %v897_v46 = vadd.f32 %v895_v49, %v869_v48  ;;  %v898_v28 = vadd.f32 %v896_v17, %v870_v18  ;;  %v984_v24 = vpop.permute.xlu0 %983 }
 0x194   :  { %v933_v7 = vmul.f32 %v932_v15, %v4375_v59  ;;  %v934_v42 = vmul.f32 %v931_v57, %v4376_v23  ;;  %v4401_v58 = vstv %s4397_s13  ;;  %v4403_v27 = vstv %s4398_s15  ;;  %s4410_s13 = sld [smem:[#allocation73_spill]]  ;;  %s4421_s15 = sld [smem:[#allocation74_spill]] }
 0x195   :  { %v908_v61 = vmul.f32 %v4401_v58, %v905_v31  ;;  %v4402_v47 = vmov %v4401_v58  ;;  %v913_v40 = vmul.f32 %v4403_v27, %v905_v31  ;;  %v4404_v6 = vmov %v4403_v27 }
 0x196   :  { %v909_v12 = vmul.f32 %v4402_v47, %v906_v38  ;;  %v914_v35 = vmul.f32 %v4404_v6, %v906_v38  ;;  %v4407_v13 = vstv %s4399_s19  ;;  %v959_v53 = vsel %vm347_vm2, %v956_v10, %v958_v44  ;;  %s4422_s19 = sld [smem:[#allocation75_spill]] }
 0x197   :  { %v918_v2 = vmul.f32 %v4407_v13, %v905_v31  ;;  %v4408_v56 = vmov %v4407_v13  ;;  %v960_v11 = vsel %vm347_vm2, %v958_v44, %v956_v10  ;;  %v910_v3 = vadd.f32 %v908_v61, %v882_v5 }
 0x198   :  { %v919_v30 = vmul.f32 %v4408_v56, %v906_v38  ;;  %v911_v50 = vadd.f32 %v909_v12, %v883_v33  ;;  %v4411_v54 = vstv %s4400_s14  ;;  %v915_v17 = vadd.f32 %v913_v40, %v887_v60  ;;  %v1014_v40 = vpop.permute.xlu1 %1013  ;;  %s4423_s14 = sld [smem:[#allocation76_spill]] }
 0x199   :  { %v923_v39 = vmul.f32 %v4411_v54, %v905_v31  ;;  %v4412_v49 = vmov %v4411_v54  ;;  %v916_v48 = vadd.f32 %v914_v35, %v888_v29  ;;  %v920_v18 = vadd.f32 %v918_v2, %v892_v52  ;;  %v1012_v35 = vpop.permute.xlu0 %1011 }
 0x19a   :  { %v924_v43 = vmul.f32 %v4412_v49, %v906_v38  ;;  %v921_v57 = vadd.f32 %v919_v30, %v893_v26  ;;  %v4413_v15 = vstv %s4405_s20  ;;  %v4415_v6 = vstv %s4406_s29  ;;  %s4424_s20 = sld [smem:[#allocation77_spill]]  ;;  %s4431_s29 = sld [smem:[#allocation78_spill]] }
 0x19b   :  { %v936_v58 = vmul.f32 %v4413_v15, %v933_v7  ;;  %v4414_v47 = vmov %v4413_v15  ;;  %v941_v13 = vmul.f32 %v4415_v6, %v933_v7  ;;  %v4416_v56 = vmov %v4415_v6 }
 0x19c   :  { %v937_v27 = vmul.f32 %v4414_v47, %v934_v42  ;;  %v942_v22 = vmul.f32 %v4416_v56, %v934_v42  ;;  %v4417_v44 = vstv %s4409_s5  ;;  %v4419_v61 = vstv %s4410_s13  ;;  %s4434_s5 = sld [smem:[#allocation79_spill]]  ;;  %s4435_s13 = sld [smem:[#allocation80_spill]] }
 0x19d   :  { %v946_v10 = vmul.f32 %v4417_v44, %v933_v7  ;;  %v4418_v5 = vmov %v4417_v44  ;;  %v951_v31 = vmul.f32 %v4419_v61, %v933_v7  ;;  %v4420_v12 = vmov %v4419_v61  ;;  %v1042_v61 = vpop.permute.xlu1 %1041 }
 0x19e   :  { %v947_v33 = vmul.f32 %v4418_v5, %v934_v42  ;;  %v952_v38 = vmul.f32 %v4420_v12, %v934_v42  ;;  %v925_v60 = vadd.f32 %v923_v39, %v897_v46  ;;  %v926_v29 = vadd.f32 %v924_v43, %v898_v28  ;;  %v4425_v39 = vld [vmem:[#allocation17_spill] sm:$0xff] }
 0x19f   :  { %v938_v52 = vadd.f32 %v936_v58, %v910_v3  ;;  %v939_v26 = vadd.f32 %v937_v27, %v911_v50  ;;  %v943_v2 = vadd.f32 %v941_v13, %v915_v17  ;;  %v944_v30 = vadd.f32 %v942_v22, %v916_v48  ;;  %v4426_v22 = vld [vmem:[#allocation18_spill] sm:$0xff] }
 0x1a0   :  { %v948_v54 = vadd.f32 %v946_v10, %v920_v18  ;;  %v949_v49 = vadd.f32 %v947_v33, %v921_v57  ;;  %v961_v7 = vmul.f32 %v960_v11, %v4375_v59  ;;  %v962_v42 = vmul.f32 %v959_v53, %v4376_v23 }
 0x1a1   :  { %v987_v46 = vsel %vm387_vm3, %v984_v24, %v986_v21  ;;  %v988_v28 = vsel %vm387_vm3, %v986_v21, %v984_v24  ;;  %v953_v3 = vadd.f32 %v951_v31, %v925_v60  ;;  %v954_v50 = vadd.f32 %v952_v38, %v926_v29  ;;  %v1040_v31 = vpop.permute.xlu0 %1039 }
 0x1a2   :  { %v989_v43 = vmul.f32 %v988_v28, %v4425_v39  ;;  %v990_v17 = vmul.f32 %v987_v46, %v4426_v22  ;;  %v4427_v48 = vstv %s4421_s15  ;;  %v4429_v11 = vstv %s4422_s19  ;;  %s4436_s15 = sld [smem:[#allocation81_spill]]  ;;  %s4447_s19 = sld [smem:[#allocation82_spill]] }
 0x1a3   :  { %v964_v18 = vmul.f32 %v4427_v48, %v961_v7  ;;  %v4428_v57 = vmov %v4427_v48  ;;  %v969_v23 = vmul.f32 %v4429_v11, %v961_v7  ;;  %v4430_v53 = vmov %v4429_v11 }
 0x1a4   :  { %v965_v59 = vmul.f32 %v4428_v57, %v962_v42  ;;  %v970_v15 = vmul.f32 %v4430_v53, %v962_v42  ;;  %v4432_v58 = vstv %s4423_s14  ;;  %v1015_v27 = vsel %vm387_vm3, %v1012_v35, %v1014_v40  ;;  %s4448_s14 = sld [smem:[#allocation83_spill]] }
 0x1a5   :  { %v974_v47 = vmul.f32 %v4432_v58, %v961_v7  ;;  %v4433_v21 = vmov %v4432_v58  ;;  %v1016_v6 = vsel %vm387_vm3, %v1014_v40, %v1012_v35  ;;  %v966_v13 = vadd.f32 %v964_v18, %v938_v52 }
 0x1a6   :  { %v975_v24 = vmul.f32 %v4433_v21, %v962_v42  ;;  %v967_v56 = vadd.f32 %v965_v59, %v939_v26  ;;  %v4437_v44 = vstv %s4424_s20  ;;  %v971_v12 = vadd.f32 %v969_v23, %v943_v2  ;;  %s4449_s20 = sld [smem:[#allocation84_spill]] }
 0x1a7   :  { %v979_v10 = vmul.f32 %v4437_v44, %v961_v7  ;;  %v4438_v5 = vmov %v4437_v44  ;;  %v972_v38 = vadd.f32 %v970_v15, %v944_v30  ;;  %v976_v60 = vadd.f32 %v974_v47, %v948_v54 }
 0x1a8   :  { %v980_v33 = vmul.f32 %v4438_v5, %v962_v42  ;;  %v977_v29 = vadd.f32 %v975_v24, %v949_v49  ;;  %v4439_v46 = vstv %s4431_s29  ;;  %v4441_v40 = vstv %s4434_s5  ;;  %s4450_s29 = sld [smem:[#allocation85_spill]]  ;;  %s4453_s5 = sld [smem:[#allocation86_spill]] }
 0x1a9   :  { %v992_v28 = vmul.f32 %v4439_v46, %v989_v43  ;;  %v4440_v48 = vmov %v4439_v46  ;;  %v997_v35 = vmul.f32 %v4441_v40, %v989_v43  ;;  %v4442_v52 = vmov %v4441_v40 }
 0x1aa   :  { %v993_v57 = vmul.f32 %v4440_v48, %v990_v17  ;;  %v998_v18 = vmul.f32 %v4442_v52, %v990_v17  ;;  %v4443_v26 = vstv %s4435_s13  ;;  %v4445_v53 = vstv %s4436_s15  ;;  %s4456_s13 = sld [smem:[#allocation87_spill]]  ;;  %s4469_s15 = sld [smem:[#allocation91_spill]] }
 0x1ab   :  { %v1002_v59 = vmul.f32 %v4443_v26, %v989_v43  ;;  %v4444_v11 = vmov %v4443_v26  ;;  %v1007_v42 = vmul.f32 %v4445_v53, %v989_v43  ;;  %v4446_v58 = vmov %v4445_v53 }
 0x1ac   :  { %v1003_v7 = vmul.f32 %v4444_v11, %v990_v17  ;;  %v1008_v21 = vmul.f32 %v4446_v58, %v990_v17  ;;  %v981_v2 = vadd.f32 %v979_v10, %v953_v3  ;;  %v982_v30 = vadd.f32 %v980_v33, %v954_v50  ;;  %v1070_v17 = vpop.permute.xlu1 %1069 }
 0x1ad   :  { %v994_v54 = vadd.f32 %v992_v28, %v966_v13  ;;  %v995_v49 = vadd.f32 %v993_v57, %v967_v56  ;;  %v999_v23 = vadd.f32 %v997_v35, %v971_v12  ;;  %v1000_v15 = vadd.f32 %v998_v18, %v972_v38  ;;  %v1068_v13 = vpop.permute.xlu0 %1067 }
 0x1ae   :  { %v1004_v47 = vadd.f32 %v1002_v59, %v976_v60  ;;  %v1005_v24 = vadd.f32 %v1003_v7, %v977_v29  ;;  %v1017_v44 = vmul.f32 %v1016_v6, %v4425_v39  ;;  %v1018_v43 = vmul.f32 %v1015_v27, %v4426_v22 }
 0x1af   :  { %v1043_v3 = vsel %vm387_vm3, %v1040_v31, %v1042_v61  ;;  %v1044_v50 = vsel %vm387_vm3, %v1042_v61, %v1040_v31  ;;  %v1009_v56 = vadd.f32 %v1007_v42, %v981_v2  ;;  %v1010_v10 = vadd.f32 %v1008_v21, %v982_v30 }
 0x1b0   :  { %v1045_v5 = vmul.f32 %v1044_v50, %v4425_v39  ;;  %v1046_v33 = vmul.f32 %v1043_v3, %v4426_v22  ;;  %v4451_v12 = vstv %s4447_s19  ;;  %v4454_v60 = vstv %s4448_s14  ;;  %s4470_s19 = sld [smem:[#allocation28_spill]]  ;;  %s3505_s14 = sld [smem:[#allocation2 + $0x4f]] }
 0x1b1   :  { %v1020_v6 = vmul.f32 %v4451_v12, %v1017_v44  ;;  %v4452_v38 = vmov %v4451_v12  ;;  %v1025_v29 = vmul.f32 %v4454_v60, %v1017_v44  ;;  %v4455_v46 = vmov %v4454_v60 }
 0x1b2   :  { %v1021_v27 = vmul.f32 %v4452_v38, %v1018_v43  ;;  %v1026_v61 = vmul.f32 %v4455_v46, %v1018_v43  ;;  %v4457_v31 = vstv %s4449_s20  ;;  %v1071_v40 = vsel %vm387_vm3, %v1068_v13, %v1070_v17  ;;  %s3509_s20 = sld [smem:[#allocation2 + $0x97]] }
 0x1b3   :  { %v1030_v28 = vmul.f32 %v4457_v31, %v1017_v44  ;;  %v4458_v48 = vmov %v4457_v31  ;;  %v1072_v35 = vsel %vm387_vm3, %v1070_v17, %v1068_v13  ;;  %v1022_v52 = vadd.f32 %v1020_v6, %v994_v54 }
 0x1b4   :  { %v1031_v57 = vmul.f32 %v4458_v48, %v1018_v43  ;;  %v1023_v18 = vadd.f32 %v1021_v27, %v995_v49  ;;  %v4459_v26 = vstv %s4450_s29  ;;  %v1027_v53 = vadd.f32 %v1025_v29, %v999_v23  ;;  %v1178_v23 = vpop.permute.xlu1 %1177  ;;  %s4489_s29 = sld [smem:[#allocation19_spill]] }
 0x1b5   :  { %v1035_v59 = vmul.f32 %v4459_v26, %v1017_v44  ;;  %v4460_v11 = vmov %v4459_v26  ;;  %v1028_v42 = vadd.f32 %v1026_v61, %v1000_v15  ;;  %v1032_v58 = vadd.f32 %v1030_v28, %v1004_v47  ;;  %v1176_v15 = vpop.permute.xlu0 %1175 }
 0x1b6   :  { %v1036_v7 = vmul.f32 %v4460_v11, %v1018_v43  ;;  %v1033_v21 = vadd.f32 %v1031_v57, %v1005_v24  ;;  %v4461_v2 = vstv %s4453_s5  ;;  %v4463_v12 = vstv %s4456_s13  ;;  %s4492_s5 = sld [smem:[#allocation100_spill]]  ;;  %s4503_s13 = sld [smem:[#allocation103_spill]] }
 0x1b7   :  { %v1048_v30 = vmul.f32 %v4461_v2, %v1045_v5  ;;  %v4462_v3 = vmov %v4461_v2  ;;  %v1053_v38 = vmul.f32 %v4463_v12, %v1045_v5  ;;  %v4464_v60 = vmov %v4463_v12 }
 0x1b8   :  { %v1049_v50 = vmul.f32 %v4462_v3, %v1046_v33  ;;  %v1054_v46 = vmul.f32 %v4464_v60, %v1046_v33  ;;  %v4465_v17 = vstv %s4252_s24  ;;  %v4467_v6 = vstv %s4253_s10  ;;  %s4471_s24 = sld [smem:[#allocation93_spill]]  ;;  %v1206_v60 = vpop.permute.xlu1 %1205 }
 0x1b9   :  { %v1058_v13 = vmul.f32 %v4465_v17, %v1045_v5  ;;  %v4466_v54 = vmov %v4465_v17  ;;  %v1063_v44 = vmul.f32 %v4467_v6, %v1045_v5  ;;  %v4468_v27 = vmov %v4467_v6  ;;  %s3503_s10 = sld [smem:[#allocation2 + $0x2b]] }
 0x1ba   :  { %v1059_v49 = vmul.f32 %v4466_v54, %v1046_v33  ;;  %v1064_v43 = vmul.f32 %v4468_v27, %v1046_v33  ;;  %v1037_v47 = vadd.f32 %v1035_v59, %v1009_v56  ;;  %v1038_v24 = vadd.f32 %v1036_v7, %v1010_v10 }
 0x1bb   :  { %v1050_v29 = vadd.f32 %v1048_v30, %v1022_v52  ;;  %v1051_v61 = vadd.f32 %v1049_v50, %v1023_v18  ;;  %v1055_v31 = vadd.f32 %v1053_v38, %v1027_v53  ;;  %v1056_v28 = vadd.f32 %v1054_v46, %v1028_v42  ;;  %v1204_v46 = vpop.permute.xlu0 %1203 }
 0x1bc   :  { %v1060_v48 = vadd.f32 %v1058_v13, %v1032_v58  ;;  %v1061_v57 = vadd.f32 %v1059_v49, %v1033_v21  ;;  %v1073_v5 = vmul.f32 %v1072_v35, %v4425_v39  ;;  %v1074_v33 = vmul.f32 %v1071_v40, %v4426_v22 }
 0x1bd   :  { %v1179_v56 = vsel %vm447_vm4, %v1176_v15, %v1178_v23  ;;  %v1180_v10 = vsel %vm447_vm4, %v1178_v23, %v1176_v15  ;;  %v1065_v52 = vadd.f32 %v1063_v44, %v1037_v47  ;;  %v1066_v18 = vadd.f32 %v1064_v43, %v1038_v24 }
 0x1be   :  { %v3482_v26 = vmul.f32 %v1179_v56, %v2158_v41  ;;  %v3485_v59 = vmul.f32 %v1180_v10, %v2169_v45  ;;  %v4472_v11 = vstv %s4254_s3  ;;  %v4474_v35 = vstv %s4469_s15  ;;  %s3507_s3 = sld [smem:[#allocation2 + $0x73]]  ;;  %v4483_v10 = vld [vmem:[#allocation99_spill] sm:$0xff]  ;;  %s4508_s15 = sld [smem:[#allocation108_spill]] }
 0x1bf   :  { %v1076_v7 = vmul.f32 %v4472_v11, %v1073_v5  ;;  %v4473_v53 = vmov %v4472_v11  ;;  %v1081_v22 = vmul.f32 %v4474_v35, %v1073_v5  ;;  %v4475_v40 = vmov %v4474_v35  ;;  %v4487_v35 = vld [vmem:[#allocation106_spill] sm:$0xff] }
 0x1c0   :  { %v1077_v39 = vmul.f32 %v4473_v53, %v1074_v33  ;;  %v1082_v42 = vmul.f32 %v4475_v40, %v1074_v33  ;;  %v4476_v58 = vstv %s4470_s19  ;;  %v4478_v3 = vstv %s4471_s24  ;;  %v4488_v40 = vld [vmem:[#allocation105_spill] sm:$0xff]  ;;  %s3607_s19 = sld [smem:[#allocation2 + $0x34]]  ;;  %s3609_s24 = sld [smem:[#allocation2 + $0x58]] }
 0x1c1   :  { %v1086_v21 = vmul.f32 %v4476_v58, %v1073_v5  ;;  %v4477_v2 = vmov %v4476_v58  ;;  %v1091_v50 = vmul.f32 %v4478_v3, %v1073_v5  ;;  %v4479_v12 = vmov %v4478_v3  ;;  %v4481_v5 = vld [vmem:[#allocation92_spill] sm:$0xff] }
 0x1c2   :  { %v1087_v30 = vmul.f32 %v4477_v2, %v1074_v33  ;;  %v1092_v38 = vmul.f32 %v4479_v12, %v1074_v33  ;;  %v1078_v17 = vadd.f32 %v1076_v7, %v1050_v29  ;;  %v1079_v13 = vadd.f32 %v1077_v39, %v1051_v61  ;;  %v4486_v7 = vld [vmem:[#allocation101_spill] sm:$0xff]  ;;  %v4490_v2 = vld [vmem:[#allocation110_spill] sm:$0xff]  ;;  %v4491_v3 = vld [vmem:[#allocation114_spill] sm:$0xff] }
 0x1c3   :  { %v1083_v54 = vadd.f32 %v1081_v22, %v1055_v31  ;;  %v1084_v49 = vadd.f32 %v1082_v42, %v1056_v28  ;;  %v1088_v6 = vadd.f32 %v1086_v21, %v1060_v48  ;;  %v1093_v27 = vadd.f32 %v1091_v50, %v1065_v52  ;;  %v4484_v52 = vld [vmem:[#allocation102_spill] sm:$0xff] }
 0x1c4   :  { %v1089_v44 = vadd.f32 %v1087_v30, %v1061_v57  ;;  %v1094_v43 = vadd.f32 %v1092_v38, %v1066_v18  ;;  %v1098_v23 = vadd.f32 %v2855_v8, %v1078_v17  ;;  %v1099_v15 = vadd.f32 %v2710_v9, %v1079_v13  ;;  %v4493_v12 = vld [vmem:[#allocation116_spill] sm:$0xff]  ;;  %v4494_v17 = vld [vmem:[#allocation109_spill] sm:$0xff] }
 0x1c5   :  { %v1103_v47 = vadd.f32 %v2864_v25, %v1083_v54  ;;  %v1104_v24 = vadd.f32 %v2725_v1, %v1084_v49  ;;  %v1108_v29 = vadd.f32 %v2869_v55, %v1088_v6  ;;  %v1113_v31 = vadd.f32 %v2874_v32, %v1093_v27  ;;  %v1234_v25 = vpop.permute.xlu1 %1233  ;;  %v4480_v32 = vld [vmem:[#allocation95_spill] sm:$0xff]  ;;  %v4495_v54 = vld [vmem:[#allocation113_spill] sm:$0xff]  ;;  %v4496_v6 = vld [vmem:[#allocation115_spill] sm:$0xff] }
 0x1c6   :  { %v1109_v61 = vadd.f32 %v2770_v36, %v1089_v44  ;;  %v1114_v28 = vadd.f32 %v2775_v34, %v1094_v43  ;;  %v1118_v48 = vadd.f32 %v2795_v0, %v1098_v23  ;;  %v1119_v57 = vadd.f32 %v2809_v62, %v1099_v15  ;;  %v1232_v0 = vpop.permute.xlu0 %1231 }
 0x1c7   :  { %v1123_v8 = vadd.f32 %v2814_v20, %v1103_v47  ;;  %v1124_v9 = vadd.f32 %v2819_v51, %v1104_v24  ;;  %v1128_v1 = vadd.f32 %v2830_v19, %v1108_v29  ;;  %v1133_v36 = vadd.f32 %v2845_v16, %v1113_v31  ;;  %v4482_v51 = vld [vmem:[#allocation94_spill] sm:$0xff] }
 0x1c8   :  { %v1129_v55 = vadd.f32 %v2835_v37, %v1109_v61  ;;  %v1134_v34 = vadd.f32 %v2850_v63, %v1114_v28  ;;  %v1139_v62 = vadd.f32 %v2893_v14, %v1119_v57  ;;  %v1138_v33 = vadd.f32 %v4481_v5, %v1118_v48  ;;  %v4485_v37 = vld [vmem:[#allocation98_spill] sm:$0xff] }
 0x1c9   :  { %v1144_v20 = vadd.f32 %v4480_v32, %v1124_v9  ;;  %v1143_v56 = vadd.f32 %v4482_v51, %v1123_v8  ;;  %v1148_v11 = vadd.f32 %v4485_v37, %v1128_v1  ;;  %v1153_v16 = vadd.f32 %v4486_v7, %v1133_v36 }
 0x1ca   :  { %v1149_v19 = vadd.f32 %v4483_v10, %v1129_v55  ;;  %v1154_v18 = vadd.f32 %v4484_v52, %v1134_v34  ;;  %v1407_v63 = vstv %s3503_s10  ;;  %v1412_v53 = vstv %s3505_s14  ;;  %v1260_v15 = vpop.permute.xlu0 %1259  ;;  %s3813_s10 = sld [smem:[#allocation2 + $0x35]]  ;;  %s3815_s14 = sld [smem:[#allocation2 + $0x59]] }
 0x1cb   :  { %v1417_v39 = vstv %s3507_s3  ;;  %v1422_v14 = vstv %s3509_s20  ;;  %v1159_v22 = vadd.f32 %v4487_v35, %v1139_v62  ;;  %v1158_v42 = vadd.f32 %v4488_v40, %v1138_v33  ;;  %s3827_s3 = sld [smem:[#allocation2 + $0x7d]]  ;;  %s3829_s20 = sld [smem:[#allocation2 + $0xa1]] }
 0x1cc   :  { %v1207_v58 = vsel %vm447_vm4, %v1204_v46, %v1206_v60  ;;  %v1208_v21 = vsel %vm447_vm4, %v1206_v60, %v1204_v46  ;;  %v1164_v30 = vadd.f32 %v4490_v2, %v1144_v20  ;;  %v1169_v50 = vadd.f32 %v4491_v3, %v1149_v19  ;;  %v1262_v46 = vpop.permute.xlu1 %1261 }
 0x1cd   :  { %v1174_v38 = vadd.f32 %v4493_v12, %v1154_v18  ;;  %v1163_v13 = vadd.f32 %v4494_v17, %v1143_v56  ;;  %v1168_v49 = vadd.f32 %v4495_v54, %v1148_v11  ;;  %v1173_v44 = vadd.f32 %v4496_v6, %v1153_v16 }
 0x1ce   :  { %v4497_v27 = vstv %s4260_s18  ;;  %v4499_v47 = vstv %s4261_s7  ;;  %v4501_v31 = vstv %s4489_s29  ;;  %v4504_v1 = vstv %s4492_s5  ;;  %s4506_s7 = sld [smem:[#allocation104_spill]]  ;;  %s4507_s18 = sld [smem:[#allocation107_spill]]  ;;  %v1288_v35 = vpop.permute.xlu0 %1287 }
 0x1cf   :  { %v1184_v43 = vmul.f32 %v4497_v27, %v3482_v26  ;;  %v4498_v23 = vmov %v4497_v27  ;;  %v1189_v24 = vmul.f32 %v4499_v47, %v3482_v26  ;;  %v4500_v29 = vmov %v4499_v47  ;;  %s3831_s29 = sld [smem:[#allocation2 + $0x3e]]  ;;  %s3833_s5 = sld [smem:[#allocation2 + $0x62]] }
 0x1d0   :  { %v1185_v60 = vmul.f32 %v4498_v23, %v3485_v59  ;;  %v1190_v61 = vmul.f32 %v4500_v29, %v3485_v59  ;;  %v1194_v28 = vmul.f32 %v4501_v31, %v3482_v26  ;;  %v4502_v48 = vmov %v4501_v31  ;;  %v1290_v16 = vpop.permute.xlu1 %1289 }
 0x1d1   :  { %v1195_v57 = vmul.f32 %v4502_v48, %v3485_v59  ;;  %v1186_v8 = vadd.f32 %v1184_v43, %v1158_v42  ;;  %v1199_v55 = vmul.f32 %v4504_v1, %v3482_v26  ;;  %v4505_v36 = vmov %v4504_v1 }
 0x1d2   :  { %v1187_v9 = vadd.f32 %v1185_v60, %v1159_v22  ;;  %v1200_v34 = vmul.f32 %v4505_v36, %v3485_v59  ;;  %v1209_v62 = vmul.f32 %v1207_v58, %v2158_v41  ;;  %v1210_v32 = vmul.f32 %v1208_v21, %v2169_v45 }
 0x1d3   :  { %v1235_v20 = vsel %vm447_vm4, %v1232_v0, %v1234_v25  ;;  %v1236_v5 = vsel %vm447_vm4, %v1234_v25, %v1232_v0  ;;  %v1191_v33 = vadd.f32 %v1189_v24, %v1163_v13  ;;  %v1192_v51 = vadd.f32 %v1190_v61, %v1164_v30 }
 0x1d4   :  { %v1196_v26 = vadd.f32 %v1194_v28, %v1168_v49  ;;  %v1197_v56 = vadd.f32 %v1195_v57, %v1169_v50  ;;  %v1201_v10 = vadd.f32 %v1199_v55, %v1173_v44  ;;  %v1202_v59 = vadd.f32 %v1200_v34, %v1174_v38 }
 0x1d5   :  { %v1237_v19 = vmul.f32 %v1235_v20, %v2158_v41  ;;  %v1238_v52 = vmul.f32 %v1236_v5, %v2169_v45  ;;  %v4509_v18 = vstv %s4503_s13  ;;  %v1263_v25 = vsel %vm447_vm4, %v1260_v15, %v1262_v46  ;;  %v1316_v20 = vpop.permute.xlu0 %1315  ;;  %s3841_s13 = sld [smem:[#allocation2 + $0x86]] }
 0x1d6   :  { %v1212_v37 = vmul.f32 %v4509_v18, %v1209_v62  ;;  %v4510_v11 = vmov %v4509_v18  ;;  %v1264_v0 = vsel %vm447_vm4, %v1262_v46, %v1260_v15  ;;  %v4511_v22 = vstv %s4506_s7  ;;  %s3843_s7 = sld [smem:[#allocation2 + $0xaa]] }
 0x1d7   :  { %v1213_v7 = vmul.f32 %v4510_v11, %v1210_v32  ;;  %v1217_v40 = vmul.f32 %v4511_v22, %v1209_v62  ;;  %v4512_v42 = vmov %v4511_v22  ;;  %v4513_v21 = vstv %s4507_s18  ;;  %s3849_s18 = sld [smem:[#allocation2 + $0x47]] }
 0x1d8   :  { %v1218_v58 = vmul.f32 %v4512_v42, %v1210_v32  ;;  %v1222_v2 = vmul.f32 %v4513_v21, %v1209_v62  ;;  %v4514_v30 = vmov %v4513_v21  ;;  %v1214_v50 = vadd.f32 %v1212_v37, %v1186_v8 }
 0x1d9   :  { %v1223_v3 = vmul.f32 %v4514_v30, %v1210_v32  ;;  %v1215_v12 = vadd.f32 %v1213_v7, %v1187_v9  ;;  %v4515_v38 = vstv %s4508_s15  ;;  %v1219_v49 = vadd.f32 %v1217_v40, %v1191_v33  ;;  %v4530_v40 = vld [vmem:[#allocation20_spill] sm:$0xff]  ;;  %s3851_s15 = sld [smem:[#allocation2 + $0x6b]] }
 0x1da   :  { %v1227_v17 = vmul.f32 %v4515_v38, %v1209_v62  ;;  %v4516_v13 = vmov %v4515_v38  ;;  %v1220_v6 = vadd.f32 %v1218_v58, %v1192_v51  ;;  %v1224_v44 = vadd.f32 %v1222_v2, %v1196_v26 }
 0x1db   :  { %v1228_v54 = vmul.f32 %v4516_v13, %v1210_v32  ;;  %v1225_v27 = vadd.f32 %v1223_v3, %v1197_v56  ;;  %v4517_v60 = vstv %s2969_s8  ;;  %v4519_v24 = vstv %s2971_s23  ;;  %v1318_v32 = vpop.permute.xlu1 %1317  ;;  %s4535_s23 = sld [smem:[#allocation112_spill]] }
 0x1dc   :  { %v1229_v43 = vadd.f32 %v1227_v17, %v1201_v10  ;;  %v1240_v46 = vmul.f32 %v4517_v60, %v1237_v19  ;;  %v4518_v15 = vmov %v4517_v60  ;;  %v1245_v29 = vmul.f32 %v4519_v24, %v1237_v19  ;;  %s3793_s8 = sld [smem:[#allocation2 + $0x2c]] }
 0x1dd   :  { %v1230_v23 = vadd.f32 %v1228_v54, %v1202_v59  ;;  %v1241_v47 = vmul.f32 %v4518_v15, %v1238_v52  ;;  %v4520_v61 = vmov %v4519_v24  ;;  %v4521_v28 = vstv %s2977_s25  ;;  %s4525_s25 = sld [smem:[#allocation26_spill]] }
 0x1de   :  { %v1246_v31 = vmul.f32 %v4520_v61, %v1238_v52  ;;  %v1250_v48 = vmul.f32 %v4521_v28, %v1237_v19  ;;  %v4522_v57 = vmov %v4521_v28  ;;  %v1242_v9 = vadd.f32 %v1240_v46, %v1214_v50 }
 0x1df   :  { %v1251_v8 = vmul.f32 %v4522_v57, %v1238_v52  ;;  %v1243_v1 = vadd.f32 %v1241_v47, %v1215_v12  ;;  %v4523_v55 = vstv %s2979_s17  ;;  %v1265_v5 = vmul.f32 %v1263_v25, %v2158_v41  ;;  %s4532_s17 = sld [smem:[#allocation111_spill]]  ;;  %v1346_v54 = vpop.permute.xlu1 %1345 }
 0x1e0   :  { %v1255_v36 = vmul.f32 %v4523_v55, %v1237_v19  ;;  %v4524_v34 = vmov %v4523_v55  ;;  %v1266_v33 = vmul.f32 %v1264_v0, %v2169_v45  ;;  %v1291_v51 = vsel %vm487_vm5, %v1288_v35, %v1290_v16 }
 0x1e1   :  { %v1256_v62 = vmul.f32 %v4524_v34, %v1238_v52  ;;  %v1292_v26 = vsel %vm487_vm5, %v1290_v16, %v1288_v35  ;;  %v1247_v56 = vadd.f32 %v1245_v29, %v1219_v49  ;;  %v1248_v10 = vadd.f32 %v1246_v31, %v1220_v6  ;;  %v4531_v16 = vld [vmem:[#allocation21_spill] sm:$0xff]  ;;  %v1344_v49 = vpop.permute.xlu0 %1343 }
 0x1e2   :  { %v1252_v59 = vadd.f32 %v1250_v48, %v1224_v44  ;;  %v1253_v19 = vadd.f32 %v1251_v8, %v1225_v27  ;;  %v4526_v52 = vstv %s2985_s22  ;;  %v4528_v11 = vstv %s2987_s30  ;;  %s3767_s30 = sld [smem:[#allocation2 + $0x46]]  ;;  %s3769_s22 = sld [smem:[#allocation2 + $0x6a]] }
 0x1e3   :  { %v1268_v18 = vmul.f32 %v4526_v52, %v1265_v5  ;;  %v4527_v37 = vmov %v4526_v52  ;;  %v1273_v45 = vmul.f32 %v4528_v11, %v1265_v5  ;;  %v4529_v7 = vmov %v4528_v11 }
 0x1e4   :  { %v1269_v41 = vmul.f32 %v4527_v37, %v1266_v33  ;;  %v1274_v25 = vmul.f32 %v4529_v7, %v1266_v33  ;;  %v1257_v0 = vadd.f32 %v1255_v36, %v1229_v43  ;;  %v1258_v22 = vadd.f32 %v1256_v62, %v1230_v23 }
 0x1e5   :  { %v1293_v42 = vmul.f32 %v1291_v51, %v4530_v40  ;;  %v1294_v35 = vmul.f32 %v1292_v26, %v4531_v16  ;;  %v4533_v58 = vstv %s3005_s21  ;;  %v4536_v3 = vstv %s4525_s25  ;;  %v1372_v37 = vpop.permute.xlu0 %1371  ;;  %s3749_s21 = sld [smem:[#allocation2 + $0x61]]  ;;  %s1956_s25 = smov [#allocation9]  }
 0x1e6   :  { %v1278_v21 = vmul.f32 %v4533_v58, %v1265_v5  ;;  %v4534_v2 = vmov %v4533_v58  ;;  %v1283_v50 = vmul.f32 %v4536_v3, %v1265_v5  ;;  %v4537_v12 = vmov %v4536_v3 }
 0x1e7   :  { %v1279_v30 = vmul.f32 %v4534_v2, %v1266_v33  ;;  %v1284_v38 = vmul.f32 %v4537_v12, %v1266_v33  ;;  %v1319_v17 = vsel %vm487_vm5, %v1316_v20, %v1318_v32  ;;  %v1320_v13 = vsel %vm487_vm5, %v1318_v32, %v1316_v20 }
 0x1e8   :  { %v1435_v6 = vstv %s3607_s19  ;;  %v1440_v44 = vstv %s3609_s24  ;;  %v1270_v27 = vadd.f32 %v1268_v18, %v1242_v9  ;;  %v1271_v43 = vadd.f32 %v1269_v41, %v1243_v1  ;;  %v1374_v18 = vpop.permute.xlu1 %1373  ;;  %s3863_s19 = sld [smem:[#allocation2 + $0x8f]]  ;;  %s3865_s24 = sld [smem:[#allocation2 + $0xb3]] }
 0x1e9   :  { %v1275_v23 = vadd.f32 %v1273_v45, %v1247_v56  ;;  %v1276_v60 = vadd.f32 %v1274_v25, %v1248_v10  ;;  %v4538_v46 = vstv %s4532_s17  ;;  %v4540_v29 = vstv %s4535_s23  ;;  %s1645_s17 = sshll.u32 %s1956_s25, 4  ;;  %s1646_s17 = int_to_ptr.vmem [resolvable:$true] %s1645_s17 }
 0x1ea   :  { %v1296_v15 = vmul.f32 %v4538_v46, %v1293_v42  ;;  %v4539_v47 = vmov %v4538_v46  ;;  %v1301_v61 = vmul.f32 %v4540_v29, %v1293_v42  ;;  %v4541_v31 = vmov %v4540_v29  ;;  %s1914_s23 = scalar_lea.vmem %s1646_s17, 1024  ;;  %p1919_p6 = scmp.lt.s32.totalorder %s1646_s17, %s1646_s17 }
 0x1eb   :  { %v1297_v24 = vmul.f32 %v4539_v47, %v1294_v35  ;;  %v1302_v28 = vmul.f32 %v4541_v31, %v1294_v35  ;;  %v1280_v48 = vadd.f32 %v1278_v21, %v1252_v59  ;;  %v1281_v57 = vadd.f32 %v1279_v30, %v1253_v19  ;;  %p1915_p5 = scmp.ne.s32.totalorder %s1646_s17, %s1914_s23  ;;  %p1920_p7 = scmp.lt.s32.totalorder %s1914_s23, %s1914_s23 }
 0x1ec   :  { %v1285_v8 = vadd.f32 %v1283_v50, %v1257_v0  ;;  %v1286_v55 = vadd.f32 %v1284_v38, %v1258_v22  ;;  %v4542_v36 = vstv %s3021_s28  ;;  %v4544_v62 = vstv %s3023_s9  ;;  %s3697_s9 = sld [smem:[#allocation2 + $0x7c]]  ;;  %s3757_s28 = sld [smem:[#allocation2 + $0xa9]] }
 0x1ed   :  { %v1306_v34 = vmul.f32 %v4542_v36, %v1293_v42  ;;  %v4543_v9 = vmov %v4542_v36  ;;  %v1311_v32 = vmul.f32 %v4544_v62, %v1293_v42  ;;  %v4545_v20 = vmov %v4544_v62  ;;  %v1400_v36 = vpop.permute.xlu0 %1399  ;;  %p1921_p8 = por %p1920_p7, %p1919_p6 }
 0x1ee   :  { %v1307_v1 = vmul.f32 %v4543_v9, %v1294_v35  ;;  %v1312_v5 = vmul.f32 %v4545_v20, %v1294_v35  ;;  %v1321_v33 = vmul.f32 %v1319_v17, %v4530_v40  ;;  %v1322_v51 = vmul.f32 %v1320_v13, %v4531_v16 }
 0x1ef   :  { %v1347_v26 = vsel %vm487_vm5, %v1344_v49, %v1346_v54  ;;  %v1348_v56 = vsel %vm487_vm5, %v1346_v54, %v1344_v49  ;;  %v1298_v10 = vadd.f32 %v1296_v15, %v1270_v27  ;;  %v1299_v59 = vadd.f32 %v1297_v24, %v1271_v43  ;;  %p1922_p9 = pnand %p1921_p8, %p1915_p5 }
 0x1f0   :  { %v1303_v19 = vadd.f32 %v1301_v61, %v1275_v23  ;;  %v1304_v52 = vadd.f32 %v1302_v28, %v1276_v60  ;;  %v4546_v41 = vstv %s4282_s27  ;;  %v4548_v25 = vstv %s4283_s16  ;;  %s4565_s27 = sld [smem:[#allocation97_spill]]  ;;  %s3811_s16 = sld [smem:[#allocation2 + $0x98]] }
 0x1f1   :  { %v1324_v11 = vmul.f32 %v4546_v41, %v1321_v33  ;;  %v4547_v45 = vmov %v4546_v41  ;;  %v1329_v0 = vmul.f32 %v4548_v25, %v1321_v33  ;;  %v4549_v22 = vmov %v4548_v25 }
 0x1f2   :  { %v1325_v7 = vmul.f32 %v4547_v45, %v1322_v51  ;;  %v1330_v42 = vmul.f32 %v4549_v22, %v1322_v51  ;;  %v1308_v35 = vadd.f32 %v1306_v34, %v1280_v48  ;;  %v1309_v58 = vadd.f32 %v1307_v1, %v1281_v57 }
 0x1f3   :  { %v1349_v21 = vmul.f32 %v1347_v26, %v4530_v40  ;;  %v1350_v2 = vmul.f32 %v1348_v56, %v4531_v16  ;;  %v4550_v30 = vstv %s4284_s11  ;;  %v4552_v38 = vstv %s4285_s2  ;;  %s3699_s11 = sld [smem:[#allocation2 + $0xa0]]  ;;  %s3809_s2 = sld [smem:[#allocation2 + $0x74]] }
 0x1f4   :  { %v1334_v3 = vmul.f32 %v4550_v30, %v1321_v33  ;;  %v4551_v50 = vmov %v4550_v30  ;;  %v1339_v17 = vmul.f32 %v4552_v38, %v1321_v33  ;;  %v4553_v13 = vmov %v4552_v38  ;;  %v1428_v38 = vpop.permute.xlu0 %1427 }
 0x1f5   :  { %v1335_v12 = vmul.f32 %v4551_v50, %v1322_v51  ;;  %v1340_v54 = vmul.f32 %v4553_v13, %v1322_v51  ;;  %v1313_v49 = vadd.f32 %v1311_v32, %v1285_v8  ;;  %v1314_v27 = vadd.f32 %v1312_v5, %v1286_v55  ;;  %v1402_v55 = vpop.permute.xlu1 %1401 }
 0x1f6   :  { %v1375_v43 = vsel %vm487_vm5, %v1372_v37, %v1374_v18  ;;  %v1376_v23 = vsel %vm487_vm5, %v1374_v18, %v1372_v37  ;;  %v1326_v60 = vadd.f32 %v1324_v11, %v1298_v10  ;;  %v1327_v46 = vadd.f32 %v1325_v7, %v1299_v59 }
 0x1f7   :  { %v1331_v15 = vadd.f32 %v1329_v0, %v1303_v19  ;;  %v1332_v47 = vadd.f32 %v1330_v42, %v1304_v52  ;;  %v4554_v24 = vstv %s3057_s0  ;;  %v4556_v28 = vstv %s3059_s6  ;;  %v4567_v42 = vld [vmem:[#allocation23_spill] sm:$0xff]  ;;  %s3787_s6 = sld [smem:[#allocation2 + $0xb2]]  ;;  %s3795_s0 = sld [smem:[#allocation2 + $0x50]] }
 0x1f8   :  { %v1352_v29 = vmul.f32 %v4554_v24, %v1349_v21  ;;  %v4555_v61 = vmov %v4554_v24  ;;  %v1357_v48 = vmul.f32 %v4556_v28, %v1349_v21  ;;  %v4557_v57 = vmov %v4556_v28 }
 0x1f9   :  { %v1353_v31 = vmul.f32 %v4555_v61, %v1350_v2  ;;  %v1358_v8 = vmul.f32 %v4557_v57, %v1350_v2  ;;  %v1336_v34 = vadd.f32 %v1334_v3, %v1308_v35  ;;  %v1337_v9 = vadd.f32 %v1335_v12, %v1309_v58  ;;  %v1430_v12 = vpop.permute.xlu1 %1429 }
 0x1fa   :  { %v1341_v1 = vadd.f32 %v1339_v17, %v1313_v49  ;;  %v1342_v62 = vadd.f32 %v1340_v54, %v1314_v27  ;;  %v4558_v32 = vstv %s3065_s1  ;;  %v4560_v51 = vstv %s3067_s4  ;;  %s4562_s1 = sld [smem:[#allocation96_spill]]  ;;  %s3785_s4 = sld [smem:[#allocation2 + $0x8e]] }
 0x1fb   :  { %v1362_v20 = vmul.f32 %v4558_v32, %v1349_v21  ;;  %v4559_v5 = vmov %v4558_v32  ;;  %v1367_v26 = vmul.f32 %v4560_v51, %v1349_v21  ;;  %v4561_v56 = vmov %v4560_v51 }
 0x1fc   :  { %v1363_v33 = vmul.f32 %v4559_v5, %v1350_v2  ;;  %v1368_v10 = vmul.f32 %v4561_v56, %v1350_v2  ;;  %v1377_v59 = vmul.f32 %v1375_v43, %v4530_v40  ;;  %v1378_v19 = vmul.f32 %v1376_v23, %v4531_v16  ;;  %v4566_v16 = vld [vmem:[#allocation22_spill] sm:$0xff]  ;;  %v1456_v5 = vpop.permute.xlu0 %1455 }
 0x1fd   :  { %v1403_v52 = vsel %vm527_vm6, %v1400_v36, %v1402_v55  ;;  %v1404_v18 = vsel %vm527_vm6, %v1402_v55, %v1400_v36  ;;  %v1354_v37 = vadd.f32 %v1352_v29, %v1326_v60  ;;  %v1355_v41 = vadd.f32 %v1353_v31, %v1327_v46 }
 0x1fe   :  { %v1359_v11 = vadd.f32 %v1357_v48, %v1331_v15  ;;  %v1360_v45 = vadd.f32 %v1358_v8, %v1332_v47  ;;  %v4563_v7 = vstv %s3073_s12  ;;  %v1405_v22 = vmul.f32 %v1403_v52, %v4566_v16  ;;  %s3755_s12 = sld [smem:[#allocation2 + $0x85]] }
 0x1ff   :  { %v1380_v25 = vmul.f32 %v4563_v7, %v1377_v59  ;;  %v4564_v0 = vmov %v4563_v7  ;;  %v1406_v35 = vmul.f32 %v1404_v18, %v4567_v42  ;;  %v1364_v58 = vadd.f32 %v1362_v20, %v1336_v34  ;;  %v1458_v20 = vpop.permute.xlu1 %1457 }
 0x200   :  { %v1381_v40 = vmul.f32 %v4564_v0, %v1378_v19  ;;  %v1365_v21 = vadd.f32 %v1363_v33, %v1337_v9  ;;  %v4568_v2 = vstv %s3075_s26  ;;  %v1369_v17 = vadd.f32 %v1367_v26, %v1341_v1  ;;  %s3747_s26 = sld [smem:[#allocation2 + $0x3d]] }
 0x201   :  { %v1385_v30 = vmul.f32 %v4568_v2, %v1377_v59  ;;  %v4569_v3 = vmov %v4568_v2  ;;  %v1370_v13 = vadd.f32 %v1368_v10, %v1342_v62  ;;  %v1445_v54 = vstv %s3697_s9 }
 0x202   :  { %v1386_v50 = vmul.f32 %v4569_v3, %v1378_v19  ;;  %v1450_v49 = vstv %s3699_s11  ;;  %v4570_v27 = vstv %s4562_s1  ;;  %v4572_v46 = vstv %s4565_s27 }
 0x203   :  { %v1390_v43 = vmul.f32 %v4570_v27, %v1377_v59  ;;  %v4571_v23 = vmov %v4570_v27  ;;  %v1395_v15 = vmul.f32 %v4572_v46, %v1377_v59  ;;  %v4573_v47 = vmov %v4572_v46  ;;  %v1486_v2 = vpop.permute.xlu1 %1485 }
 0x204   :  { %v1391_v60 = vmul.f32 %v4571_v23, %v1378_v19  ;;  %v1396_v24 = vmul.f32 %v4573_v47, %v1378_v19  ;;  %v1382_v29 = vadd.f32 %v1380_v25, %v1354_v37  ;;  %v1383_v61 = vadd.f32 %v1381_v40, %v1355_v41 }
 0x205   :  { %v1408_v31 = vmul.f32 %v1407_v63, %v1405_v22  ;;  %v1409_v28 = vmul.f32 %v1407_v63, %v1406_v35  ;;  %v1387_v48 = vadd.f32 %v1385_v30, %v1359_v11  ;;  %v1388_v57 = vadd.f32 %v1386_v50, %v1360_v45  ;;  %v1484_v30 = vpop.permute.xlu0 %1483 }
 0x206   :  { %v1413_v8 = vmul.f32 %v1412_v53, %v1405_v22  ;;  %v1414_v55 = vmul.f32 %v1412_v53, %v1406_v35  ;;  %v1418_v36 = vmul.f32 %v1417_v39, %v1405_v22  ;;  %v1419_v34 = vmul.f32 %v1417_v39, %v1406_v35 }
 0x207   :  { %v1423_v63 = vmul.f32 %v1422_v14, %v1405_v22  ;;  %v1424_v9 = vmul.f32 %v1422_v14, %v1406_v35  ;;  %v1392_v1 = vadd.f32 %v1390_v43, %v1364_v58  ;;  %v1393_v62 = vadd.f32 %v1391_v60, %v1365_v21 }
 0x208   :  { %v1397_v32 = vadd.f32 %v1395_v15, %v1369_v17  ;;  %v1398_v53 = vadd.f32 %v1396_v24, %v1370_v13  ;;  %v1410_v33 = vadd.f32 %v1408_v31, %v1382_v29  ;;  %v1411_v51 = vadd.f32 %v1409_v28, %v1383_v61 }
 0x209   :  { %v1431_v39 = vsel %vm527_vm6, %v1428_v38, %v1430_v12  ;;  %v1432_v14 = vsel %vm527_vm6, %v1430_v12, %v1428_v38  ;;  %v1415_v26 = vadd.f32 %v1413_v8, %v1387_v48  ;;  %v1416_v56 = vadd.f32 %v1414_v55, %v1388_v57  ;;  %v1514_v55 = vpop.permute.xlu1 %1513 }
 0x20a   :  { %v1433_v10 = vmul.f32 %v1431_v39, %v4566_v16  ;;  %v1434_v59 = vmul.f32 %v1432_v14, %v4567_v42  ;;  %v1420_v19 = vadd.f32 %v1418_v36, %v1392_v1  ;;  %v1421_v52 = vadd.f32 %v1419_v34, %v1393_v62  ;;  %v1512_v36 = vpop.permute.xlu0 %1511 }
 0x20b   :  { %v1425_v18 = vadd.f32 %v1423_v63, %v1397_v32  ;;  %v1426_v37 = vadd.f32 %v1424_v9, %v1398_v53  ;;  %v1459_v45 = vsel %vm527_vm6, %v1456_v5, %v1458_v20  ;;  %v1460_v7 = vsel %vm527_vm6, %v1458_v20, %v1456_v5 }
 0x20c   :  { %v1436_v41 = vmul.f32 %v1435_v6, %v1433_v10  ;;  %v1437_v11 = vmul.f32 %v1435_v6, %v1434_v59  ;;  %v1441_v25 = vmul.f32 %v1440_v44, %v1433_v10  ;;  %v1442_v0 = vmul.f32 %v1440_v44, %v1434_v59 }
 0x20d   :  { %v1446_v40 = vmul.f32 %v1445_v54, %v1433_v10  ;;  %v1447_v22 = vmul.f32 %v1445_v54, %v1434_v59  ;;  %v1463_v6 = vstv %s3747_s26  ;;  %v1468_v35 = vstv %s3749_s21 }
 0x20e   :  { %v1473_v58 = vstv %s3755_s12  ;;  %v1478_v21 = vstv %s3757_s28  ;;  %v1451_v3 = vmul.f32 %v1450_v49, %v1433_v10  ;;  %v1452_v50 = vmul.f32 %v1450_v49, %v1434_v59 }
 0x20f   :  { %v1491_v12 = vstv %s3767_s30  ;;  %v1496_v38 = vstv %s3769_s22  ;;  %v1438_v17 = vadd.f32 %v1436_v41, %v1410_v33  ;;  %v1439_v13 = vadd.f32 %v1437_v11, %v1411_v51  ;;  %v1542_v11 = vpop.permute.xlu1 %1541 }
 0x210   :  { %v1461_v44 = vmul.f32 %v1459_v45, %v4566_v16  ;;  %v1462_v54 = vmul.f32 %v1460_v7, %v4567_v42  ;;  %v1443_v27 = vadd.f32 %v1441_v25, %v1415_v26  ;;  %v1444_v43 = vadd.f32 %v1442_v0, %v1416_v56  ;;  %v1540_v45 = vpop.permute.xlu0 %1539 }
 0x211   :  { %v1448_v23 = vadd.f32 %v1446_v40, %v1420_v19  ;;  %v1449_v60 = vadd.f32 %v1447_v22, %v1421_v52  ;;  %v1487_v47 = vsel %vm527_vm6, %v1484_v30, %v1486_v2  ;;  %v1488_v49 = vsel %vm527_vm6, %v1486_v2, %v1484_v30 }
 0x212   :  { %v1464_v46 = vmul.f32 %v1463_v6, %v1461_v44  ;;  %v1465_v15 = vmul.f32 %v1463_v6, %v1462_v54  ;;  %v1469_v24 = vmul.f32 %v1468_v35, %v1461_v44  ;;  %v1470_v29 = vmul.f32 %v1468_v35, %v1462_v54  ;;  %v4574_v35 = vld [vmem:[#allocation24_spill] sm:$0xff] }
 0x213   :  { %v1474_v61 = vmul.f32 %v1473_v58, %v1461_v44  ;;  %v1475_v31 = vmul.f32 %v1473_v58, %v1462_v54  ;;  %v1453_v28 = vadd.f32 %v1451_v3, %v1425_v18  ;;  %v1454_v48 = vadd.f32 %v1452_v50, %v1426_v37 }
 0x214   :  { %v1501_v57 = vstv %s3785_s4  ;;  %v1506_v8 = vstv %s3787_s6  ;;  %v1479_v34 = vmul.f32 %v1478_v21, %v1461_v44  ;;  %v1480_v63 = vmul.f32 %v1478_v21, %v1462_v54  ;;  %v4575_v21 = vld [vmem:[#allocation25_spill] sm:$0xff] }
 0x215   :  { %v1519_v9 = vstv %s3793_s8  ;;  %v1524_v1 = vstv %s3795_s0  ;;  %v1466_v62 = vadd.f32 %v1464_v46, %v1438_v17  ;;  %v1467_v32 = vadd.f32 %v1465_v15, %v1439_v13 }
 0x216   :  { %v1489_v53 = vmul.f32 %v1487_v47, %v4566_v16  ;;  %v1490_v20 = vmul.f32 %v1488_v49, %v4567_v42  ;;  %v1471_v5 = vadd.f32 %v1469_v24, %v1443_v27  ;;  %v1472_v33 = vadd.f32 %v1470_v29, %v1444_v43  ;;  %v1570_v49 = vpop.permute.xlu1 %1569  ;;  %v1568_v24 = vpop.permute.xlu0 %1567 }
 0x217   :  { %v1476_v51 = vadd.f32 %v1474_v61, %v1448_v23  ;;  %v1477_v39 = vadd.f32 %v1475_v31, %v1449_v60  ;;  %v1515_v56 = vsel %vm567_vm7, %v1512_v36, %v1514_v55  ;;  %v1516_v10 = vsel %vm567_vm7, %v1514_v55, %v1512_v36 }
 0x218   :  { %v1492_v14 = vmul.f32 %v1491_v12, %v1489_v53  ;;  %v1493_v26 = vmul.f32 %v1491_v12, %v1490_v20  ;;  %v1497_v16 = vmul.f32 %v1496_v38, %v1489_v53  ;;  %v1498_v42 = vmul.f32 %v1496_v38, %v1490_v20 }
 0x219   :  { %v1502_v59 = vmul.f32 %v1501_v57, %v1489_v53  ;;  %v1503_v19 = vmul.f32 %v1501_v57, %v1490_v20  ;;  %v1481_v52 = vadd.f32 %v1479_v34, %v1453_v28  ;;  %v1482_v18 = vadd.f32 %v1480_v63, %v1454_v48 }
 0x21a   :  { %v1529_v37 = vstv %s3809_s2  ;;  %v1534_v41 = vstv %s3811_s16  ;;  %v1507_v7 = vmul.f32 %v1506_v8, %v1489_v53  ;;  %v1508_v25 = vmul.f32 %v1506_v8, %v1490_v20 }
 0x21b   :  { %v1547_v0 = vstv %s3813_s10  ;;  %v1552_v40 = vstv %s3815_s14  ;;  %v1494_v22 = vadd.f32 %v1492_v14, %v1466_v62  ;;  %v1495_v6 = vadd.f32 %v1493_v26, %v1467_v32  ;;  %v1598_v26 = vpop.permute.xlu1 %1597 }
 0x21c   :  { %v1517_v58 = vmul.f32 %v1515_v56, %v4574_v35  ;;  %v1518_v2 = vmul.f32 %v1516_v10, %v4575_v21  ;;  %v1499_v30 = vadd.f32 %v1497_v16, %v1471_v5  ;;  %v1500_v3 = vadd.f32 %v1498_v42, %v1472_v33  ;;  %v1596_v16 = vpop.permute.xlu0 %1595 }
 0x21d   :  { %v1504_v50 = vadd.f32 %v1502_v59, %v1476_v51  ;;  %v1505_v12 = vadd.f32 %v1503_v19, %v1477_v39  ;;  %v1543_v13 = vsel %vm567_vm7, %v1540_v45, %v1542_v11  ;;  %v1544_v44 = vsel %vm567_vm7, %v1542_v11, %v1540_v45 }
 0x21e   :  { %v1520_v38 = vmul.f32 %v1519_v9, %v1517_v58  ;;  %v1521_v17 = vmul.f32 %v1519_v9, %v1518_v2  ;;  %v1525_v54 = vmul.f32 %v1524_v1, %v1517_v58  ;;  %v1526_v27 = vmul.f32 %v1524_v1, %v1518_v2 }
 0x21f   :  { %v1530_v43 = vmul.f32 %v1529_v37, %v1517_v58  ;;  %v1531_v23 = vmul.f32 %v1529_v37, %v1518_v2  ;;  %v1509_v60 = vadd.f32 %v1507_v7, %v1481_v52  ;;  %v1510_v46 = vadd.f32 %v1508_v25, %v1482_v18 }
 0x220   :  { %v1535_v15 = vmul.f32 %v1534_v41, %v1517_v58  ;;  %v1536_v47 = vmul.f32 %v1534_v41, %v1518_v2  ;;  %v1557_v29 = vstv %s3827_s3  ;;  %v1562_v61 = vstv %s3829_s20 }
 0x221   :  { %v1575_v31 = vstv %s3831_s29  ;;  %v1580_v28 = vstv %s3833_s5  ;;  %v1522_v48 = vadd.f32 %v1520_v38, %v1494_v22  ;;  %v1523_v57 = vadd.f32 %v1521_v17, %v1495_v6 }
 0x222   :  { %v1545_v8 = vmul.f32 %v1543_v13, %v4574_v35  ;;  %v1546_v55 = vmul.f32 %v1544_v44, %v4575_v21  ;;  %v1527_v36 = vadd.f32 %v1525_v54, %v1499_v30  ;;  %v1528_v34 = vadd.f32 %v1526_v27, %v1500_v3 }
 0x223   :  { %v1532_v63 = vadd.f32 %v1530_v43, %v1504_v50  ;;  %v1533_v9 = vadd.f32 %v1531_v23, %v1505_v12  ;;  %v1537_v1 = vadd.f32 %v1535_v15, %v1509_v60  ;;  %v1538_v62 = vadd.f32 %v1536_v47, %v1510_v46 }
 0x224   :  { %v1548_v32 = vmul.f32 %v1547_v0, %v1545_v8  ;;  %v1549_v53 = vmul.f32 %v1547_v0, %v1546_v55  ;;  %v1553_v20 = vmul.f32 %v1552_v40, %v1545_v8  ;;  %v1554_v5 = vmul.f32 %v1552_v40, %v1546_v55 }
 0x225   :  { %v1571_v33 = vsel %vm567_vm7, %v1568_v24, %v1570_v49  ;;  %v1572_v51 = vsel %vm567_vm7, %v1570_v49, %v1568_v24  ;;  %v1585_v39 = vstv %s3841_s13  ;;  %v1590_v14 = vstv %s3843_s7 }
 0x226   :  { %v1603_v56 = vstv %s3849_s18  ;;  %v1608_v10 = vstv %s3851_s15  ;;  %v1558_v42 = vmul.f32 %v1557_v29, %v1545_v8  ;;  %v1559_v59 = vmul.f32 %v1557_v29, %v1546_v55 }
 0x227   :  { %v1563_v19 = vmul.f32 %v1562_v61, %v1545_v8  ;;  %v1564_v52 = vmul.f32 %v1562_v61, %v1546_v55  ;;  %v1550_v18 = vadd.f32 %v1548_v32, %v1522_v48  ;;  %v1551_v37 = vadd.f32 %v1549_v53, %v1523_v57 }
 0x228   :  { %v1573_v41 = vmul.f32 %v1571_v33, %v4574_v35  ;;  %v1574_v11 = vmul.f32 %v1572_v51, %v4575_v21  ;;  %v1555_v45 = vadd.f32 %v1553_v20, %v1527_v36  ;;  %v1556_v7 = vadd.f32 %v1554_v5, %v1528_v34 }
 0x229   :  { %v1599_v25 = vsel %vm567_vm7, %v1596_v16, %v1598_v26  ;;  %v1600_v0 = vsel %vm567_vm7, %v1598_v26, %v1596_v16  ;;  %v1560_v12 = vadd.f32 %v1558_v42, %v1532_v63  ;;  %v1561_v38 = vadd.f32 %v1559_v59, %v1533_v9 }
 0x22a   :  { %v1576_v40 = vmul.f32 %v1575_v31, %v1573_v41  ;;  %v1577_v22 = vmul.f32 %v1575_v31, %v1574_v11  ;;  %v1581_v6 = vmul.f32 %v1580_v28, %v1573_v41  ;;  %v1582_v58 = vmul.f32 %v1580_v28, %v1574_v11 }
 0x22b   :  { %v1586_v2 = vmul.f32 %v1585_v39, %v1573_v41  ;;  %v1587_v30 = vmul.f32 %v1585_v39, %v1574_v11  ;;  %v1591_v3 = vmul.f32 %v1590_v14, %v1573_v41  ;;  %v1592_v50 = vmul.f32 %v1590_v14, %v1574_v11 }
 0x22c   :  { %v1565_v17 = vadd.f32 %v1563_v19, %v1537_v1  ;;  %v1566_v13 = vadd.f32 %v1564_v52, %v1538_v62  ;;  %v1578_v44 = vadd.f32 %v1576_v40, %v1550_v18  ;;  %v1579_v54 = vadd.f32 %v1577_v22, %v1551_v37 }
 0x22d   :  { %v1613_v27 = vstv %s3863_s19  ;;  %v1618_v43 = vstv %s3865_s24  ;;  %v1583_v4 = vadd.f32 %v1581_v6, %v1555_v45  ;;  %v1584_v23 = vadd.f32 %v1582_v58, %v1556_v7 }
 0x22e   :  { %v1601_v60 = vmul.f32 %v1599_v25, %v4574_v35  ;;  %v1602_v46 = vmul.f32 %v1600_v0, %v4575_v21  ;;  %v1588_v15 = vadd.f32 %v1586_v2, %v1560_v12  ;;  %v1589_v47 = vadd.f32 %v1587_v30, %v1561_v38 }
 0x22f   :  { %v1593_v49 = vadd.f32 %v1591_v3, %v1565_v17  ;;  %v1594_v24 = vadd.f32 %v1592_v50, %v1566_v13 }
 0x230   :  { %v1604_v29 = vmul.f32 %v1603_v56, %v1601_v60  ;;  %v1605_v61 = vmul.f32 %v1603_v56, %v1602_v46  ;;  %v1609_v31 = vmul.f32 %v1608_v10, %v1601_v60  ;;  %v1610_v28 = vmul.f32 %v1608_v10, %v1602_v46 }
 0x231   :  { %v1614_v48 = vmul.f32 %v1613_v27, %v1601_v60  ;;  %v1615_v57 = vmul.f32 %v1613_v27, %v1602_v46  ;;  %v1619_v8 = vmul.f32 %v1618_v43, %v1601_v60  ;;  %v1620_v55 = vmul.f32 %v1618_v43, %v1602_v46 }
 0x232   :  { %v1606_v36 = vadd.f32 %v1604_v29, %v1578_v44  ;;  %v1607_v34 = vadd.f32 %v1605_v61, %v1579_v54  ;;  %v1611_v63 = vadd.f32 %v1609_v31, %v1583_v4  ;;  %v1612_v9 = vadd.f32 %v1610_v28, %v1584_v23 }
 0x233   :  { %v1616_v35 = vadd.f32 %v1614_v48, %v1588_v15  ;;  %v1617_v21 = vadd.f32 %v1615_v57, %v1589_v47  ;;  %v1621_v1 = vadd.f32 %v1619_v8, %v1593_v49  ;;  %v1622_v62 = vadd.f32 %v1620_v55, %v1594_v24 }
 0x234   :  { %v1623_v32 = vmax.f32 %v1606_v36, 0.0  ;;  %v1624_v53 = vmax.f32 %v1607_v34, 0.0  ;;  %v1627_v20 = vmax.f32 %v1611_v63, 0.0  ;;  %v1628_v5 = vmax.f32 %v1612_v9, 0.0 }
 0x235   :  { %v1631_v33 = vmax.f32 %v1616_v35, 0.0  ;;  %v1632_v51 = vmax.f32 %v1617_v21, 0.0  ;;  %v1635_v39 = vmax.f32 %v1621_v1, 0.0  ;;  %v1636_v14 = vmax.f32 %v1622_v62, 0.0 }
 0x236   :  { %1625 = vst [vmem:[#allocation9] sm:$0xff] %v1623_v32  ;;  %1626 = vst [vmem:[#allocation9 + $0x8] sm:$0xff] %v1624_v53 }
 0x237   :  { %1629 = vst [vmem:[#allocation9 + $0x10] sm:$0xff] %v1627_v20  ;;  %1630 = vst [vmem:[#allocation9 + $0x18] sm:$0xff] %v1628_v5 }
 0x238   :  { %1633 = vst [vmem:[#allocation9 + $0x20] sm:$0xff] %v1631_v33  ;;  %1634 = vst [vmem:[#allocation9 + $0x28] sm:$0xff] %v1632_v51 }
 0x239   :  { %1637 = vst [vmem:[#allocation9 + $0x30] sm:$0xff] %v1635_v39  ;;  %1638 = vst [vmem:[#allocation9 + $0x38] sm:$0xff] %v1636_v14 }
 0x23a   :  { %1925 = shalt.err (!%p1922_p9)
}
 0x23b   :  { %s4576_s1 = sld [smem:[#allocation117_spill]] }
 0x241   :  { %s1926_s27 = scalar_lea.hbm %s4576_s1, 1024 }
 0x242   :  { %p1927_p10 = scmp.ne.s32.totalorder %s4576_s1, %s1926_s27  ;;  %p1930_p11 = scmp.lt.u32.totalorder %s1926_s27, %s4576_s1 }
 0x244   :  { %p1932_p12 = pnand %p1930_p11, %p1927_p10 }
 0x246   :  { %1935 = shalt.err (!%p1932_p12)
}
 0x247   :  { %1648 = dma.vmem_to_hbm [thread:$0]  %s1646_s17, 1024, %s4576_s1, [#allocation4]  }
 0x248   :  { %1942 = dma.done.wait [#allocation4], 1024  }
 0x249   :  { %1943 = vsyncadd [#allocation4], 4294966272 }
 0x24a   :  { %1652 = vsyncpa [#allocation3], 1 }
 0x24b   :  { %1653 = vsyncpa [#allocation8], 1 }
 0x24c   :  { %1654 = vsyncpa [#allocation4], 1 }
 0x24d   :  { %1655 = vsyncpa [#allocation5], 1 }

</bundles_post_ra>
